<compile_context>
chip_gen: v7x
topology: tpu7x:2x2x1
jax: 0.10.0
libtpu: 0.0.40
codegen_flags: <defaults>
</compile_context>

<pallas_src>
import math

import jax
import jax.numpy as jnp
from jax.experimental import pallas as pl
from jax.experimental.pallas import tpu as pltpu

LOG_2PI = math.log(2.0 * math.pi)
MIXTURE_WEIGHTS = (3.0 / 20.0, 3.0 / 4.0, 1.0 / 10.0)
LOG_W = tuple(math.log(w) for w in MIXTURE_WEIGHTS)
LN_EPS = 0.1                      # Encoder default eps
LOGVAR_UNIFORM = 10.0
STND_CONST = -0.5 * LOG_2PI + LOG_W[0]
UNIF_CONST = -0.5 * (LOGVAR_UNIFORM + LOG_2PI) + LOG_W[2]
UNIF_COEF = 0.5 * math.exp(-LOGVAR_UNIFORM)


def _round_up(n, m):
    return -(-n // m) * m


def _swish(v):
    return v * jax.nn.sigmoid(v)


def _per_generation_defaults():
    """(vmem_limit_bytes, default block_batch) chosen per TPU generation."""
    vmem_cap = 128 * 1024 * 1024
    try:
        info = pltpu.get_tpu_info()
        vmem_cap = int(getattr(info, "vmem_capacity_bytes", vmem_cap))
    except Exception:
        pass
    if vmem_cap <= 80 * 1024 * 1024:          # v7x-class: 64 MiB VMEM per TC
        return 56 * 1024 * 1024, 256
    return 100 * 1024 * 1024, 256             # v5e / v6e: 128 MiB physical
    # TODO(synk): on v5e (128x128 MXU) a default block_batch of 128 is enough;
    # chip-version detection is not relied on here.


def _make_kernel(hidden_real, latent_pad):
    inv_h = 1.0 / float(hidden_real)

    def kernel(x_ref, z_ref,
               w1_ref, w2_ref, w3_ref, w4_ref, w5_ref, whead_ref,
               pvec_ref, bhead_ref, out_ref, acc_ref, ss_ref):
        k = pl.program_id(1)

        @pl.when(k == 0)
        def _():
            acc_ref[...] = jnp.zeros_like(acc_ref)
            ss_ref[...] = jnp.zeros_like(ss_ref)

        # --- streaming first layer: accumulate x @ w1 and sum(x^2) over K ---
        xk = x_ref[...]                               # (TB, TK) weights dtype
        xk32 = xk.astype(jnp.float32)
        ss_ref[...] += jnp.sum(xk32 * xk32, axis=-1, keepdims=True)
        acc_ref[...] += jnp.dot(xk, w1_ref[...],
                                preferred_element_type=jnp.float32)

        @pl.when(k == pl.num_programs(1) - 1)
        def _():
            # Ref-view reads of the stacked per-layer vectors (no 16-row load).
            def b(i):
                return pvec_ref[i:i + 1, :]

            def g(i):
                return pvec_ref[5 + i:6 + i, :]

            def be(i):
                return pvec_ref[10 + i:11 + i, :]

            def fc(v, w_ref, bias):
                return jnp.dot(v.astype(w_ref.dtype), w_ref[...],
                               preferred_element_type=jnp.float32) + bias

            def layernorm(v, gamma, beta):
                # Padded hidden columns of v are exactly zero (zero-padded
                # weights/bias), so sums over the padded width equal sums over
                # the real width; divide by H_real.
                mean = jnp.sum(v, axis=-1, keepdims=True) * inv_h
                var = jnp.sum(v * v, axis=-1, keepdims=True) * inv_h - mean * mean
                return (v - mean) * jax.lax.rsqrt(var + LN_EPS) * gamma + beta

            # Row normalization applied after the matmul: (x/||x||)@W == (x@W)/||x||.
            inv_norm = jax.lax.rsqrt(jnp.maximum(ss_ref[...], 1e-12))
            pre1 = acc_ref[...] * inv_norm + b(0)

            h1 = layernorm(_swish(pre1), g(0), be(0))
            res = h1
            h2 = layernorm(_swish(fc(h1, w2_ref, b(1)) + res), g(1), be(1))
            res = res + h2
            h3 = layernorm(_swish(fc(h2, w3_ref, b(2)) + res), g(2), be(2))
            res = res + h3
            h4 = layernorm(_swish(fc(h3, w4_ref, b(3)) + res), g(3), be(3))
            res = res + h4
            h5 = layernorm(_swish(fc(h4, w5_ref, b(4)) + res), g(4), be(4))

            # Fused fc_mu / fc_logvar head (split at a 128-aligned boundary).
            head = fc(h5, whead_ref, bhead_ref[...])
            post_mu = head[:, :latent_pad]
            post_logvar = head[:, latent_pad:]

            # 3-component log-normal mixture + elementwise logsumexp.
            z = z_ref[...]
            zsq = z * z
            stnd = STND_CONST - 0.5 * zsq
            diff = z - post_mu
            post = (-0.5 * (post_logvar + LOG_2PI
                            + diff * diff * jnp.exp(-post_logvar)) + LOG_W[1])
            unif = UNIF_CONST - UNIF_COEF * zsq
            m = jnp.maximum(jnp.maximum(stnd, post), unif)
            out_ref[...] = m + jnp.log(
                jnp.exp(stnd - m) + jnp.exp(post - m) + jnp.exp(unif - m))

    return kernel


def prepare_params(params, *, weights_dtype=jnp.bfloat16, k_tile=2048):
    """One-time padding / casting / fusion of CompositePrior parameters.

    Call once and reuse the result; the hot path does no weight preprocessing.
    """
    D_in, H = params["w1"].shape
    L = params["wmu"].shape[1]
    f32 = jnp.float32

    H_pad = _round_up(H, 128)
    L_pad = _round_up(L, 128)
    TK = min(int(k_tile), _round_up(D_in, 128))      # K tile (multiple of 128)
    D_pad = _round_up(D_in, TK)                       # K grid divides evenly

    def pad_w(w, r, c):
        return jnp.pad(w.astype(f32), ((0, r - w.shape[0]), (0, c - w.shape[1])))

    prep = {
        "w1": pad_w(params["w1"], D_pad, H_pad).astype(weights_dtype),
        "w2": pad_w(params["w2"], H_pad, H_pad).astype(weights_dtype),
        "w3": pad_w(params["w3"], H_pad, H_pad).astype(weights_dtype),
        "w4": pad_w(params["w4"], H_pad, H_pad).astype(weights_dtype),
        "w5": pad_w(params["w5"], H_pad, H_pad).astype(weights_dtype),
        "whead": jnp.concatenate(
            [pad_w(params["wmu"], H_pad, L_pad),
             pad_w(params["wlv"], H_pad, L_pad)], axis=1).astype(weights_dtype),
        "bhead": jnp.concatenate(
            [jnp.pad(params["bmu"].astype(f32).reshape(1, -1),
                     ((0, 0), (0, L_pad - L))),
             jnp.pad(params["blv"].astype(f32).reshape(1, -1),
                     ((0, 0), (0, L_pad - L)))], axis=1),
    }

    # Stack the 15 tiny per-layer vectors into one (16, H_pad) array (1 DMA).
    rows = []
    for name in ("b", "g", "be"):
        for i in range(1, 6):
            rows.append(jnp.pad(params[f"{name}{i}"].astype(f32).reshape(1, -1),
                                ((0, 0), (0, H_pad - H))))
    rows.append(jnp.zeros((1, H_pad), f32))           # pad sublanes to 16
    prep["pvec"] = jnp.concatenate(rows, axis=0)

    prep["dims"] = (D_in, D_pad, H, H_pad, L, L_pad, TK)
    prep["weights_dtype"] = weights_dtype
    return prep


def composite_prior(x, z, prepared, *, block_batch=None, vmem_limit_bytes=None):
    """Pallas forward for CompositePrior.forward(x, z) using prepared params."""
    D_in, D_pad, H, H_pad, L, L_pad, TK = prepared["dims"]
    wdt = prepared["weights_dtype"]
    B = x.shape[0]
    assert x.shape[1] == D_in and z.shape[1] == L

    default_vmem, default_tb = _per_generation_defaults()
    if block_batch is None:
        block_batch = default_tb
    if vmem_limit_bytes is None:
        vmem_limit_bytes = default_vmem

    # Pad B only to a multiple of 8; the grid uses ceil-div (edge block masked).
    B_pad = _round_up(B, 8)
    TB = min(int(block_batch), B_pad)
    TB = max(8, (TB // 8) * 8)
    # Keep >= 2 batch tiles when possible so both v7x TensorCores get work.
    if (B_pad + TB - 1) // TB < 2 and B_pad >= 16 and (B_pad // 2) % 8 == 0:
        TB = B_pad // 2

    grid_m = (B_pad + TB - 1) // TB
    grid_k = D_pad // TK

    x_p = jnp.pad(x, ((0, B_pad - B), (0, D_pad - D_in))).astype(wdt)
    z_p = jnp.pad(z.astype(jnp.float32), ((0, B_pad - B), (0, L_pad - L)))

    def run(single_buffer_consts):
        def const_spec(shape):
            if single_buffer_consts:
                return pl.BlockSpec(shape, lambda i, k: (0, 0),
                                    pipeline_mode=pl.Buffered(1))
            return pl.BlockSpec(shape, lambda i, k: (0, 0))

        return pl.pallas_call(
            _make_kernel(H, L_pad),
            out_shape=jax.ShapeDtypeStruct((B_pad, L_pad), jnp.float32),
            grid=(grid_m, grid_k),
            in_specs=[
                pl.BlockSpec((TB, TK), lambda i, k: (i, k)),     # x (streamed K)
                pl.BlockSpec((TB, L_pad), lambda i, k: (i, 0)),  # z batch tile
                pl.BlockSpec((TK, H_pad), lambda i, k: (k, 0)),  # w1 K tile
                const_spec((H_pad, H_pad)),                      # w2
                const_spec((H_pad, H_pad)),                      # w3
                const_spec((H_pad, H_pad)),                      # w4
                const_spec((H_pad, H_pad)),                      # w5
                const_spec((H_pad, 2 * L_pad)),                  # fused head W
                const_spec((16, H_pad)),                         # bias/gamma/beta
                const_spec((1, 2 * L_pad)),                      # fused head bias
            ],
            out_specs=pl.BlockSpec((TB, L_pad), lambda i, k: (i, 0)),
            scratch_shapes=[
                pltpu.VMEM((TB, H_pad), jnp.float32),            # x@w1 accumulator
                pltpu.VMEM((TB, 1), jnp.float32),                # sum(x*x)
            ],
            compiler_params=pltpu.CompilerParams(
                dimension_semantics=("parallel", "arbitrary"),
                vmem_limit_bytes=int(vmem_limit_bytes),
            ),
        )(x_p, z_p, prepared["w1"], prepared["w2"], prepared["w3"],
          prepared["w4"], prepared["w5"], prepared["whead"],
          prepared["pvec"], prepared["bhead"])

    try:
        out = run(True)
    except Exception:
        # This JAX/Mosaic build rejects Buffered(1); fall back to default
        # double-buffering for the constant-index weight blocks.
        out = run(False)

    return out[:B, :L]


def make_params(key, input_dim, hidden_dim, latent_dim, dtype=jnp.float32):
    """Deterministic synthetic parameters (weights stored as (in, out))."""
    keys = jax.random.split(key, 16)
    p = {}
    dims_in = [input_dim, hidden_dim, hidden_dim, hidden_dim, hidden_dim]
    for i in range(5):
        p[f"w{i+1}"] = (0.1 * jax.random.normal(keys[i], (dims_in[i], hidden_dim))).astype(dtype)
        p[f"b{i+1}"] = (0.05 * jax.random.normal(keys[5 + i], (1, hidden_dim))).astype(dtype)
        p[f"g{i+1}"] = jnp.ones((1, hidden_dim), dtype)
        p[f"be{i+1}"] = jnp.zeros((1, hidden_dim), dtype)
    p["wmu"] = (0.1 * jax.random.normal(keys[10], (hidden_dim, latent_dim))).astype(dtype)
    p["bmu"] = (0.05 * jax.random.normal(keys[11], (1, latent_dim))).astype(dtype)
    p["wlv"] = (0.1 * jax.random.normal(keys[12], (hidden_dim, latent_dim))).astype(dtype)
    p["blv"] = (0.05 * jax.random.normal(keys[13], (1, latent_dim))).astype(dtype)
    return p


def composite_prior_reference(x, z, params):
    """Plain-JAX (f32) reference, matching the PyTorch module."""
    def swish(v):
        return v * jax.nn.sigmoid(v)

    def ln(v, g, b):
        mean = jnp.mean(v, -1, keepdims=True)
        var = jnp.mean((v - mean) ** 2, -1, keepdims=True)
        return (v - mean) / jnp.sqrt(var + LN_EPS) * g + b

    xn = x / jnp.sqrt(jnp.sum(x * x, -1, keepdims=True))
    h1 = ln(swish(xn @ params["w1"] + params["b1"]), params["g1"], params["be1"])
    h2 = ln(swish(h1 @ params["w2"] + params["b2"] + h1), params["g2"], params["be2"])
    h3 = ln(swish(h2 @ params["w3"] + params["b3"] + h1 + h2), params["g3"], params["be3"])
    h4 = ln(swish(h3 @ params["w4"] + params["b4"] + h1 + h2 + h3), params["g4"], params["be4"])
    h5 = ln(swish(h4 @ params["w5"] + params["b5"] + h1 + h2 + h3 + h4),
            params["g5"], params["be5"])
    post_mu = h5 @ params["wmu"] + params["bmu"]
    post_logvar = h5 @ params["wlv"] + params["blv"]

    def log_norm_pdf(zz, mu, logvar):
        return -0.5 * (logvar + LOG_2PI + (zz - mu) ** 2 / jnp.exp(logvar))

    stnd = log_norm_pdf(z, 0.0, jnp.zeros_like(z)) + LOG_W[0]
    post = log_norm_pdf(z, post_mu, post_logvar) + LOG_W[1]
    unif = log_norm_pdf(z, 0.0, jnp.full_like(z, LOGVAR_UNIFORM)) + LOG_W[2]
    dens = jnp.stack([stnd, post, unif], axis=-1)
    return jax.nn.logsumexp(dens, axis=-1)


if __name__ == "__main__":
    B, input_dim, hidden_dim, latent_dim = 16, 64, 32, 16

    key = jax.random.PRNGKey(0)
    kx, kz, kp = jax.random.split(key, 3)
    x = jax.random.normal(kx, (B, input_dim), jnp.float32)
    z = jax.random.normal(kz, (B, latent_dim), jnp.float32)
    params = make_params(kp, input_dim, hidden_dim, latent_dim)

    ref = composite_prior_reference(x, z, params)

    # One-time parameter preparation, hoisted out of the forward path.
    prep_f32 = prepare_params(params, weights_dtype=jnp.float32)
    prep_bf16 = prepare_params(params, weights_dtype=jnp.bfloat16)

    # f32-weight path: tight check of the kernel math (2-step batch grid).
    out_f32 = jax.block_until_ready(composite_prior(x, z, prep_f32, block_batch=8))
    # bf16-weight path (optimized default): loosened tolerance.
    out_bf16 = jax.block_until_ready(composite_prior(x, z, prep_bf16, block_batch=8))

    assert out_f32.shape == (B, latent_dim)
    assert out_bf16.shape == (B, latent_dim)
    assert jnp.allclose(out_f32, ref, rtol=1e-3, atol=1e-3), "f32 kernel mismatch vs reference"
    assert jnp.allclose(out_bf16, ref, rtol=6e-2, atol=6e-2), "bf16 kernel mismatch vs reference"

    # Non-divisible batch: B=24 with TB=16 -> ceil-div grid, overhanging last block.
    B2 = 24
    x2 = jax.random.normal(jax.random.PRNGKey(1), (B2, input_dim), jnp.float32)
    z2 = jax.random.normal(jax.random.PRNGKey(2), (B2, latent_dim), jnp.float32)
    ref2 = composite_prior_reference(x2, z2, params)
    out2 = jax.block_until_ready(composite_prior(x2, z2, prep_f32, block_batch=16))
    assert out2.shape == (B2, latent_dim)
    assert jnp.allclose(out2, ref2, rtol=1e-3, atol=1e-3), "edge-block kernel mismatch"

    print("KERNEL_OK")
</pallas_src>

<mosaic_0001>
module attributes {stable_mosaic.version = 11 : i64} {
  func.func @kernel(%arg0: i32, %arg1: i32, %arg2: memref<8x128xf32, #tpu.memory_space<vmem>>, %arg3: memref<8x128xf32, #tpu.memory_space<vmem>>, %arg4: memref<128x128xf32, #tpu.memory_space<vmem>>, %arg5: memref<128x128xf32, #tpu.memory_space<vmem>>, %arg6: memref<128x128xf32, #tpu.memory_space<vmem>>, %arg7: memref<128x128xf32, #tpu.memory_space<vmem>>, %arg8: memref<128x128xf32, #tpu.memory_space<vmem>>, %arg9: memref<128x256xf32, #tpu.memory_space<vmem>>, %arg10: memref<16x128xf32, #tpu.memory_space<vmem>>, %arg11: memref<1x256xf32, #tpu.memory_space<vmem>>, %arg12: memref<8x128xf32, #tpu.memory_space<vmem>>, %arg13: memref<8x128xf32, #tpu.memory_space<vmem>>, %arg14: memref<8x1xf32, #tpu.memory_space<vmem>>) attributes {dimension_semantics = [#tpu.dimension_semantics<parallel>, #tpu.dimension_semantics<arbitrary>], iteration_bounds = array<i64: 2, 1>, scalar_prefetch = 0 : i64, scratch_operands = 2 : i64, tpu.core_type = #tpu.core_type<tc>, window_params = [{transform_indices = @transform_0, window_bounds = array<i64: 8, 128>}, {transform_indices = @transform_1, window_bounds = array<i64: 8, 128>}, {transform_indices = @transform_2, window_bounds = array<i64: 128, 128>}, {pipeline_mode = #tpu.pipeline_mode<synchronous>, transform_indices = @transform_3, window_bounds = array<i64: 128, 128>}, {pipeline_mode = #tpu.pipeline_mode<synchronous>, transform_indices = @transform_4, window_bounds = array<i64: 128, 128>}, {pipeline_mode = #tpu.pipeline_mode<synchronous>, transform_indices = @transform_5, window_bounds = array<i64: 128, 128>}, {pipeline_mode = #tpu.pipeline_mode<synchronous>, transform_indices = @transform_6, window_bounds = array<i64: 128, 128>}, {pipeline_mode = #tpu.pipeline_mode<synchronous>, transform_indices = @transform_7, window_bounds = array<i64: 128, 256>}, {pipeline_mode = #tpu.pipeline_mode<synchronous>, transform_indices = @transform_8, window_bounds = array<i64: 16, 128>}, {pipeline_mode = #tpu.pipeline_mode<synchronous>, transform_indices = @transform_9, window_bounds = array<i64: 1, 256>}, {transform_indices = @transform_10, window_bounds = array<i64: 8, 128>}]} {
    %c0_i32 = arith.constant 0 : i32
    %0 = arith.cmpi eq, %arg1, %c0_i32 : i32
    %1 = arith.extui %0 : i1 to i32
    %c0_i32_0 = arith.constant 0 : i32
    %2 = arith.cmpi ne, %1, %c0_i32_0 : i32
    scf.if %2 {
      %cst_15 = arith.constant 0.000000e+00 : f32
      %18 = vector.broadcast %cst_15 : f32 to vector<8x128xf32>
      %c0_16 = arith.constant 0 : index
      %c0_17 = arith.constant 0 : index
      %19 = vector.load %arg13[%c0_16, %c0_17] : memref<8x128xf32, #tpu.memory_space<vmem>>, vector<8x128xf32>
      tpu.vector_store %arg13[%c0_16, %c0_17], %18 {strides = array<i32>} : memref<8x128xf32, #tpu.memory_space<vmem>>, vector<8x128xf32>,
      %cst_18 = arith.constant 0.000000e+00 : f32
      %20 = vector.broadcast %cst_18 : f32 to vector<8x1xf32>
      %c0_19 = arith.constant 0 : index
      %c0_20 = arith.constant 0 : index
      %21 = vector.load %arg14[%c0_19, %c0_20] : memref<8x1xf32, #tpu.memory_space<vmem>>, vector<8x1xf32>
      tpu.vector_store %arg14[%c0_19, %c0_20], %20 {strides = array<i32>} : memref<8x1xf32, #tpu.memory_space<vmem>>, vector<8x1xf32>,
    } else {
    }
    %c0 = arith.constant 0 : index
    %c0_1 = arith.constant 0 : index
    %3 = vector.load %arg2[%c0, %c0_1] : memref<8x128xf32, #tpu.memory_space<vmem>>, vector<8x128xf32>
    %c0_2 = arith.constant 0 : index
    %c0_3 = arith.constant 0 : index
    %4 = vector.load %arg14[%c0_2, %c0_3] : memref<8x1xf32, #tpu.memory_space<vmem>>, vector<8x1xf32>
    %5 = arith.mulf %3, %3 : vector<8x128xf32>
    %cst = arith.constant dense<0.000000e+00> : vector<8xf32>
    %6 = vector.multi_reduction <add>, %5, %cst [1] : vector<8x128xf32> to vector<8xf32>
    %7 = vector.shape_cast %6 : vector<8xf32> to vector<8x1xf32>
    %8 = arith.addf %4, %7 : vector<8x1xf32>
    %c0_4 = arith.constant 0 : index
    %c0_5 = arith.constant 0 : index
    %9 = vector.load %arg14[%c0_4, %c0_5] : memref<8x1xf32, #tpu.memory_space<vmem>>, vector<8x1xf32>
    tpu.vector_store %arg14[%c0_4, %c0_5], %8 {strides = array<i32>} : memref<8x1xf32, #tpu.memory_space<vmem>>, vector<8x1xf32>,
    %c0_6 = arith.constant 0 : index
    %c0_7 = arith.constant 0 : index
    %10 = vector.load %arg13[%c0_6, %c0_7] : memref<8x128xf32, #tpu.memory_space<vmem>>, vector<8x128xf32>
    %c0_8 = arith.constant 0 : index
    %c0_9 = arith.constant 0 : index
    %11 = vector.load %arg4[%c0_8, %c0_9] : memref<128x128xf32, #tpu.memory_space<vmem>>, vector<128x128xf32>
    %cst_10 = arith.constant dense<0.000000e+00> : vector<8x128xf32>
    %12 = tpu.matmul %3, %11, %cst_10 {dimension_numbers = #tpu.dot_dimension_numbers<[1], [0], [0], [1], [0, 0, 1, 1], [], []>} : vector<8x128xf32>, vector<128x128xf32>, vector<8x128xf32> -> vector<8x128xf32>
    %13 = arith.addf %10, %12 : vector<8x128xf32>
    %c0_11 = arith.constant 0 : index
    %c0_12 = arith.constant 0 : index
    %14 = vector.load %arg13[%c0_11, %c0_12] : memref<8x128xf32, #tpu.memory_space<vmem>>, vector<8x128xf32>
    tpu.vector_store %arg13[%c0_11, %c0_12], %13 {strides = array<i32>} : memref<8x128xf32, #tpu.memory_space<vmem>>, vector<8x128xf32>,
    %c0_i32_13 = arith.constant 0 : i32
    %15 = arith.cmpi eq, %arg1, %c0_i32_13 : i32
    %16 = arith.extui %15 : i1 to i32
    %c0_i32_14 = arith.constant 0 : i32
    %17 = arith.cmpi ne, %16, %c0_i32_14 : i32
    scf.if %17 {
      %c0_15 = arith.constant 0 : index
      %c0_16 = arith.constant 0 : index
      %18 = vector.load %arg14[%c0_15, %c0_16] : memref<8x1xf32, #tpu.memory_space<vmem>>, vector<8x1xf32>
      %cst_17 = arith.constant 9.99999996E-13 : f32
      %19 = vector.broadcast %cst_17 : f32 to vector<8x1xf32>
      %20 = arith.maximumf %18, %19 : vector<8x1xf32>
      %21 = math.rsqrt %20 : vector<8x1xf32>
      %c0_18 = arith.constant 0 : index
      %c0_19 = arith.constant 0 : index
      %22 = vector.load %arg13[%c0_18, %c0_19] : memref<8x128xf32, #tpu.memory_space<vmem>>, vector<8x128xf32>
      %23 = vector.broadcast %21 : vector<8x1xf32> to vector<8x128xf32>
      %24 = arith.mulf %22, %23 : vector<8x128xf32>
      %c0_20 = arith.constant 0 : index
      %c0_21 = arith.constant 0 : index
      %25 = vector.load %arg10[%c0_20, %c0_21] : memref<16x128xf32, #tpu.memory_space<vmem>>, vector<1x128xf32>
      %26 = vector.broadcast %25 : vector<1x128xf32> to vector<8x128xf32>
      %27 = arith.addf %24, %26 : vector<8x128xf32>
      %28 = arith.negf %27 : vector<8x128xf32>
      %29 = math.exp %28 : vector<8x128xf32>
      %cst_22 = arith.constant 1.000000e+00 : f32
      %30 = vector.broadcast %cst_22 : f32 to vector<8x128xf32>
      %31 = arith.addf %30, %29 : vector<8x128xf32>
      %32 = arith.divf %30, %31 : vector<8x128xf32>
      %33 = arith.mulf %27, %32 : vector<8x128xf32>
      %c5 = arith.constant 5 : index
      %c0_23 = arith.constant 0 : index
      %34 = vector.load %arg10[%c5, %c0_23] : memref<16x128xf32, #tpu.memory_space<vmem>>, vector<1x128xf32>
      %c10 = arith.constant 10 : index
      %c0_24 = arith.constant 0 : index
      %35 = vector.load %arg10[%c10, %c0_24] : memref<16x128xf32, #tpu.memory_space<vmem>>, vector<1x128xf32>
      %cst_25 = arith.constant dense<0.000000e+00> : vector<8xf32>
      %36 = vector.multi_reduction <add>, %33, %cst_25 [1] : vector<8x128xf32> to vector<8xf32>
      %37 = vector.shape_cast %36 : vector<8xf32> to vector<8x1xf32>
      %cst_26 = arith.constant 3.125000e-02 : f32
      %38 = vector.broadcast %cst_26 : f32 to vector<8x1xf32>
      %39 = arith.mulf %37, %38 : vector<8x1xf32>
      %40 = arith.mulf %33, %33 : vector<8x128xf32>
      %cst_27 = arith.constant dense<0.000000e+00> : vector<8xf32>
      %41 = vector.multi_reduction <add>, %40, %cst_27 [1] : vector<8x128xf32> to vector<8xf32>
      %42 = vector.shape_cast %41 : vector<8xf32> to vector<8x1xf32>
      %cst_28 = arith.constant 3.125000e-02 : f32
      %43 = vector.broadcast %cst_28 : f32 to vector<8x1xf32>
      %44 = arith.mulf %42, %43 : vector<8x1xf32>
      %45 = arith.mulf %39, %39 : vector<8x1xf32>
      %46 = arith.subf %44, %45 : vector<8x1xf32>
      %47 = vector.broadcast %39 : vector<8x1xf32> to vector<8x128xf32>
      %48 = arith.subf %33, %47 : vector<8x128xf32>
      %cst_29 = arith.constant 1.000000e-01 : f32
      %49 = vector.broadcast %cst_29 : f32 to vector<8x1xf32>
      %50 = arith.addf %46, %49 : vector<8x1xf32>
      %51 = math.rsqrt %50 : vector<8x1xf32>
      %52 = vector.broadcast %51 : vector<8x1xf32> to vector<8x128xf32>
      %53 = arith.mulf %48, %52 : vector<8x128xf32>
      %54 = vector.broadcast %34 : vector<1x128xf32> to vector<8x128xf32>
      %55 = arith.mulf %53, %54 : vector<8x128xf32>
      %56 = vector.broadcast %35 : vector<1x128xf32> to vector<8x128xf32>
      %57 = arith.addf %55, %56 : vector<8x128xf32>
      %c1 = arith.constant 1 : index
      %c0_30 = arith.constant 0 : index
      %58 = vector.load %arg10[%c1, %c0_30] : memref<16x128xf32, #tpu.memory_space<vmem>>, vector<1x128xf32>
      %c0_31 = arith.constant 0 : index
      %c0_32 = arith.constant 0 : index
      %59 = vector.load %arg5[%c0_31, %c0_32] : memref<128x128xf32, #tpu.memory_space<vmem>>, vector<128x128xf32>
      %cst_33 = arith.constant dense<0.000000e+00> : vector<8x128xf32>
      %60 = tpu.matmul %57, %59, %cst_33 {dimension_numbers = #tpu.dot_dimension_numbers<[1], [0], [0], [1], [0, 0, 1, 1], [], []>} : vector<8x128xf32>, vector<128x128xf32>, vector<8x128xf32> -> vector<8x128xf32>
      %61 = vector.broadcast %58 : vector<1x128xf32> to vector<8x128xf32>
      %62 = arith.addf %60, %61 : vector<8x128xf32>
      %63 = arith.addf %62, %57 : vector<8x128xf32>
      %64 = arith.negf %63 : vector<8x128xf32>
      %65 = math.exp %64 : vector<8x128xf32>
      %cst_34 = arith.constant 1.000000e+00 : f32
      %66 = vector.broadcast %cst_34 : f32 to vector<8x128xf32>
      %67 = arith.addf %66, %65 : vector<8x128xf32>
      %68 = arith.divf %66, %67 : vector<8x128xf32>
      %69 = arith.mulf %63, %68 : vector<8x128xf32>
      %c6 = arith.constant 6 : index
      %c0_35 = arith.constant 0 : index
      %70 = vector.load %arg10[%c6, %c0_35] : memref<16x128xf32, #tpu.memory_space<vmem>>, vector<1x128xf32>
      %c11 = arith.constant 11 : index
      %c0_36 = arith.constant 0 : index
      %71 = vector.load %arg10[%c11, %c0_36] : memref<16x128xf32, #tpu.memory_space<vmem>>, vector<1x128xf32>
      %cst_37 = arith.constant dense<0.000000e+00> : vector<8xf32>
      %72 = vector.multi_reduction <add>, %69, %cst_37 [1] : vector<8x128xf32> to vector<8xf32>
      %73 = vector.shape_cast %72 : vector<8xf32> to vector<8x1xf32>
      %cst_38 = arith.constant 3.125000e-02 : f32
      %74 = vector.broadcast %cst_38 : f32 to vector<8x1xf32>
      %75 = arith.mulf %73, %74 : vector<8x1xf32>
      %76 = arith.mulf %69, %69 : vector<8x128xf32>
      %cst_39 = arith.constant dense<0.000000e+00> : vector<8xf32>
      %77 = vector.multi_reduction <add>, %76, %cst_39 [1] : vector<8x128xf32> to vector<8xf32>
      %78 = vector.shape_cast %77 : vector<8xf32> to vector<8x1xf32>
      %cst_40 = arith.constant 3.125000e-02 : f32
      %79 = vector.broadcast %cst_40 : f32 to vector<8x1xf32>
      %80 = arith.mulf %78, %79 : vector<8x1xf32>
      %81 = arith.mulf %75, %75 : vector<8x1xf32>
      %82 = arith.subf %80, %81 : vector<8x1xf32>
      %83 = vector.broadcast %75 : vector<8x1xf32> to vector<8x128xf32>
      %84 = arith.subf %69, %83 : vector<8x128xf32>
      %cst_41 = arith.constant 1.000000e-01 : f32
      %85 = vector.broadcast %cst_41 : f32 to vector<8x1xf32>
      %86 = arith.addf %82, %85 : vector<8x1xf32>
      %87 = math.rsqrt %86 : vector<8x1xf32>
      %88 = vector.broadcast %87 : vector<8x1xf32> to vector<8x128xf32>
      %89 = arith.mulf %84, %88 : vector<8x128xf32>
      %90 = vector.broadcast %70 : vector<1x128xf32> to vector<8x128xf32>
      %91 = arith.mulf %89, %90 : vector<8x128xf32>
      %92 = vector.broadcast %71 : vector<1x128xf32> to vector<8x128xf32>
      %93 = arith.addf %91, %92 : vector<8x128xf32>
      %94 = arith.addf %57, %93 : vector<8x128xf32>
      %c2 = arith.constant 2 : index
      %c0_42 = arith.constant 0 : index
      %95 = vector.load %arg10[%c2, %c0_42] : memref<16x128xf32, #tpu.memory_space<vmem>>, vector<1x128xf32>
      %c0_43 = arith.constant 0 : index
      %c0_44 = arith.constant 0 : index
      %96 = vector.load %arg6[%c0_43, %c0_44] : memref<128x128xf32, #tpu.memory_space<vmem>>, vector<128x128xf32>
      %cst_45 = arith.constant dense<0.000000e+00> : vector<8x128xf32>
      %97 = tpu.matmul %93, %96, %cst_45 {dimension_numbers = #tpu.dot_dimension_numbers<[1], [0], [0], [1], [0, 0, 1, 1], [], []>} : vector<8x128xf32>, vector<128x128xf32>, vector<8x128xf32> -> vector<8x128xf32>
      %98 = vector.broadcast %95 : vector<1x128xf32> to vector<8x128xf32>
      %99 = arith.addf %97, %98 : vector<8x128xf32>
      %100 = arith.addf %99, %94 : vector<8x128xf32>
      %101 = arith.negf %100 : vector<8x128xf32>
      %102 = math.exp %101 : vector<8x128xf32>
      %cst_46 = arith.constant 1.000000e+00 : f32
      %103 = vector.broadcast %cst_46 : f32 to vector<8x128xf32>
      %104 = arith.addf %103, %102 : vector<8x128xf32>
      %105 = arith.divf %103, %104 : vector<8x128xf32>
      %106 = arith.mulf %100, %105 : vector<8x128xf32>
      %c7 = arith.constant 7 : index
      %c0_47 = arith.constant 0 : index
      %107 = vector.load %arg10[%c7, %c0_47] : memref<16x128xf32, #tpu.memory_space<vmem>>, vector<1x128xf32>
      %c12 = arith.constant 12 : index
      %c0_48 = arith.constant 0 : index
      %108 = vector.load %arg10[%c12, %c0_48] : memref<16x128xf32, #tpu.memory_space<vmem>>, vector<1x128xf32>
      %cst_49 = arith.constant dense<0.000000e+00> : vector<8xf32>
      %109 = vector.multi_reduction <add>, %106, %cst_49 [1] : vector<8x128xf32> to vector<8xf32>
      %110 = vector.shape_cast %109 : vector<8xf32> to vector<8x1xf32>
      %cst_50 = arith.constant 3.125000e-02 : f32
      %111 = vector.broadcast %cst_50 : f32 to vector<8x1xf32>
      %112 = arith.mulf %110, %111 : vector<8x1xf32>
      %113 = arith.mulf %106, %106 : vector<8x128xf32>
      %cst_51 = arith.constant dense<0.000000e+00> : vector<8xf32>
      %114 = vector.multi_reduction <add>, %113, %cst_51 [1] : vector<8x128xf32> to vector<8xf32>
      %115 = vector.shape_cast %114 : vector<8xf32> to vector<8x1xf32>
      %cst_52 = arith.constant 3.125000e-02 : f32
      %116 = vector.broadcast %cst_52 : f32 to vector<8x1xf32>
      %117 = arith.mulf %115, %116 : vector<8x1xf32>
      %118 = arith.mulf %112, %112 : vector<8x1xf32>
      %119 = arith.subf %117, %118 : vector<8x1xf32>
      %120 = vector.broadcast %112 : vector<8x1xf32> to vector<8x128xf32>
      %121 = arith.subf %106, %120 : vector<8x128xf32>
      %cst_53 = arith.constant 1.000000e-01 : f32
      %122 = vector.broadcast %cst_53 : f32 to vector<8x1xf32>
      %123 = arith.addf %119, %122 : vector<8x1xf32>
      %124 = math.rsqrt %123 : vector<8x1xf32>
      %125 = vector.broadcast %124 : vector<8x1xf32> to vector<8x128xf32>
      %126 = arith.mulf %121, %125 : vector<8x128xf32>
      %127 = vector.broadcast %107 : vector<1x128xf32> to vector<8x128xf32>
      %128 = arith.mulf %126, %127 : vector<8x128xf32>
      %129 = vector.broadcast %108 : vector<1x128xf32> to vector<8x128xf32>
      %130 = arith.addf %128, %129 : vector<8x128xf32>
      %131 = arith.addf %94, %130 : vector<8x128xf32>
      %c3 = arith.constant 3 : index
      %c0_54 = arith.constant 0 : index
      %132 = vector.load %arg10[%c3, %c0_54] : memref<16x128xf32, #tpu.memory_space<vmem>>, vector<1x128xf32>
      %c0_55 = arith.constant 0 : index
      %c0_56 = arith.constant 0 : index
      %133 = vector.load %arg7[%c0_55, %c0_56] : memref<128x128xf32, #tpu.memory_space<vmem>>, vector<128x128xf32>
      %cst_57 = arith.constant dense<0.000000e+00> : vector<8x128xf32>
      %134 = tpu.matmul %130, %133, %cst_57 {dimension_numbers = #tpu.dot_dimension_numbers<[1], [0], [0], [1], [0, 0, 1, 1], [], []>} : vector<8x128xf32>, vector<128x128xf32>, vector<8x128xf32> -> vector<8x128xf32>
      %135 = vector.broadcast %132 : vector<1x128xf32> to vector<8x128xf32>
      %136 = arith.addf %134, %135 : vector<8x128xf32>
      %137 = arith.addf %136, %131 : vector<8x128xf32>
      %138 = arith.negf %137 : vector<8x128xf32>
      %139 = math.exp %138 : vector<8x128xf32>
      %cst_58 = arith.constant 1.000000e+00 : f32
      %140 = vector.broadcast %cst_58 : f32 to vector<8x128xf32>
      %141 = arith.addf %140, %139 : vector<8x128xf32>
      %142 = arith.divf %140, %141 : vector<8x128xf32>
      %143 = arith.mulf %137, %142 : vector<8x128xf32>
      %c8 = arith.constant 8 : index
      %c0_59 = arith.constant 0 : index
      %144 = vector.load %arg10[%c8, %c0_59] : memref<16x128xf32, #tpu.memory_space<vmem>>, vector<1x128xf32>
      %c13 = arith.constant 13 : index
      %c0_60 = arith.constant 0 : index
      %145 = vector.load %arg10[%c13, %c0_60] : memref<16x128xf32, #tpu.memory_space<vmem>>, vector<1x128xf32>
      %cst_61 = arith.constant dense<0.000000e+00> : vector<8xf32>
      %146 = vector.multi_reduction <add>, %143, %cst_61 [1] : vector<8x128xf32> to vector<8xf32>
      %147 = vector.shape_cast %146 : vector<8xf32> to vector<8x1xf32>
      %cst_62 = arith.constant 3.125000e-02 : f32
      %148 = vector.broadcast %cst_62 : f32 to vector<8x1xf32>
      %149 = arith.mulf %147, %148 : vector<8x1xf32>
      %150 = arith.mulf %143, %143 : vector<8x128xf32>
      %cst_63 = arith.constant dense<0.000000e+00> : vector<8xf32>
      %151 = vector.multi_reduction <add>, %150, %cst_63 [1] : vector<8x128xf32> to vector<8xf32>
      %152 = vector.shape_cast %151 : vector<8xf32> to vector<8x1xf32>
      %cst_64 = arith.constant 3.125000e-02 : f32
      %153 = vector.broadcast %cst_64 : f32 to vector<8x1xf32>
      %154 = arith.mulf %152, %153 : vector<8x1xf32>
      %155 = arith.mulf %149, %149 : vector<8x1xf32>
      %156 = arith.subf %154, %155 : vector<8x1xf32>
      %157 = vector.broadcast %149 : vector<8x1xf32> to vector<8x128xf32>
      %158 = arith.subf %143, %157 : vector<8x128xf32>
      %cst_65 = arith.constant 1.000000e-01 : f32
      %159 = vector.broadcast %cst_65 : f32 to vector<8x1xf32>
      %160 = arith.addf %156, %159 : vector<8x1xf32>
      %161 = math.rsqrt %160 : vector<8x1xf32>
      %162 = vector.broadcast %161 : vector<8x1xf32> to vector<8x128xf32>
      %163 = arith.mulf %158, %162 : vector<8x128xf32>
      %164 = vector.broadcast %144 : vector<1x128xf32> to vector<8x128xf32>
      %165 = arith.mulf %163, %164 : vector<8x128xf32>
      %166 = vector.broadcast %145 : vector<1x128xf32> to vector<8x128xf32>
      %167 = arith.addf %165, %166 : vector<8x128xf32>
      %168 = arith.addf %131, %167 : vector<8x128xf32>
      %c4 = arith.constant 4 : index
      %c0_66 = arith.constant 0 : index
      %169 = vector.load %arg10[%c4, %c0_66] : memref<16x128xf32, #tpu.memory_space<vmem>>, vector<1x128xf32>
      %c0_67 = arith.constant 0 : index
      %c0_68 = arith.constant 0 : index
      %170 = vector.load %arg8[%c0_67, %c0_68] : memref<128x128xf32, #tpu.memory_space<vmem>>, vector<128x128xf32>
      %cst_69 = arith.constant dense<0.000000e+00> : vector<8x128xf32>
      %171 = tpu.matmul %167, %170, %cst_69 {dimension_numbers = #tpu.dot_dimension_numbers<[1], [0], [0], [1], [0, 0, 1, 1], [], []>} : vector<8x128xf32>, vector<128x128xf32>, vector<8x128xf32> -> vector<8x128xf32>
      %172 = vector.broadcast %169 : vector<1x128xf32> to vector<8x128xf32>
      %173 = arith.addf %171, %172 : vector<8x128xf32>
      %174 = arith.addf %173, %168 : vector<8x128xf32>
      %175 = arith.negf %174 : vector<8x128xf32>
      %176 = math.exp %175 : vector<8x128xf32>
      %cst_70 = arith.constant 1.000000e+00 : f32
      %177 = vector.broadcast %cst_70 : f32 to vector<8x128xf32>
      %178 = arith.addf %177, %176 : vector<8x128xf32>
      %179 = arith.divf %177, %178 : vector<8x128xf32>
      %180 = arith.mulf %174, %179 : vector<8x128xf32>
      %c9 = arith.constant 9 : index
      %c0_71 = arith.constant 0 : index
      %181 = vector.load %arg10[%c9, %c0_71] : memref<16x128xf32, #tpu.memory_space<vmem>>, vector<1x128xf32>
      %c14 = arith.constant 14 : index
      %c0_72 = arith.constant 0 : index
      %182 = vector.load %arg10[%c14, %c0_72] : memref<16x128xf32, #tpu.memory_space<vmem>>, vector<1x128xf32>
      %cst_73 = arith.constant dense<0.000000e+00> : vector<8xf32>
      %183 = vector.multi_reduction <add>, %180, %cst_73 [1] : vector<8x128xf32> to vector<8xf32>
      %184 = vector.shape_cast %183 : vector<8xf32> to vector<8x1xf32>
      %cst_74 = arith.constant 3.125000e-02 : f32
      %185 = vector.broadcast %cst_74 : f32 to vector<8x1xf32>
      %186 = arith.mulf %184, %185 : vector<8x1xf32>
      %187 = arith.mulf %180, %180 : vector<8x128xf32>
      %cst_75 = arith.constant dense<0.000000e+00> : vector<8xf32>
      %188 = vector.multi_reduction <add>, %187, %cst_75 [1] : vector<8x128xf32> to vector<8xf32>
      %189 = vector.shape_cast %188 : vector<8xf32> to vector<8x1xf32>
      %cst_76 = arith.constant 3.125000e-02 : f32
      %190 = vector.broadcast %cst_76 : f32 to vector<8x1xf32>
      %191 = arith.mulf %189, %190 : vector<8x1xf32>
      %192 = arith.mulf %186, %186 : vector<8x1xf32>
      %193 = arith.subf %191, %192 : vector<8x1xf32>
      %194 = vector.broadcast %186 : vector<8x1xf32> to vector<8x128xf32>
      %195 = arith.subf %180, %194 : vector<8x128xf32>
      %cst_77 = arith.constant 1.000000e-01 : f32
      %196 = vector.broadcast %cst_77 : f32 to vector<8x1xf32>
      %197 = arith.addf %193, %196 : vector<8x1xf32>
      %198 = math.rsqrt %197 : vector<8x1xf32>
      %199 = vector.broadcast %198 : vector<8x1xf32> to vector<8x128xf32>
      %200 = arith.mulf %195, %199 : vector<8x128xf32>
      %201 = vector.broadcast %181 : vector<1x128xf32> to vector<8x128xf32>
      %202 = arith.mulf %200, %201 : vector<8x128xf32>
      %203 = vector.broadcast %182 : vector<1x128xf32> to vector<8x128xf32>
      %204 = arith.addf %202, %203 : vector<8x128xf32>
      %c0_78 = arith.constant 0 : index
      %c0_79 = arith.constant 0 : index
      %205 = vector.load %arg11[%c0_78, %c0_79] : memref<1x256xf32, #tpu.memory_space<vmem>>, vector<1x256xf32>
      %c0_80 = arith.constant 0 : index
      %c0_81 = arith.constant 0 : index
      %206 = vector.load %arg9[%c0_80, %c0_81] : memref<128x256xf32, #tpu.memory_space<vmem>>, vector<128x256xf32>
      %cst_82 = arith.constant dense<0.000000e+00> : vector<8x256xf32>
      %207 = tpu.matmul %204, %206, %cst_82 {dimension_numbers = #tpu.dot_dimension_numbers<[1], [0], [0], [1], [0, 0, 1, 1], [], []>} : vector<8x128xf32>, vector<128x256xf32>, vector<8x256xf32> -> vector<8x256xf32>
      %208 = vector.broadcast %205 : vector<1x256xf32> to vector<8x256xf32>
      %209 = arith.addf %207, %208 : vector<8x256xf32>
      %210 = vector.extract_strided_slice %209 {offsets = [0, 0], sizes = [8, 128], strides = [1, 1]} : vector<8x256xf32> to vector<8x128xf32>
      %211 = vector.extract_strided_slice %209 {offsets = [0, 128], sizes = [8, 128], strides = [1, 1]} : vector<8x256xf32> to vector<8x128xf32>
      %c0_83 = arith.constant 0 : index
      %c0_84 = arith.constant 0 : index
      %212 = vector.load %arg3[%c0_83, %c0_84] : memref<8x128xf32, #tpu.memory_space<vmem>>, vector<8x128xf32>
      %213 = arith.mulf %212, %212 : vector<8x128xf32>
      %cst_85 = arith.constant 5.000000e-01 : f32
      %214 = vector.broadcast %cst_85 : f32 to vector<8x128xf32>
      %215 = arith.mulf %214, %213 : vector<8x128xf32>
      %cst_86 = arith.constant -2.81605864 : f32
      %216 = vector.broadcast %cst_86 : f32 to vector<8x128xf32>
      %217 = arith.subf %216, %215 : vector<8x128xf32>
      %218 = arith.subf %212, %210 : vector<8x128xf32>
      %cst_87 = arith.constant 1.83787704 : f32
      %219 = vector.broadcast %cst_87 : f32 to vector<8x128xf32>
      %220 = arith.addf %211, %219 : vector<8x128xf32>
      %221 = arith.mulf %218, %218 : vector<8x128xf32>
      %cst_88 = arith.constant 0.000000e+00 : f32
      %222 = vector.broadcast %cst_88 : f32 to vector<8x128xf32>
      %223 = arith.subf %222, %211 : vector<8x128xf32>
      %224 = math.exp %223 : vector<8x128xf32>
      %225 = arith.mulf %221, %224 : vector<8x128xf32>
      %226 = arith.addf %220, %225 : vector<8x128xf32>
      %cst_89 = arith.constant -5.000000e-01 : f32
      %227 = vector.broadcast %cst_89 : f32 to vector<8x128xf32>
      %228 = arith.mulf %227, %226 : vector<8x128xf32>
      %cst_90 = arith.constant -0.287682086 : f32
      %229 = vector.broadcast %cst_90 : f32 to vector<8x128xf32>
      %230 = arith.addf %228, %229 : vector<8x128xf32>
      %cst_91 = arith.constant 2.26999655E-5 : f32
      %231 = vector.broadcast %cst_91 : f32 to vector<8x128xf32>
      %232 = arith.mulf %231, %213 : vector<8x128xf32>
      %cst_92 = arith.constant -8.22152328 : f32
      %233 = vector.broadcast %cst_92 : f32 to vector<8x128xf32>
      %234 = arith.subf %233, %232 : vector<8x128xf32>
      %235 = arith.maximumf %217, %230 : vector<8x128xf32>
      %236 = arith.maximumf %235, %234 : vector<8x128xf32>
      %237 = arith.subf %217, %236 : vector<8x128xf32>
      %238 = math.exp %237 : vector<8x128xf32>
      %239 = arith.subf %230, %236 : vector<8x128xf32>
      %240 = math.exp %239 : vector<8x128xf32>
      %241 = arith.addf %238, %240 : vector<8x128xf32>
      %242 = arith.subf %234, %236 : vector<8x128xf32>
      %243 = math.exp %242 : vector<8x128xf32>
      %244 = arith.addf %241, %243 : vector<8x128xf32>
      %245 = math.log %244 : vector<8x128xf32>
      %246 = arith.addf %236, %245 : vector<8x128xf32>
      %c0_93 = arith.constant 0 : index
      %c0_94 = arith.constant 0 : index
      %247 = vector.load %arg12[%c0_93, %c0_94] : memref<8x128xf32, #tpu.memory_space<vmem>>, vector<8x128xf32>
      tpu.vector_store %arg12[%c0_93, %c0_94], %246 {strides = array<i32>} : memref<8x128xf32, #tpu.memory_space<vmem>>, vector<8x128xf32>,
    } else {
    }
    return
  }
  func.func @transform_0(%arg0: i32, %arg1: i32) -> (i32, i32) {
    %c0_i32 = arith.constant 0 : i32
    return %arg0, %arg1 : i32, i32
  }
  func.func @transform_1(%arg0: i32, %arg1: i32) -> (i32, i32) {
    %c0_i32 = arith.constant 0 : i32
    %c0_i32_0 = arith.constant 0 : i32
    return %arg0, %c0_i32 : i32, i32
  }
  func.func @transform_2(%arg0: i32, %arg1: i32) -> (i32, i32) {
    %c0_i32 = arith.constant 0 : i32
    %c0_i32_0 = arith.constant 0 : i32
    return %arg1, %c0_i32 : i32, i32
  }
  func.func @transform_3(%arg0: i32, %arg1: i32) -> (i32, i32) {
    %c0_i32 = arith.constant 0 : i32
    %c0_i32_0 = arith.constant 0 : i32
    %c0_i32_1 = arith.constant 0 : i32
    return %c0_i32, %c0_i32_0 : i32, i32
  }
  func.func @transform_4(%arg0: i32, %arg1: i32) -> (i32, i32) {
    %c0_i32 = arith.constant 0 : i32
    %c0_i32_0 = arith.constant 0 : i32
    %c0_i32_1 = arith.constant 0 : i32
    return %c0_i32, %c0_i32_0 : i32, i32
  }
  func.func @transform_5(%arg0: i32, %arg1: i32) -> (i32, i32) {
    %c0_i32 = arith.constant 0 : i32
    %c0_i32_0 = arith.constant 0 : i32
    %c0_i32_1 = arith.constant 0 : i32
    return %c0_i32, %c0_i32_0 : i32, i32
  }
  func.func @transform_6(%arg0: i32, %arg1: i32) -> (i32, i32) {
    %c0_i32 = arith.constant 0 : i32
    %c0_i32_0 = arith.constant 0 : i32
    %c0_i32_1 = arith.constant 0 : i32
    return %c0_i32, %c0_i32_0 : i32, i32
  }
  func.func @transform_7(%arg0: i32, %arg1: i32) -> (i32, i32) {
    %c0_i32 = arith.constant 0 : i32
    %c0_i32_0 = arith.constant 0 : i32
    %c0_i32_1 = arith.constant 0 : i32
    return %c0_i32, %c0_i32_0 : i32, i32
  }
  func.func @transform_8(%arg0: i32, %arg1: i32) -> (i32, i32) {
    %c0_i32 = arith.constant 0 : i32
    %c0_i32_0 = arith.constant 0 : i32
    %c0_i32_1 = arith.constant 0 : i32
    return %c0_i32, %c0_i32_0 : i32, i32
  }
  func.func @transform_9(%arg0: i32, %arg1: i32) -> (i32, i32) {
    %c0_i32 = arith.constant 0 : i32
    %c0_i32_0 = arith.constant 0 : i32
    %c0_i32_1 = arith.constant 0 : i32
    return %c0_i32, %c0_i32_0 : i32, i32
  }
  func.func @transform_10(%arg0: i32, %arg1: i32) -> (i32, i32) {
    %c0_i32 = arith.constant 0 : i32
    %c0_i32_0 = arith.constant 0 : i32
    return %arg0, %c0_i32 : i32, i32
  }
}

module attributes {stable_mosaic.version = 11 : i64} {
  func.func @kernel(%arg0: i32, %arg1: i32, %arg2: memref<8x128xf32, #tpu.memory_space<vmem>>, %arg3: memref<8x128xf32, #tpu.memory_space<vmem>>, %arg4: memref<128x128xf32, #tpu.memory_space<vmem>>, %arg5: memref<128x128xf32, #tpu.memory_space<vmem>>, %arg6: memref<128x128xf32, #tpu.memory_space<vmem>>, %arg7: memref<128x128xf32, #tpu.memory_space<vmem>>, %arg8: memref<128x128xf32, #tpu.memory_space<vmem>>, %arg9: memref<128x256xf32, #tpu.memory_space<vmem>>, %arg10: memref<16x128xf32, #tpu.memory_space<vmem>>, %arg11: memref<1x256xf32, #tpu.memory_space<vmem>>, %arg12: memref<8x128xf32, #tpu.memory_space<vmem>>, %arg13: memref<8x128xf32, #tpu.memory_space<vmem>>, %arg14: memref<8x1xf32, #tpu.memory_space<vmem>>) attributes {dimension_semantics = [#tpu.dimension_semantics<parallel>, #tpu.dimension_semantics<arbitrary>], iteration_bounds = array<i64: 2, 1>, scalar_prefetch = 0 : i64, scratch_operands = 2 : i64, tpu.core_type = #tpu.core_type<tc>, window_params = [{transform_indices = @transform_0, window_bounds = array<i64: 8, 128>}, {transform_indices = @transform_1, window_bounds = array<i64: 8, 128>}, {transform_indices = @transform_2, window_bounds = array<i64: 128, 128>}, {pipeline_mode = #tpu.pipeline_mode<synchronous>, transform_indices = @transform_3, window_bounds = array<i64: 128, 128>}, {pipeline_mode = #tpu.pipeline_mode<synchronous>, transform_indices = @transform_4, window_bounds = array<i64: 128, 128>}, {pipeline_mode = #tpu.pipeline_mode<synchronous>, transform_indices = @transform_5, window_bounds = array<i64: 128, 128>}, {pipeline_mode = #tpu.pipeline_mode<synchronous>, transform_indices = @transform_6, window_bounds = array<i64: 128, 128>}, {pipeline_mode = #tpu.pipeline_mode<synchronous>, transform_indices = @transform_7, window_bounds = array<i64: 128, 256>}, {pipeline_mode = #tpu.pipeline_mode<synchronous>, transform_indices = @transform_8, window_bounds = array<i64: 16, 128>}, {pipeline_mode = #tpu.pipeline_mode<synchronous>, transform_indices = @transform_9, window_bounds = array<i64: 1, 256>}, {transform_indices = @transform_10, window_bounds = array<i64: 8, 128>}]} {
    %c0_i32 = arith.constant 0 : i32
    %0 = arith.cmpi eq, %arg1, %c0_i32 : i32
    %1 = arith.extui %0 : i1 to i32
    %c0_i32_0 = arith.constant 0 : i32
    %2 = arith.cmpi ne, %1, %c0_i32_0 : i32
    scf.if %2 {
      %cst_15 = arith.constant 0.000000e+00 : f32
      %18 = vector.broadcast %cst_15 : f32 to vector<8x128xf32>
      %c0_16 = arith.constant 0 : index
      %c0_17 = arith.constant 0 : index
      %19 = vector.load %arg13[%c0_16, %c0_17] : memref<8x128xf32, #tpu.memory_space<vmem>>, vector<8x128xf32>
      tpu.vector_store %arg13[%c0_16, %c0_17], %18 {strides = array<i32>} : memref<8x128xf32, #tpu.memory_space<vmem>>, vector<8x128xf32>,
      %cst_18 = arith.constant 0.000000e+00 : f32
      %20 = vector.broadcast %cst_18 : f32 to vector<8x1xf32>
      %c0_19 = arith.constant 0 : index
      %c0_20 = arith.constant 0 : index
      %21 = vector.load %arg14[%c0_19, %c0_20] : memref<8x1xf32, #tpu.memory_space<vmem>>, vector<8x1xf32>
      tpu.vector_store %arg14[%c0_19, %c0_20], %20 {strides = array<i32>} : memref<8x1xf32, #tpu.memory_space<vmem>>, vector<8x1xf32>,
    } else {
    }
    %c0 = arith.constant 0 : index
    %c0_1 = arith.constant 0 : index
    %3 = vector.load %arg2[%c0, %c0_1] : memref<8x128xf32, #tpu.memory_space<vmem>>, vector<8x128xf32>
    %c0_2 = arith.constant 0 : index
    %c0_3 = arith.constant 0 : index
    %4 = vector.load %arg14[%c0_2, %c0_3] : memref<8x1xf32, #tpu.memory_space<vmem>>, vector<8x1xf32>
    %5 = arith.mulf %3, %3 : vector<8x128xf32>
    %cst = arith.constant dense<0.000000e+00> : vector<8xf32>
    %6 = vector.multi_reduction <add>, %5, %cst [1] : vector<8x128xf32> to vector<8xf32>
    %7 = vector.shape_cast %6 : vector<8xf32> to vector<8x1xf32>
    %8 = arith.addf %4, %7 : vector<8x1xf32>
    %c0_4 = arith.constant 0 : index
    %c0_5 = arith.constant 0 : index
    %9 = vector.load %arg14[%c0_4, %c0_5] : memref<8x1xf32, #tpu.memory_space<vmem>>, vector<8x1xf32>
    tpu.vector_store %arg14[%c0_4, %c0_5], %8 {strides = array<i32>} : memref<8x1xf32, #tpu.memory_space<vmem>>, vector<8x1xf32>,
    %c0_6 = arith.constant 0 : index
    %c0_7 = arith.constant 0 : index
    %10 = vector.load %arg13[%c0_6, %c0_7] : memref<8x128xf32, #tpu.memory_space<vmem>>, vector<8x128xf32>
    %c0_8 = arith.constant 0 : index
    %c0_9 = arith.constant 0 : index
    %11 = vector.load %arg4[%c0_8, %c0_9] : memref<128x128xf32, #tpu.memory_space<vmem>>, vector<128x128xf32>
    %cst_10 = arith.constant dense<0.000000e+00> : vector<8x128xf32>
    %12 = tpu.matmul %3, %11, %cst_10 {dimension_numbers = #tpu.dot_dimension_numbers<[1], [0], [0], [1], [0, 0, 1, 1], [], []>} : vector<8x128xf32>, vector<128x128xf32>, vector<8x128xf32> -> vector<8x128xf32>
    %13 = arith.addf %10, %12 : vector<8x128xf32>
    %c0_11 = arith.constant 0 : index
    %c0_12 = arith.constant 0 : index
    %14 = vector.load %arg13[%c0_11, %c0_12] : memref<8x128xf32, #tpu.memory_space<vmem>>, vector<8x128xf32>
    tpu.vector_store %arg13[%c0_11, %c0_12], %13 {strides = array<i32>} : memref<8x128xf32, #tpu.memory_space<vmem>>, vector<8x128xf32>,
    %c0_i32_13 = arith.constant 0 : i32
    %15 = arith.cmpi eq, %arg1, %c0_i32_13 : i32
    %16 = arith.extui %15 : i1 to i32
    %c0_i32_14 = arith.constant 0 : i32
    %17 = arith.cmpi ne, %16, %c0_i32_14 : i32
    scf.if %17 {
      %c0_15 = arith.constant 0 : index
      %c0_16 = arith.constant 0 : index
      %18 = vector.load %arg14[%c0_15, %c0_16] : memref<8x1xf32, #tpu.memory_space<vmem>>, vector<8x1xf32>
      %cst_17 = arith.constant 9.99999996E-13 : f32
      %19 = vector.broadcast %cst_17 : f32 to vector<8x1xf32>
      %20 = arith.maximumf %18, %19 : vector<8x1xf32>
      %21 = math.rsqrt %20 : vector<8x1xf32>
      %c0_18 = arith.constant 0 : index
      %c0_19 = arith.constant 0 : index
      %22 = vector.load %arg13[%c0_18, %c0_19] : memref<8x128xf32, #tpu.memory_space<vmem>>, vector<8x128xf32>
      %23 = vector.broadcast %21 : vector<8x1xf32> to vector<8x128xf32>
      %24 = arith.mulf %22, %23 : vector<8x128xf32>
      %c0_20 = arith.constant 0 : index
      %c0_21 = arith.constant 0 : index
      %25 = vector.load %arg10[%c0_20, %c0_21] : memref<16x128xf32, #tpu.memory_space<vmem>>, vector<1x128xf32>
      %26 = vector.broadcast %25 : vector<1x128xf32> to vector<8x128xf32>
      %27 = arith.addf %24, %26 : vector<8x128xf32>
      %28 = arith.negf %27 : vector<8x128xf32>
      %29 = math.exp %28 : vector<8x128xf32>
      %cst_22 = arith.constant 1.000000e+00 : f32
      %30 = vector.broadcast %cst_22 : f32 to vector<8x128xf32>
      %31 = arith.addf %30, %29 : vector<8x128xf32>
      %32 = arith.divf %30, %31 : vector<8x128xf32>
      %33 = arith.mulf %27, %32 : vector<8x128xf32>
      %c5 = arith.constant 5 : index
      %c0_23 = arith.constant 0 : index
      %34 = vector.load %arg10[%c5, %c0_23] : memref<16x128xf32, #tpu.memory_space<vmem>>, vector<1x128xf32>
      %c10 = arith.constant 10 : index
      %c0_24 = arith.constant 0 : index
      %35 = vector.load %arg10[%c10, %c0_24] : memref<16x128xf32, #tpu.memory_space<vmem>>, vector<1x128xf32>
      %cst_25 = arith.constant dense<0.000000e+00> : vector<8xf32>
      %36 = vector.multi_reduction <add>, %33, %cst_25 [1] : vector<8x128xf32> to vector<8xf32>
      %37 = vector.shape_cast %36 : vector<8xf32> to vector<8x1xf32>
      %cst_26 = arith.constant 3.125000e-02 : f32
      %38 = vector.broadcast %cst_26 : f32 to vector<8x1xf32>
      %39 = arith.mulf %37, %38 : vector<8x1xf32>
      %40 = arith.mulf %33, %33 : vector<8x128xf32>
      %cst_27 = arith.constant dense<0.000000e+00> : vector<8xf32>
      %41 = vector.multi_reduction <add>, %40, %cst_27 [1] : vector<8x128xf32> to vector<8xf32>
      %42 = vector.shape_cast %41 : vector<8xf32> to vector<8x1xf32>
      %cst_28 = arith.constant 3.125000e-02 : f32
      %43 = vector.broadcast %cst_28 : f32 to vector<8x1xf32>
      %44 = arith.mulf %42, %43 : vector<8x1xf32>
      %45 = arith.mulf %39, %39 : vector<8x1xf32>
      %46 = arith.subf %44, %45 : vector<8x1xf32>
      %47 = vector.broadcast %39 : vector<8x1xf32> to vector<8x128xf32>
      %48 = arith.subf %33, %47 : vector<8x128xf32>
      %cst_29 = arith.constant 1.000000e-01 : f32
      %49 = vector.broadcast %cst_29 : f32 to vector<8x1xf32>
      %50 = arith.addf %46, %49 : vector<8x1xf32>
      %51 = math.rsqrt %50 : vector<8x1xf32>
      %52 = vector.broadcast %51 : vector<8x1xf32> to vector<8x128xf32>
      %53 = arith.mulf %48, %52 : vector<8x128xf32>
      %54 = vector.broadcast %34 : vector<1x128xf32> to vector<8x128xf32>
      %55 = arith.mulf %53, %54 : vector<8x128xf32>
      %56 = vector.broadcast %35 : vector<1x128xf32> to vector<8x128xf32>
      %57 = arith.addf %55, %56 : vector<8x128xf32>
      %c1 = arith.constant 1 : index
      %c0_30 = arith.constant 0 : index
      %58 = vector.load %arg10[%c1, %c0_30] : memref<16x128xf32, #tpu.memory_space<vmem>>, vector<1x128xf32>
      %c0_31 = arith.constant 0 : index
      %c0_32 = arith.constant 0 : index
      %59 = vector.load %arg5[%c0_31, %c0_32] : memref<128x128xf32, #tpu.memory_space<vmem>>, vector<128x128xf32>
      %cst_33 = arith.constant dense<0.000000e+00> : vector<8x128xf32>
      %60 = tpu.matmul %57, %59, %cst_33 {dimension_numbers = #tpu.dot_dimension_numbers<[1], [0], [0], [1], [0, 0, 1, 1], [], []>} : vector<8x128xf32>, vector<128x128xf32>, vector<8x128xf32> -> vector<8x128xf32>
      %61 = vector.broadcast %58 : vector<1x128xf32> to vector<8x128xf32>
      %62 = arith.addf %60, %61 : vector<8x128xf32>
      %63 = arith.addf %62, %57 : vector<8x128xf32>
      %64 = arith.negf %63 : vector<8x128xf32>
      %65 = math.exp %64 : vector<8x128xf32>
      %cst_34 = arith.constant 1.000000e+00 : f32
      %66 = vector.broadcast %cst_34 : f32 to vector<8x128xf32>
      %67 = arith.addf %66, %65 : vector<8x128xf32>
      %68 = arith.divf %66, %67 : vector<8x128xf32>
      %69 = arith.mulf %63, %68 : vector<8x128xf32>
      %c6 = arith.constant 6 : index
      %c0_35 = arith.constant 0 : index
      %70 = vector.load %arg10[%c6, %c0_35] : memref<16x128xf32, #tpu.memory_space<vmem>>, vector<1x128xf32>
      %c11 = arith.constant 11 : index
      %c0_36 = arith.constant 0 : index
      %71 = vector.load %arg10[%c11, %c0_36] : memref<16x128xf32, #tpu.memory_space<vmem>>, vector<1x128xf32>
      %cst_37 = arith.constant dense<0.000000e+00> : vector<8xf32>
      %72 = vector.multi_reduction <add>, %69, %cst_37 [1] : vector<8x128xf32> to vector<8xf32>
      %73 = vector.shape_cast %72 : vector<8xf32> to vector<8x1xf32>
      %cst_38 = arith.constant 3.125000e-02 : f32
      %74 = vector.broadcast %cst_38 : f32 to vector<8x1xf32>
      %75 = arith.mulf %73, %74 : vector<8x1xf32>
      %76 = arith.mulf %69, %69 : vector<8x128xf32>
      %cst_39 = arith.constant dense<0.000000e+00> : vector<8xf32>
      %77 = vector.multi_reduction <add>, %76, %cst_39 [1] : vector<8x128xf32> to vector<8xf32>
      %78 = vector.shape_cast %77 : vector<8xf32> to vector<8x1xf32>
      %cst_40 = arith.constant 3.125000e-02 : f32
      %79 = vector.broadcast %cst_40 : f32 to vector<8x1xf32>
      %80 = arith.mulf %78, %79 : vector<8x1xf32>
      %81 = arith.mulf %75, %75 : vector<8x1xf32>
      %82 = arith.subf %80, %81 : vector<8x1xf32>
      %83 = vector.broadcast %75 : vector<8x1xf32> to vector<8x128xf32>
      %84 = arith.subf %69, %83 : vector<8x128xf32>
      %cst_41 = arith.constant 1.000000e-01 : f32
      %85 = vector.broadcast %cst_41 : f32 to vector<8x1xf32>
      %86 = arith.addf %82, %85 : vector<8x1xf32>
      %87 = math.rsqrt %86 : vector<8x1xf32>
      %88 = vector.broadcast %87 : vector<8x1xf32> to vector<8x128xf32>
      %89 = arith.mulf %84, %88 : vector<8x128xf32>
      %90 = vector.broadcast %70 : vector<1x128xf32> to vector<8x128xf32>
      %91 = arith.mulf %89, %90 : vector<8x128xf32>
      %92 = vector.broadcast %71 : vector<1x128xf32> to vector<8x128xf32>
      %93 = arith.addf %91, %92 : vector<8x128xf32>
      %94 = arith.addf %57, %93 : vector<8x128xf32>
      %c2 = arith.constant 2 : index
      %c0_42 = arith.constant 0 : index
      %95 = vector.load %arg10[%c2, %c0_42] : memref<16x128xf32, #tpu.memory_space<vmem>>, vector<1x128xf32>
      %c0_43 = arith.constant 0 : index
      %c0_44 = arith.constant 0 : index
      %96 = vector.load %arg6[%c0_43, %c0_44] : memref<128x128xf32, #tpu.memory_space<vmem>>, vector<128x128xf32>
      %cst_45 = arith.constant dense<0.000000e+00> : vector<8x128xf32>
      %97 = tpu.matmul %93, %96, %cst_45 {dimension_numbers = #tpu.dot_dimension_numbers<[1], [0], [0], [1], [0, 0, 1, 1], [], []>} : vector<8x128xf32>, vector<128x128xf32>, vector<8x128xf32> -> vector<8x128xf32>
      %98 = vector.broadcast %95 : vector<1x128xf32> to vector<8x128xf32>
      %99 = arith.addf %97, %98 : vector<8x128xf32>
      %100 = arith.addf %99, %94 : vector<8x128xf32>
      %101 = arith.negf %100 : vector<8x128xf32>
      %102 = math.exp %101 : vector<8x128xf32>
      %cst_46 = arith.constant 1.000000e+00 : f32
      %103 = vector.broadcast %cst_46 : f32 to vector<8x128xf32>
      %104 = arith.addf %103, %102 : vector<8x128xf32>
      %105 = arith.divf %103, %104 : vector<8x128xf32>
      %106 = arith.mulf %100, %105 : vector<8x128xf32>
      %c7 = arith.constant 7 : index
      %c0_47 = arith.constant 0 : index
      %107 = vector.load %arg10[%c7, %c0_47] : memref<16x128xf32, #tpu.memory_space<vmem>>, vector<1x128xf32>
      %c12 = arith.constant 12 : index
      %c0_48 = arith.constant 0 : index
      %108 = vector.load %arg10[%c12, %c0_48] : memref<16x128xf32, #tpu.memory_space<vmem>>, vector<1x128xf32>
      %cst_49 = arith.constant dense<0.000000e+00> : vector<8xf32>
      %109 = vector.multi_reduction <add>, %106, %cst_49 [1] : vector<8x128xf32> to vector<8xf32>
      %110 = vector.shape_cast %109 : vector<8xf32> to vector<8x1xf32>
      %cst_50 = arith.constant 3.125000e-02 : f32
      %111 = vector.broadcast %cst_50 : f32 to vector<8x1xf32>
      %112 = arith.mulf %110, %111 : vector<8x1xf32>
      %113 = arith.mulf %106, %106 : vector<8x128xf32>
      %cst_51 = arith.constant dense<0.000000e+00> : vector<8xf32>
      %114 = vector.multi_reduction <add>, %113, %cst_51 [1] : vector<8x128xf32> to vector<8xf32>
      %115 = vector.shape_cast %114 : vector<8xf32> to vector<8x1xf32>
      %cst_52 = arith.constant 3.125000e-02 : f32
      %116 = vector.broadcast %cst_52 : f32 to vector<8x1xf32>
      %117 = arith.mulf %115, %116 : vector<8x1xf32>
      %118 = arith.mulf %112, %112 : vector<8x1xf32>
      %119 = arith.subf %117, %118 : vector<8x1xf32>
      %120 = vector.broadcast %112 : vector<8x1xf32> to vector<8x128xf32>
      %121 = arith.subf %106, %120 : vector<8x128xf32>
      %cst_53 = arith.constant 1.000000e-01 : f32
      %122 = vector.broadcast %cst_53 : f32 to vector<8x1xf32>
      %123 = arith.addf %119, %122 : vector<8x1xf32>
      %124 = math.rsqrt %123 : vector<8x1xf32>
      %125 = vector.broadcast %124 : vector<8x1xf32> to vector<8x128xf32>
      %126 = arith.mulf %121, %125 : vector<8x128xf32>
      %127 = vector.broadcast %107 : vector<1x128xf32> to vector<8x128xf32>
      %128 = arith.mulf %126, %127 : vector<8x128xf32>
      %129 = vector.broadcast %108 : vector<1x128xf32> to vector<8x128xf32>
      %130 = arith.addf %128, %129 : vector<8x128xf32>
      %131 = arith.addf %94, %130 : vector<8x128xf32>
      %c3 = arith.constant 3 : index
      %c0_54 = arith.constant 0 : index
      %132 = vector.load %arg10[%c3, %c0_54] : memref<16x128xf32, #tpu.memory_space<vmem>>, vector<1x128xf32>
      %c0_55 = arith.constant 0 : index
      %c0_56 = arith.constant 0 : index
      %133 = vector.load %arg7[%c0_55, %c0_56] : memref<128x128xf32, #tpu.memory_space<vmem>>, vector<128x128xf32>
      %cst_57 = arith.constant dense<0.000000e+00> : vector<8x128xf32>
      %134 = tpu.matmul %130, %133, %cst_57 {dimension_numbers = #tpu.dot_dimension_numbers<[1], [0], [0], [1], [0, 0, 1, 1], [], []>} : vector<8x128xf32>, vector<128x128xf32>, vector<8x128xf32> -> vector<8x128xf32>
      %135 = vector.broadcast %132 : vector<1x128xf32> to vector<8x128xf32>
      %136 = arith.addf %134, %135 : vector<8x128xf32>
      %137 = arith.addf %136, %131 : vector<8x128xf32>
      %138 = arith.negf %137 : vector<8x128xf32>
      %139 = math.exp %138 : vector<8x128xf32>
      %cst_58 = arith.constant 1.000000e+00 : f32
      %140 = vector.broadcast %cst_58 : f32 to vector<8x128xf32>
      %141 = arith.addf %140, %139 : vector<8x128xf32>
      %142 = arith.divf %140, %141 : vector<8x128xf32>
      %143 = arith.mulf %137, %142 : vector<8x128xf32>
      %c8 = arith.constant 8 : index
      %c0_59 = arith.constant 0 : index
      %144 = vector.load %arg10[%c8, %c0_59] : memref<16x128xf32, #tpu.memory_space<vmem>>, vector<1x128xf32>
      %c13 = arith.constant 13 : index
      %c0_60 = arith.constant 0 : index
      %145 = vector.load %arg10[%c13, %c0_60] : memref<16x128xf32, #tpu.memory_space<vmem>>, vector<1x128xf32>
      %cst_61 = arith.constant dense<0.000000e+00> : vector<8xf32>
      %146 = vector.multi_reduction <add>, %143, %cst_61 [1] : vector<8x128xf32> to vector<8xf32>
      %147 = vector.shape_cast %146 : vector<8xf32> to vector<8x1xf32>
      %cst_62 = arith.constant 3.125000e-02 : f32
      %148 = vector.broadcast %cst_62 : f32 to vector<8x1xf32>
      %149 = arith.mulf %147, %148 : vector<8x1xf32>
      %150 = arith.mulf %143, %143 : vector<8x128xf32>
      %cst_63 = arith.constant dense<0.000000e+00> : vector<8xf32>
      %151 = vector.multi_reduction <add>, %150, %cst_63 [1] : vector<8x128xf32> to vector<8xf32>
      %152 = vector.shape_cast %151 : vector<8xf32> to vector<8x1xf32>
      %cst_64 = arith.constant 3.125000e-02 : f32
      %153 = vector.broadcast %cst_64 : f32 to vector<8x1xf32>
      %154 = arith.mulf %152, %153 : vector<8x1xf32>
      %155 = arith.mulf %149, %149 : vector<8x1xf32>
      %156 = arith.subf %154, %155 : vector<8x1xf32>
      %157 = vector.broadcast %149 : vector<8x1xf32> to vector<8x128xf32>
      %158 = arith.subf %143, %157 : vector<8x128xf32>
      %cst_65 = arith.constant 1.000000e-01 : f32
      %159 = vector.broadcast %cst_65 : f32 to vector<8x1xf32>
      %160 = arith.addf %156, %159 : vector<8x1xf32>
      %161 = math.rsqrt %160 : vector<8x1xf32>
      %162 = vector.broadcast %161 : vector<8x1xf32> to vector<8x128xf32>
      %163 = arith.mulf %158, %162 : vector<8x128xf32>
      %164 = vector.broadcast %144 : vector<1x128xf32> to vector<8x128xf32>
      %165 = arith.mulf %163, %164 : vector<8x128xf32>
      %166 = vector.broadcast %145 : vector<1x128xf32> to vector<8x128xf32>
      %167 = arith.addf %165, %166 : vector<8x128xf32>
      %168 = arith.addf %131, %167 : vector<8x128xf32>
      %c4 = arith.constant 4 : index
      %c0_66 = arith.constant 0 : index
      %169 = vector.load %arg10[%c4, %c0_66] : memref<16x128xf32, #tpu.memory_space<vmem>>, vector<1x128xf32>
      %c0_67 = arith.constant 0 : index
      %c0_68 = arith.constant 0 : index
      %170 = vector.load %arg8[%c0_67, %c0_68] : memref<128x128xf32, #tpu.memory_space<vmem>>, vector<128x128xf32>
      %cst_69 = arith.constant dense<0.000000e+00> : vector<8x128xf32>
      %171 = tpu.matmul %167, %170, %cst_69 {dimension_numbers = #tpu.dot_dimension_numbers<[1], [0], [0], [1], [0, 0, 1, 1], [], []>} : vector<8x128xf32>, vector<128x128xf32>, vector<8x128xf32> -> vector<8x128xf32>
      %172 = vector.broadcast %169 : vector<1x128xf32> to vector<8x128xf32>
      %173 = arith.addf %171, %172 : vector<8x128xf32>
      %174 = arith.addf %173, %168 : vector<8x128xf32>
      %175 = arith.negf %174 : vector<8x128xf32>
      %176 = math.exp %175 : vector<8x128xf32>
      %cst_70 = arith.constant 1.000000e+00 : f32
      %177 = vector.broadcast %cst_70 : f32 to vector<8x128xf32>
      %178 = arith.addf %177, %176 : vector<8x128xf32>
      %179 = arith.divf %177, %178 : vector<8x128xf32>
      %180 = arith.mulf %174, %179 : vector<8x128xf32>
      %c9 = arith.constant 9 : index
      %c0_71 = arith.constant 0 : index
      %181 = vector.load %arg10[%c9, %c0_71] : memref<16x128xf32, #tpu.memory_space<vmem>>, vector<1x128xf32>
      %c14 = arith.constant 14 : index
      %c0_72 = arith.constant 0 : index
      %182 = vector.load %arg10[%c14, %c0_72] : memref<16x128xf32, #tpu.memory_space<vmem>>, vector<1x128xf32>
      %cst_73 = arith.constant dense<0.000000e+00> : vector<8xf32>
      %183 = vector.multi_reduction <add>, %180, %cst_73 [1] : vector<8x128xf32> to vector<8xf32>
      %184 = vector.shape_cast %183 : vector<8xf32> to vector<8x1xf32>
      %cst_74 = arith.constant 3.125000e-02 : f32
      %185 = vector.broadcast %cst_74 : f32 to vector<8x1xf32>
      %186 = arith.mulf %184, %185 : vector<8x1xf32>
      %187 = arith.mulf %180, %180 : vector<8x128xf32>
      %cst_75 = arith.constant dense<0.000000e+00> : vector<8xf32>
      %188 = vector.multi_reduction <add>, %187, %cst_75 [1] : vector<8x128xf32> to vector<8xf32>
      %189 = vector.shape_cast %188 : vector<8xf32> to vector<8x1xf32>
      %cst_76 = arith.constant 3.125000e-02 : f32
      %190 = vector.broadcast %cst_76 : f32 to vector<8x1xf32>
      %191 = arith.mulf %189, %190 : vector<8x1xf32>
      %192 = arith.mulf %186, %186 : vector<8x1xf32>
      %193 = arith.subf %191, %192 : vector<8x1xf32>
      %194 = vector.broadcast %186 : vector<8x1xf32> to vector<8x128xf32>
      %195 = arith.subf %180, %194 : vector<8x128xf32>
      %cst_77 = arith.constant 1.000000e-01 : f32
      %196 = vector.broadcast %cst_77 : f32 to vector<8x1xf32>
      %197 = arith.addf %193, %196 : vector<8x1xf32>
      %198 = math.rsqrt %197 : vector<8x1xf32>
      %199 = vector.broadcast %198 : vector<8x1xf32> to vector<8x128xf32>
      %200 = arith.mulf %195, %199 : vector<8x128xf32>
      %201 = vector.broadcast %181 : vector<1x128xf32> to vector<8x128xf32>
      %202 = arith.mulf %200, %201 : vector<8x128xf32>
      %203 = vector.broadcast %182 : vector<1x128xf32> to vector<8x128xf32>
      %204 = arith.addf %202, %203 : vector<8x128xf32>
      %c0_78 = arith.constant 0 : index
      %c0_79 = arith.constant 0 : index
      %205 = vector.load %arg11[%c0_78, %c0_79] : memref<1x256xf32, #tpu.memory_space<vmem>>, vector<1x256xf32>
      %c0_80 = arith.constant 0 : index
      %c0_81 = arith.constant 0 : index
      %206 = vector.load %arg9[%c0_80, %c0_81] : memref<128x256xf32, #tpu.memory_space<vmem>>, vector<128x256xf32>
      %cst_82 = arith.constant dense<0.000000e+00> : vector<8x256xf32>
      %207 = tpu.matmul %204, %206, %cst_82 {dimension_numbers = #tpu.dot_dimension_numbers<[1], [0], [0], [1], [0, 0, 1, 1], [], []>} : vector<8x128xf32>, vector<128x256xf32>, vector<8x256xf32> -> vector<8x256xf32>
      %208 = vector.broadcast %205 : vector<1x256xf32> to vector<8x256xf32>
      %209 = arith.addf %207, %208 : vector<8x256xf32>
      %210 = vector.extract_strided_slice %209 {offsets = [0, 0], sizes = [8, 128], strides = [1, 1]} : vector<8x256xf32> to vector<8x128xf32>
      %211 = vector.extract_strided_slice %209 {offsets = [0, 128], sizes = [8, 128], strides = [1, 1]} : vector<8x256xf32> to vector<8x128xf32>
      %c0_83 = arith.constant 0 : index
      %c0_84 = arith.constant 0 : index
      %212 = vector.load %arg3[%c0_83, %c0_84] : memref<8x128xf32, #tpu.memory_space<vmem>>, vector<8x128xf32>
      %213 = arith.mulf %212, %212 : vector<8x128xf32>
      %cst_85 = arith.constant 5.000000e-01 : f32
      %214 = vector.broadcast %cst_85 : f32 to vector<8x128xf32>
      %215 = arith.mulf %214, %213 : vector<8x128xf32>
      %cst_86 = arith.constant -2.81605864 : f32
      %216 = vector.broadcast %cst_86 : f32 to vector<8x128xf32>
      %217 = arith.subf %216, %215 : vector<8x128xf32>
      %218 = arith.subf %212, %210 : vector<8x128xf32>
      %cst_87 = arith.constant 1.83787704 : f32
      %219 = vector.broadcast %cst_87 : f32 to vector<8x128xf32>
      %220 = arith.addf %211, %219 : vector<8x128xf32>
      %221 = arith.mulf %218, %218 : vector<8x128xf32>
      %cst_88 = arith.constant 0.000000e+00 : f32
      %222 = vector.broadcast %cst_88 : f32 to vector<8x128xf32>
      %223 = arith.subf %222, %211 : vector<8x128xf32>
      %224 = math.exp %223 : vector<8x128xf32>
      %225 = arith.mulf %221, %224 : vector<8x128xf32>
      %226 = arith.addf %220, %225 : vector<8x128xf32>
      %cst_89 = arith.constant -5.000000e-01 : f32
      %227 = vector.broadcast %cst_89 : f32 to vector<8x128xf32>
      %228 = arith.mulf %227, %226 : vector<8x128xf32>
      %cst_90 = arith.constant -0.287682086 : f32
      %229 = vector.broadcast %cst_90 : f32 to vector<8x128xf32>
      %230 = arith.addf %228, %229 : vector<8x128xf32>
      %cst_91 = arith.constant 2.26999655E-5 : f32
      %231 = vector.broadcast %cst_91 : f32 to vector<8x128xf32>
      %232 = arith.mulf %231, %213 : vector<8x128xf32>
      %cst_92 = arith.constant -8.22152328 : f32
      %233 = vector.broadcast %cst_92 : f32 to vector<8x128xf32>
      %234 = arith.subf %233, %232 : vector<8x128xf32>
      %235 = arith.maximumf %217, %230 : vector<8x128xf32>
      %236 = arith.maximumf %235, %234 : vector<8x128xf32>
      %237 = arith.subf %217, %236 : vector<8x128xf32>
      %238 = math.exp %237 : vector<8x128xf32>
      %239 = arith.subf %230, %236 : vector<8x128xf32>
      %240 = math.exp %239 : vector<8x128xf32>
      %241 = arith.addf %238, %240 : vector<8x128xf32>
      %242 = arith.subf %234, %236 : vector<8x128xf32>
      %243 = math.exp %242 : vector<8x128xf32>
      %244 = arith.addf %241, %243 : vector<8x128xf32>
      %245 = math.log %244 : vector<8x128xf32>
      %246 = arith.addf %236, %245 : vector<8x128xf32>
      %c0_93 = arith.constant 0 : index
      %c0_94 = arith.constant 0 : index
      %247 = vector.load %arg12[%c0_93, %c0_94] : memref<8x128xf32, #tpu.memory_space<vmem>>, vector<8x128xf32>
      tpu.vector_store %arg12[%c0_93, %c0_94], %246 {strides = array<i32>} : memref<8x128xf32, #tpu.memory_space<vmem>>, vector<8x128xf32>,
    } else {
    }
    return
  }
  func.func @transform_0(%arg0: i32, %arg1: i32) -> (i32, i32) {
    %c0_i32 = arith.constant 0 : i32
    return %arg0, %arg1 : i32, i32
  }
  func.func @transform_1(%arg0: i32, %arg1: i32) -> (i32, i32) {
    %c0_i32 = arith.constant 0 : i32
    %c0_i32_0 = arith.constant 0 : i32
    return %arg0, %c0_i32 : i32, i32
  }
  func.func @transform_2(%arg0: i32, %arg1: i32) -> (i32, i32) {
    %c0_i32 = arith.constant 0 : i32
    %c0_i32_0 = arith.constant 0 : i32
    return %arg1, %c0_i32 : i32, i32
  }
  func.func @transform_3(%arg0: i32, %arg1: i32) -> (i32, i32) {
    %c0_i32 = arith.constant 0 : i32
    %c0_i32_0 = arith.constant 0 : i32
    %c0_i32_1 = arith.constant 0 : i32
    return %c0_i32, %c0_i32_0 : i32, i32
  }
  func.func @transform_4(%arg0: i32, %arg1: i32) -> (i32, i32) {
    %c0_i32 = arith.constant 0 : i32
    %c0_i32_0 = arith.constant 0 : i32
    %c0_i32_1 = arith.constant 0 : i32
    return %c0_i32, %c0_i32_0 : i32, i32
  }
  func.func @transform_5(%arg0: i32, %arg1: i32) -> (i32, i32) {
    %c0_i32 = arith.constant 0 : i32
    %c0_i32_0 = arith.constant 0 : i32
    %c0_i32_1 = arith.constant 0 : i32
    return %c0_i32, %c0_i32_0 : i32, i32
  }
  func.func @transform_6(%arg0: i32, %arg1: i32) -> (i32, i32) {
    %c0_i32 = arith.constant 0 : i32
    %c0_i32_0 = arith.constant 0 : i32
    %c0_i32_1 = arith.constant 0 : i32
    return %c0_i32, %c0_i32_0 : i32, i32
  }
  func.func @transform_7(%arg0: i32, %arg1: i32) -> (i32, i32) {
    %c0_i32 = arith.constant 0 : i32
    %c0_i32_0 = arith.constant 0 : i32
    %c0_i32_1 = arith.constant 0 : i32
    return %c0_i32, %c0_i32_0 : i32, i32
  }
  func.func @transform_8(%arg0: i32, %arg1: i32) -> (i32, i32) {
    %c0_i32 = arith.constant 0 : i32
    %c0_i32_0 = arith.constant 0 : i32
    %c0_i32_1 = arith.constant 0 : i32
    return %c0_i32, %c0_i32_0 : i32, i32
  }
  func.func @transform_9(%arg0: i32, %arg1: i32) -> (i32, i32) {
    %c0_i32 = arith.constant 0 : i32
    %c0_i32_0 = arith.constant 0 : i32
    %c0_i32_1 = arith.constant 0 : i32
    return %c0_i32, %c0_i32_0 : i32, i32
  }
  func.func @transform_10(%arg0: i32, %arg1: i32) -> (i32, i32) {
    %c0_i32 = arith.constant 0 : i32
    %c0_i32_0 = arith.constant 0 : i32
    return %arg0, %c0_i32 : i32, i32
  }
}

</mosaic_0001>

<bundles_post_ra>
// kernel: tpu_custom_call.1
= control target key start
LH: loop header
LB: loop body
LE: loop exit
PB: predicated region body
PF: predicated region fallthrough
CT: control target
= control target key end

     0   :  { %s3196_s0 = inlined_call_operand.hbm [shape: f32[16,128], index: 0, kind: input, shape index: {}]   ;;  %s3197_s1 = inlined_call_operand.hbm [shape: f32[16,128], index: 1, kind: input, shape index: {}]   ;;  %s3198_s2 = inlined_call_operand.hbm [shape: f32[128,128], index: 2, kind: input, shape index: {}]   ;;  %s3199_s3 = inlined_call_operand.hbm [shape: f32[128,128], index: 3, kind: input, shape index: {}]   ;;  %s3200_s4 = inlined_call_operand.hbm [shape: f32[128,128], index: 4, kind: input, shape index: {}]   ;;  %s3201_s5 = inlined_call_operand.hbm [shape: f32[128,128], index: 5, kind: input, shape index: {}]   ;;  %s3202_s6 = inlined_call_operand.hbm [shape: f32[128,128], index: 6, kind: input, shape index: {}]   ;;  %s3203_s7 = inlined_call_operand.hbm [shape: f32[128,256], index: 7, kind: input, shape index: {}]   ;;  %s3204_s8 = inlined_call_operand.hbm [shape: f32[16,128], index: 8, kind: input, shape index: {}]   ;;  %s3205_s9 = inlined_call_operand.hbm [shape: f32[1,256], index: 9, kind: input, shape index: {}]   ;;  %s3206_s10 = inlined_call_operand.hbm [shape: f32[16,128], index: 10, kind: output, shape index: {}]  }
   0x1   :  { %3218 = sst [smem:[#allocation32_spill]] %s3197_s1 }
   0x2   :  { %3219 = sst [smem:[#allocation33_spill]] %s3198_s2 }
   0x3   :  { %3220 = sst [smem:[#allocation34_spill]] %s3199_s3 }
   0x4   :  { %3221 = sst [smem:[#allocation35_spill]] %s3200_s4 }
   0x5   :  { %3222 = sst [smem:[#allocation36_spill]] %s3201_s5 }
   0x6   :  { %3223 = sst [smem:[#allocation37_spill]] %s3202_s6 }
   0x7   :  { %3224 = sst [smem:[#allocation38_spill]] %s3203_s7 }
   0x8   :  { %3225 = sst [smem:[#allocation39_spill]] %s3206_s10 }
   0x9   :  { %15 = vsyncpa [#allocation5], 0 }
   0xa   :  { %17 = vsyncpa [#allocation5 + $0x1], 0 }
   0xb   :  { %18 = vsyncpa [#allocation8], 0 }
   0xc   :  { %20 = vsyncpa [#allocation8 + $0x1], 0 }
   0xd   :  { %21 = vsyncpa [#allocation11], 0 }
   0xe   :  { %22 = vsyncpa [#allocation14], 0 }
   0xf   :  { %23 = vsyncpa [#allocation17], 0 }
  0x10   :  { %24 = vsyncpa [#allocation20], 0 }
  0x11   :  { %25 = vsyncpa [#allocation6], 0 }
  0x12   :  { %27 = vsyncpa [#allocation6 + $0x1], 0  ;;  %s2675_s13 = smov 0   ;;  %s2677_s14 = smov 0  }
  0x13   :  { %s2679_s15 = smov 0   ;;  %s2681_s16 = smov 0  }
  0x14   :  { %s2683_s17 = smov 0   ;;  %s2685_s18 = smov 0  }
  0x15 LB: > { %3226 = sst [smem:[#allocation30_spill]] %s2591_s16  ;;  %s2706_s19 = sadd.s32 4294967295, %s2599_s18   ;;  %s2599_s18 = sphi %s2685_s18, %s33_s18   ;;  %s2595_s17 = sphi %s2683_s17, %s3268_s17   ;;  %s2591_s16 = sphi %s2681_s16, %s3267_s16   ;;  %s2587_s15 = sphi %s2679_s15, %s3266_s15   ;;  %s2583_s14 = sphi %s2677_s14, %s3265_s14   ;;  %s2579_s13 = sphi %s2675_s13, %s3264_s13  }
  0x16   : > { %p1548_p0 = scmp.ge.s32.totalorder %s2599_s18, 1  ;;  %p3210_p1 = scmp.eq.s32.totalorder %s2706_s19, 0 }
  0x17   : > { %p303_p2 = scmp.lt.s32.totalorder %s2599_s18, 3  ;;  %s2601_s21 = smov [#allocation9]  }
  0x18   : > { %s318_s22 = sshll.u32 %s2601_s21, 4  ;;  %s2602_s24 = smov [#allocation10]   ;;  %s2715_s22 = int_to_ptr.vmem [resolvable:$true] %s318_s22 }
  0x19   : > { %p2711_p3 = pnand %p1548_p0, %p303_p2  ;;  %s331_s25 = sshll.u32 %s2602_s24, 4  ;;  %s2726_s25 = int_to_ptr.vmem [resolvable:$true] %s331_s25 }
  0x1a   : > { %s2603_s26 = smov [#allocation13]   ;;  %s3230_s2 = sld [smem:[#allocation33_spill]] }
  0x1b   : > { %s3227_s20 = scalar_select %p2711_p3, 1, 0 }
  0x1c   : > { %p2048_p4 = pneg %p2711_p3  ;;  %s2728_s27 = sshll.u32 %s2603_s26, 4  ;;  %s358_s27 = int_to_ptr.vmem [resolvable:$true] %s2728_s27 }
  0x1d   : > { %3228 = sst [smem:[#allocation31_spill]] %s3227_s20 }
  0x1e   : > { %p2722_p6 = pnand %p2048_p4, %p3210_p1 }
  0x20   : > { %s2209_s30 = scalar_lea.hbm %s3230_s2, 2048  ;;  %p2738_p8 = pneg %p2722_p6 }
  0x21   : > { %p2210_p7 = scmp.ne.s32.totalorder %s3230_s2, %s2209_s30  ;;  %p2216_p11 = scmp.lt.u32.totalorder %s2209_s30, %s3230_s2 }
  0x23   : > { %p2212_p9 = pnand %p2738_p8, %p2210_p7 }
  0x25   : > { %p2213_p10 = pneg %p2212_p9 }
  0x27   : > { %p2218_p12 = pnand %p2216_p11, %p2213_p10 }
  0x29   : > { %2221 = shalt.err (!%p2218_p12)
}
  0x2a   : > { %s2222_s28 = scalar_lea.vmem %s2715_s22, 2048  ;;  %p2230_p4 = scmp.lt.s32.totalorder %s2715_s22, %s2715_s22 }
  0x2b   : > { %p2223_p13 = scmp.ne.s32.totalorder %s2715_s22, %s2222_s28  ;;  %p2231_p5 = scmp.lt.s32.totalorder %s2222_s28, %s2222_s28 }
  0x2d   : > { %p2225_p0 = pnand %p2223_p13, %p2738_p8  ;;  %p2232_p7 = por %p2231_p5, %p2230_p4 }
  0x2f   : > { %p2226_p2 = pneg %p2225_p0 }
  0x31   : > { %p2233_p9 = pnand %p2232_p7, %p2226_p2 }
  0x33   : > { %2236 = shalt.err (!%p2233_p9)
}
  0x34   : > { %s3212_s29 = smov 128   ;;  %s3214_s30 = smov 8  }
  0x35   : > { %2051 = dma.hbm_to_vmem [thread:$0]  (!%p2722_p6), %s3230_s2, 2048, %s2715_s22, [#allocation8], %s3212_s29, %s3212_s29, %s3214_s30  }
  0x36   : > { %s3232_s3 = sld [smem:[#allocation34_spill]] }
  0x3c   : > { %s2237_s28 = scalar_lea.hbm %s3232_s3, 2048 }
  0x3d   : > { %p2238_p5 = scmp.ne.s32.totalorder %s3232_s3, %s2237_s28  ;;  %p2244_p12 = scmp.lt.u32.totalorder %s2237_s28, %s3232_s3 }
  0x3f   : > { %p2240_p10 = pnand %p2238_p5, %p2738_p8 }
  0x41   : > { %p2241_p11 = pneg %p2240_p10 }
  0x43   : > { %p2246_p13 = pnand %p2244_p12, %p2241_p11 }
  0x45   : > { %2249 = shalt.err (!%p2246_p13)
}
  0x46   : > { %s2250_s22 = scalar_lea.vmem %s2726_s25, 2048  ;;  %p2258_p7 = scmp.lt.s32.totalorder %s2726_s25, %s2726_s25 }
  0x47   : > { %p2251_p0 = scmp.ne.s32.totalorder %s2726_s25, %s2250_s22  ;;  %p2259_p9 = scmp.lt.s32.totalorder %s2250_s22, %s2250_s22 }
  0x49   : > { %p2253_p2 = pnand %p2251_p0, %p2738_p8  ;;  %p2260_p5 = por %p2259_p9, %p2258_p7 }
  0x4b   : > { %p2254_p4 = pneg %p2253_p2 }
  0x4d   : > { %p2261_p10 = pnand %p2260_p5, %p2254_p4 }
  0x4f   : > { %2264 = shalt.err (!%p2261_p10)
}
  0x50   : > { %2054 = dma.hbm_to_vmem [thread:$0]  (!%p2722_p6), %s3232_s3, 2048, %s2726_s25, [#allocation11], %s3212_s29, %s3212_s29, %s3214_s30  }
  0x51   : > { %s3233_s5 = sld [smem:[#allocation36_spill]] }
  0x57   : > { %s2265_s11 = scalar_lea.hbm %s3233_s5, 2048 }
  0x58   : > { %p2266_p11 = scmp.ne.s32.totalorder %s3233_s5, %s2265_s11  ;;  %p2272_p0 = scmp.lt.u32.totalorder %s2265_s11, %s3233_s5 }
  0x5a   : > { %p2268_p12 = pnand %p2266_p11, %p2738_p8 }
  0x5c   : > { %p2269_p13 = pneg %p2268_p12 }
  0x5e   : > { %p2274_p2 = pnand %p2272_p0, %p2269_p13 }
  0x60   : > { %2277 = shalt.err (!%p2274_p2)
}
  0x61   : > { %s2278_s22 = scalar_lea.vmem %s358_s27, 2048  ;;  %p2286_p5 = scmp.lt.s32.totalorder %s358_s27, %s358_s27 }
  0x62   : > { %p2279_p4 = scmp.ne.s32.totalorder %s358_s27, %s2278_s22  ;;  %p2287_p10 = scmp.lt.s32.totalorder %s2278_s22, %s2278_s22 }
  0x64   : > { %p2281_p7 = pnand %p2279_p4, %p2738_p8  ;;  %p2288_p1 = por %p2287_p10, %p2286_p5 }
  0x66   : > { %p2282_p9 = pneg %p2281_p7 }
  0x68   : > { %p2289_p3 = pnand %p2288_p1, %p2282_p9 }
  0x6a   : > { %2292 = shalt.err (!%p2289_p3)
}
  0x6b   : > { %2060 = dma.hbm_to_vmem [thread:$0]  (!%p2722_p6), %s3233_s5, 2048, %s358_s27, [#allocation14], %s3212_s29, %s3212_s29, %s3214_s30  }
  0x6c   : > { %s2606_s10 = smov [#allocation16]   ;;  %s3234_s7 = sld [smem:[#allocation38_spill]] }
  0x6d   : > { %s383_s16 = sshll.u32 %s2606_s10, 4  ;;  %s384_s16 = int_to_ptr.vmem [resolvable:$true] %s383_s16 }
  0x72   : > { %s2293_s12 = scalar_lea.hbm %s3234_s7, 4096 }
  0x73   : > { %p2294_p1 = scmp.ne.s32.totalorder %s3234_s7, %s2293_s12  ;;  %p2300_p12 = scmp.lt.u32.totalorder %s2293_s12, %s3234_s7 }
  0x75   : > { %p2296_p3 = pnand %p2294_p1, %p2738_p8 }
  0x77   : > { %p2297_p11 = pneg %p2296_p3 }
  0x79   : > { %p2302_p13 = pnand %p2300_p12, %p2297_p11 }
  0x7b   : > { %2305 = shalt.err (!%p2302_p13)
}
  0x7c   : > { %s2306_s27 = scalar_lea.vmem %s384_s16, 4096  ;;  %p2314_p7 = scmp.lt.s32.totalorder %s384_s16, %s384_s16 }
  0x7d   : > { %p2307_p0 = scmp.ne.s32.totalorder %s384_s16, %s2306_s27  ;;  %p2315_p9 = scmp.lt.s32.totalorder %s2306_s27, %s2306_s27 }
  0x7f   : > { %p2309_p2 = pnand %p2307_p0, %p2738_p8  ;;  %p2316_p5 = por %p2315_p9, %p2314_p7 }
  0x81   : > { %p2310_p4 = pneg %p2309_p2 }
  0x83   : > { %p2317_p10 = pnand %p2316_p5, %p2310_p4 }
  0x85   : > { %2320 = shalt.err (!%p2317_p10)
}
  0x86   : > { %s2607_s25 = smov 256   ;;  %s2608_s1 = smov 16  }
  0x87   : > { %2066 = dma.hbm_to_vmem [thread:$0]  (!%p2722_p6), %s3234_s7, 4096, %s384_s16, [#allocation17], %s2607_s25, %s2607_s25, %s2608_s1  }
  0x88   : > { %s2609_s11 = smov [#allocation12]   ;;  %s2610_s24 = smov [#allocation15]  }
  0x89   : > { %s344_s12 = sshll.u32 %s2609_s11, 4  ;;  %s370_s26 = sshll.u32 %s2610_s24, 4  ;;  %s345_s12 = int_to_ptr.vmem [resolvable:$true] %s344_s12  ;;  %s2828_s26 = int_to_ptr.vmem [resolvable:$true] %s370_s26 }
  0x8a   : > { %s3235_s4 = sld [smem:[#allocation35_spill]] }
  0x90   : > { %s2321_s27 = scalar_lea.hbm %s3235_s4, 2048 }
  0x91   : > { %p2322_p1 = scmp.ne.s32.totalorder %s3235_s4, %s2321_s27  ;;  %p2328_p12 = scmp.lt.u32.totalorder %s2321_s27, %s3235_s4 }
  0x93   : > { %p2324_p3 = pnand %p2322_p1, %p2738_p8 }
  0x95   : > { %p2325_p11 = pneg %p2324_p3 }
  0x97   : > { %p2330_p13 = pnand %p2328_p12, %p2325_p11 }
  0x99   : > { %2333 = shalt.err (!%p2330_p13)
}
  0x9a   : > { %s2334_s25 = scalar_lea.vmem %s345_s12, 2048  ;;  %p2342_p7 = scmp.lt.s32.totalorder %s345_s12, %s345_s12 }
  0x9b   : > { %p2335_p0 = scmp.ne.s32.totalorder %s345_s12, %s2334_s25  ;;  %p2343_p9 = scmp.lt.s32.totalorder %s2334_s25, %s2334_s25 }
  0x9d   : > { %p2337_p2 = pnand %p2335_p0, %p2738_p8  ;;  %p2344_p5 = por %p2343_p9, %p2342_p7 }
  0x9f   : > { %p2338_p4 = pneg %p2337_p2 }
  0xa1   : > { %p2345_p10 = pnand %p2344_p5, %p2338_p4 }
  0xa3   : > { %2348 = shalt.err (!%p2345_p10)
}
  0xa4   : > { %s3236_s29 = smov 8   ;;  %s3237_s30 = smov 128  }
  0xa5   : > { %2057 = dma.hbm_to_vmem [thread:$0]  (!%p2722_p6), %s3235_s4, 2048, %s345_s12, [#allocation11], %s3237_s30, %s3237_s30, %s3236_s29  }
  0xa6   : > { %s3238_s6 = sld [smem:[#allocation37_spill]] }
  0xac   : > { %s2349_s28 = scalar_lea.hbm %s3238_s6, 2048 }
  0xad   : > { %p2350_p1 = scmp.ne.s32.totalorder %s3238_s6, %s2349_s28  ;;  %p2356_p12 = scmp.lt.u32.totalorder %s2349_s28, %s3238_s6 }
  0xaf   : > { %p2352_p3 = pnand %p2350_p1, %p2738_p8 }
  0xb1   : > { %p2353_p11 = pneg %p2352_p3 }
  0xb3   : > { %p2358_p13 = pnand %p2356_p12, %p2353_p11 }
  0xb5   : > { %2361 = shalt.err (!%p2358_p13)
}
  0xb6   : > { %s2362_s12 = scalar_lea.vmem %s2828_s26, 2048  ;;  %p2370_p7 = scmp.lt.s32.totalorder %s2828_s26, %s2828_s26 }
  0xb7   : > { %p2363_p0 = scmp.ne.s32.totalorder %s2828_s26, %s2362_s12  ;;  %p2371_p9 = scmp.lt.s32.totalorder %s2362_s12, %s2362_s12 }
  0xb9   : > { %p2365_p2 = pnand %p2363_p0, %p2738_p8  ;;  %p2372_p5 = por %p2371_p9, %p2370_p7 }
  0xbb   : > { %p2366_p4 = pneg %p2365_p2 }
  0xbd   : > { %p2373_p10 = pnand %p2372_p5, %p2366_p4 }
  0xbf   : > { %2376 = shalt.err (!%p2373_p10)
}
  0xc0   : > { %2063 = dma.hbm_to_vmem [thread:$0]  (!%p2722_p6), %s3238_s6, 2048, %s2828_s26, [#allocation14], %s3237_s30, %s3237_s30, %s3236_s29  }
  0xc1   : > { %s2611_s20 = smov [#allocation18]   ;;  %s2612_s24 = smov [#allocation19]  }
  0xc2   : > { %s396_s11 = sshll.u32 %s2611_s20, 4  ;;  %s410_s28 = sshll.u32 %s2612_s24, 4  ;;  %s397_s11 = int_to_ptr.vmem [resolvable:$true] %s396_s11  ;;  %s2877_s28 = int_to_ptr.vmem [resolvable:$true] %s410_s28 }
  0xc3   : > { %s2377_s10 = scalar_lea.hbm %s3204_s8, 256 }
  0xc4   : > { %p2378_p1 = scmp.ne.s32.totalorder %s3204_s8, %s2377_s10  ;;  %p2384_p12 = scmp.lt.u32.totalorder %s2377_s10, %s3204_s8 }
  0xc6   : > { %p2380_p3 = pnand %p2378_p1, %p2738_p8 }
  0xc8   : > { %p2381_p11 = pneg %p2380_p3 }
  0xca   : > { %p2386_p13 = pnand %p2384_p12, %p2381_p11 }
  0xcc   : > { %2389 = shalt.err (!%p2386_p13)
}
  0xcd   : > { %s2390_s1 = scalar_lea.vmem %s397_s11, 256  ;;  %p2398_p7 = scmp.lt.s32.totalorder %s397_s11, %s397_s11 }
  0xce   : > { %p2391_p0 = scmp.ne.s32.totalorder %s397_s11, %s2390_s1  ;;  %p2399_p9 = scmp.lt.s32.totalorder %s2390_s1, %s2390_s1 }
  0xd0   : > { %p2393_p2 = pnand %p2391_p0, %p2738_p8  ;;  %p2400_p5 = por %p2399_p9, %p2398_p7 }
  0xd2   : > { %p2394_p4 = pneg %p2393_p2 }
  0xd4   : > { %p2401_p10 = pnand %p2400_p5, %p2394_p4 }
  0xd6   : > { %2404 = shalt.err (!%p2401_p10)
}
  0xd7   : > { %2069 = dma.hbm_to_vmem [thread:$0]  (!%p2722_p6), %s3204_s8, 256, %s397_s11, [#allocation17], %s3237_s30, %s3237_s30, %s3236_s29  }
  0xd8   : > { %s2405_s10 = scalar_lea.hbm %s3205_s9, 32 }
  0xd9   : > { %p2406_p1 = scmp.ne.s32.totalorder %s3205_s9, %s2405_s10  ;;  %p2412_p12 = scmp.lt.u32.totalorder %s2405_s10, %s3205_s9 }
  0xdb   : > { %p2408_p3 = pnand %p2406_p1, %p2738_p8 }
  0xdd   : > { %p2409_p11 = pneg %p2408_p3 }
  0xdf   : > { %p2414_p13 = pnand %p2412_p12, %p2409_p11 }
  0xe1   : > { %2417 = shalt.err (!%p2414_p13)
}
  0xe2   : > { %s2418_s29 = scalar_lea.vmem %s2877_s28, 32  ;;  %p2426_p7 = scmp.lt.s32.totalorder %s2877_s28, %s2877_s28 }
  0xe3   : > { %p2419_p0 = scmp.ne.s32.totalorder %s2877_s28, %s2418_s29  ;;  %p2427_p9 = scmp.lt.s32.totalorder %s2418_s29, %s2418_s29 }
  0xe5   : > { %p2421_p2 = pnand %p2419_p0, %p2738_p8  ;;  %p2428_p5 = por %p2427_p9, %p2426_p7 }
  0xe7   : > { %p2422_p4 = pneg %p2421_p2 }
  0xe9   : > { %p2429_p10 = pnand %p2428_p5, %p2422_p4 }
  0xeb   : > { %2432 = shalt.err (!%p2429_p10)
}
  0xec   : > { %2072 = dma.hbm_to_vmem [thread:$0]  (!%p2722_p6), %s3205_s9, 32, %s2877_s28, [#allocation20]  }
  0xed   : > { %s1547_s21 = sadd.s32 4294967294, %s2599_s18   ;;  %s45_s1 = sadd.s32 1, %s2595_s17 }
  0xee   : > { %p47_p8 = scmp.ge.s32.totalorder %s45_s1, 2  ;;  %s54_s23 = sadd.s32 1, %s2587_s15 }
  0xef   : > { %p61_p1 = scmp.ne.s32.totalorder %s2587_s15, %s2583_s14  ;;  %p62_p3 = scmp.eq.s32.totalorder %s2599_s18, 0 }
  0xf0   : > { %s3270_s1 = smov (%p47_p8, %s45_s1), 0  ;;  %p67_p12 = scmp.ne.s32.totalorder %s2583_s14, %s2579_s13 }
  0xf1   : > { %p2931_p11 = por %p62_p3, %p61_p1  ;;  %s49_s28 = ssub.s32 %s2595_s17, %s3270_s1 }
  0xf2   : > { %p290_p6 = scmp.eq.s32.totalorder %s2706_s19, 1  ;;  %p52_p13 = scmp.eq.s32.totalorder %s49_s28, 0 }
  0xf3   : > { %p3240_p0 = scmp.eq.s32.totalorder %s2706_s19, 0  ;;  %p296_p7 = scmp.eq.s32.totalorder %s1547_s21, 1 }
  0xf4   : > { %p2946_p4 = por %p290_p6, %p61_p1  ;;  %p2092_p5 = scmp.lt.s32.totalorder %s2599_s18, 2 }
  0xf5   : > { %p2942_p2 = por %p3240_p0, %p67_p12  ;;  %p2953_p9 = por %p296_p7, %p67_p12 }
  0xf6   : > { %s3242_s22 = scalar_select %p2946_p4, 1, 0 }
  0xf7   : > { %s3241_s24 = scalar_select %p2942_p2, 1, 0 }
  0xf8   : > { %s2951_s27 = scalar_select %p52_p13, %s2587_s15, %s54_s23  }
  0xf9   : > { %s3243_s10 = scalar_select %p2953_p9, 1, 0 }
  0xfa   : > { %s421_s16 = sand.u32 1, %s2587_s15   ;;  %s1559_s12 = sshll.u32 %s2595_s17, 7 }
  0xfb   : > { %s2960_s25 = sshll.u32 %s421_s16, 3  ;;  %s2965_s30 = scalar_lea.hbm %s3196_s0, %s1559_s12 }
  0xfc   : > { %s425_s11 = scalar_lea.vmem [#allocation4], %s2960_s25  ;;  %p2970_p10 = pnand %p2092_p5, %p2931_p11 }
  0xfd   : > { %s433_s21 = sshll.u32 %s425_s11, 4  ;;  %s3245_s29 = sld [smem:[#allocation32_spill]]  ;;  %s2974_s21 = int_to_ptr.vmem [resolvable:$true] %s433_s21 }
  0xfe   : > { %s422_s3 = scalar_lea.sflag [#allocation5], %s421_s16  ;;  %s2433_s4 = scalar_lea.hbm %s2965_s30, 128 }
  0xff   : > { %p2434_p8 = scmp.ne.s32.totalorder %s2965_s30, %s2433_s4  ;;  %p2435_p1 = pneg %p2970_p10 }
 0x100   : > { %s2438_s5 = scalar_lea.hbm %s3196_s0, 256  ;;  %p2439_p12 = scmp.lt.u32.totalorder %s2965_s30, %s3196_s0 }
 0x101   : > { %p2436_p3 = pnand %p2435_p1, %p2434_p8  ;;  %p2440_p6 = scmp.lt.u32.totalorder %s2438_s5, %s2433_s4 }
 0x102   : > { %p2442_p0 = scmp.lt.u32.totalorder %s2433_s4, %s2965_s30 }
 0x103   : > { %s2979_s2 = scalar_lea.hbm %s3245_s29, %s1559_s12  ;;  %p2437_p11 = pneg %p2436_p3 }
 0x104   : > { %p2441_p13 = por %p2440_p6, %p2439_p12 }
 0x106   : > { %p2443_p7 = por %p2442_p0, %p2441_p13 }
 0x108   : > { %p2444_p5 = pnand %p2443_p7, %p2437_p11 }
 0x10a   : > { %2447 = shalt.err (!%p2444_p5)
}
 0x10b   : > { %s2448_s16 = scalar_lea.vmem %s2974_s21, 128  ;;  %s2613_s12 = smov [#allocation4]  }
 0x10c   : > { %p2449_p8 = scmp.ne.s32.totalorder %s2974_s21, %s2448_s16  ;;  %s2453_s28 = sshll.u32 %s2613_s12, 4  ;;  %s2454_s28 = int_to_ptr.vmem [resolvable:$false] %s2453_s28 }
 0x10d   : > { %s2455_s6 = scalar_lea.vmem %s2454_s28, 256  ;;  %p2456_p4 = scmp.lt.s32.totalorder %s2974_s21, %s2454_s28 }
 0x10e   : > { %p2451_p3 = pnand %p2449_p8, %p2435_p1  ;;  %p2457_p12 = scmp.lt.s32.totalorder %s2455_s6, %s2448_s16 }
 0x110   : > { %p2452_p9 = pneg %p2451_p3  ;;  %p2458_p6 = por %p2457_p12, %p2456_p4 }
 0x112   : > { %p2459_p13 = pnand %p2458_p6, %p2452_p9 }
 0x114   : > { %2462 = shalt.err (!%p2459_p13)
}
 0x115   : > { %2076 = dma.hbm_to_vmem [thread:$0]  (!%p2970_p10), %s2965_s30, 128, %s2974_s21, %s422_s3  }
 0x116   : > { %s440_s4 = sand.u32 1, %s2599_s18   ;;  %s444_s5 = scalar_lea.vmem [#allocation7], %s2960_s25 }
 0x117   : > { %s451_s7 = sshll.u32 %s444_s5, 4  ;;  %s441_s26 = scalar_lea.sflag [#allocation8], %s440_s4  ;;  %s452_s7 = int_to_ptr.vmem [resolvable:$true] %s451_s7 }
 0x118   : > { %s2463_s20 = scalar_lea.hbm %s2979_s2, 128  ;;  %s2468_s12 = scalar_lea.hbm %s3245_s29, 256 }
 0x119   : > { %p2464_p4 = scmp.ne.s32.totalorder %s2979_s2, %s2463_s20  ;;  %p2469_p0 = scmp.lt.u32.totalorder %s2979_s2, %s3245_s29 }
 0x11a   : > { %p2470_p7 = scmp.lt.u32.totalorder %s2468_s12, %s2463_s20  ;;  %p2472_p8 = scmp.lt.u32.totalorder %s2463_s20, %s2979_s2 }
 0x11b   : > { %p2466_p9 = pnand %p2464_p4, %p2435_p1 }
 0x11c   : > { %p2471_p5 = por %p2470_p7, %p2469_p0 }
 0x11d   : > { %p2467_p11 = pneg %p2466_p9 }
 0x11e   : > { %p2473_p3 = por %p2472_p8, %p2471_p5 }
 0x120   : > { %p2474_p12 = pnand %p2473_p3, %p2467_p11 }
 0x122   : > { %2477 = shalt.err (!%p2474_p12)
}
 0x123   : > { %s2478_s3 = scalar_lea.vmem %s452_s7, 128  ;;  %s2614_s25 = smov [#allocation7]  }
 0x124   : > { %p2479_p6 = scmp.ne.s32.totalorder %s452_s7, %s2478_s3  ;;  %s2483_s30 = sshll.u32 %s2614_s25, 4  ;;  %s2484_s30 = int_to_ptr.vmem [resolvable:$false] %s2483_s30 }
 0x125   : > { %s2485_s21 = scalar_lea.vmem %s2484_s30, 256  ;;  %p2486_p9 = scmp.lt.s32.totalorder %s452_s7, %s2484_s30 }
 0x126   : > { %p2481_p13 = pnand %p2479_p6, %p2435_p1  ;;  %p2487_p2 = scmp.lt.s32.totalorder %s2485_s21, %s2478_s3 }
 0x128   : > { %p2482_p4 = pneg %p2481_p13  ;;  %p2488_p0 = por %p2487_p2, %p2486_p9 }
 0x12a   : > { %p2489_p7 = pnand %p2488_p0, %p2482_p4 }
 0x12c   : > { %2492 = shalt.err (!%p2489_p7)
}
 0x12d   : > { %2079 = dma.hbm_to_vmem [thread:$0]  (!%p2970_p10), %s2979_s2, 128, %s452_s7, %s441_s26  }
 0x12e   : > { %s3246_s4 = sld [smem:[#allocation31_spill]] }
 0x134   : > { %p3247_p11 = scmp.ne.s32.totalorder %s3246_s4, 0 }
 0x135   : > { %s3030_s5 = sand.u32 (!%p3247_p11), 1, %s2583_s14   ;;  %p3248_p2 = scmp.ne.s32.totalorder (!%p3247_p11), %s3241_s24, 0 }
 0x136   : > { %460 = sbr.rel (%p3247_p11) target bundleno = 2778 (0xada), region = 60  ;;  %s3033_s20 = sshll.u32 (!%p3247_p11), %s3030_s5, 3 }
 0x137   : > { %s463_s11 = scalar_lea.sflag (!%p3247_p11), [#allocation5], %s3030_s5  ;;  %s466_s16 = scalar_lea.vmem (!%p3247_p11), [#allocation4], %s3033_s20 }
 0x13d   : > { %2546 = dma.done.wait (%p3248_p2), %s463_s11, 128  }
 0x13e   : > { %2548 = vsyncadd (%p3248_p2), %s463_s11, 4294967168  ;;  %s471_s2 = sand.u32 1, %s2706_s19   ;;  %s475_s7 = scalar_lea.vmem [#allocation7], %s3033_s20 }
 0x13f   : > { %s472_s23 = scalar_lea.sflag [#allocation8], %s471_s2 }
 0x140   : > { %2550 = dma.done.wait (%p3248_p2), %s472_s23, 128  }
 0x141   : > { %2552 = vsyncadd (%p3248_p2), %s472_s23, 4294967168  ;;  %p3249_p10 = scmp.eq.s32.totalorder %s2706_s19, 0 }
 0x143   : > { %2554 = dma.done.wait (%p3249_p10), [#allocation8], 2048   ;;  %p3250_p1 = pmov %p3249_p10 }
 0x145   : > { %2556 = vsyncadd (%p3250_p1), [#allocation8], 4294965248  ;;  %p3251_p5 = pmov %p3250_p1 }
 0x146   : > { %p3252_p8 = pmov %p3250_p1 }
 0x147   : > { %2558 = dma.done.wait (%p3251_p5), [#allocation11], 4096  }
 0x148   : > { %2560 = vsyncadd (%p3252_p8), [#allocation11], 4294963200  ;;  %p3253_p3 = pmov %p3250_p1 }
 0x149   : > { %p3254_p12 = pmov %p3250_p1 }
 0x14a   : > { %2562 = dma.done.wait (%p3253_p3), [#allocation14], 4096  }
 0x14b   : > { %2564 = vsyncadd (%p3254_p12), [#allocation14], 4294963200  ;;  %p3255_p6 = pmov %p3250_p1 }
 0x14c   : > { %p3256_p13 = pmov %p3250_p1 }
 0x14d   : > { %2566 = dma.done.wait (%p3255_p6), [#allocation17], 4352  }
 0x14e   : > { %2568 = vsyncadd (%p3256_p13), [#allocation17], 4294962944  ;;  %p3257_p4 = pmov %p3250_p1 }
 0x14f   : > { %p3258_p9 = pmov %p3250_p1 }
 0x150   : > { %2570 = dma.done.wait (%p3257_p4), [#allocation20], 32  }
 0x151   : > { %2572 = vsyncadd (%p3258_p9), [#allocation20], 4294967264  ;;  %vm555_vm0 = vcmask 7168   ;;  %v2615_v0 = vmov 0.0|0.0   ;;  %vm2616_vm1 = vmmov 0   ;;  %v2617_v1 = vmov 0.0  }
 0x152   : > { %1858 = vmatprep.subr.bf16.mxu0 %v2615_v0  ;;  %1715 = vmatprep.mubr.msk.f32.mxu0 %vm2616_vm1, %v2617_v1  ;;  %556 = vst.msk [vmem:[#allocation3] sm:$0xff] %vm555_vm0, %v2617_v1  ;;  %v557_v2 = vld [vmem:[%s466_s16] sm:$0xff]  ;;  %v568_v7 = vld [vmem:[#allocation9 + $0x10] sm:$0xff]  ;;  %v569_v8 = vld [vmem:[#allocation9 + $0x18] sm:$0xff]  ;;  %v2618_v24 = vmov 0   ;;  %s3259_s19 = sld [smem:[#allocation30_spill]] }
 0x153   : > { %1882 = vmatprep.subr.bf16.mxu1 %v2615_v0  ;;  %1750 = vmatprep.mubr.msk.f32.mxu1 %vm2616_vm1, %v2617_v1  ;;  %v566_v3 = vld [vmem:[#allocation9] sm:$0xff]  ;;  %v567_v4 = vld [vmem:[#allocation9 + $0x8] sm:$0xff]  ;;  %v559_v5 = vmul.f32 %v557_v2, %v557_v2  ;;  %v1862_v9 = vpack.c.bf16 %v569_v8, %v568_v7  ;;  %v572_v13 = vld [vmem:[#allocation9 + $0x30] sm:$0xff]  ;;  %s548_s26 = scalar_lea.vmem [#allocation21], %s3033_s20  ;;  %s3260_s3 = sld [smem:[#allocation39_spill]] }
 0x154   : > { %v1859_v6 = vpack.c.bf16 %v567_v4, %v566_v3  ;;  %v570_v10 = vld [vmem:[#allocation9 + $0x20] sm:$0xff]  ;;  %v571_v11 = vld [vmem:[#allocation9 + $0x28] sm:$0xff]  ;;  %v573_v14 = vld [vmem:[#allocation9 + $0x38] sm:$0xff]  ;;  %2166 = vset.pattern.permute.xlu0 %v2618_v24  ;;  %s1366_s12 = sshll.u32 %s548_s26, 4  ;;  %s1353_s30 = scalar_lea.sflag [#allocation6], %s3030_s5  ;;  %s3149_s12 = int_to_ptr.vmem [resolvable:$true] %s1366_s12 }
 0x155   : > { %560 = vadd.xlane.f32.xlu0 %v559_v5  ;;  %v1865_v12 = vpack.c.bf16 %v571_v11, %v570_v10  ;;  %v1868_v15 = vpack.c.bf16 %v573_v14, %v572_v13  ;;  %v574_v16 = vld [vmem:[#allocation9 + $0x40] sm:$0xff]  ;;  %v575_v17 = vld [vmem:[#allocation9 + $0x48] sm:$0xff]  ;;  %v576_v19 = vld [vmem:[#allocation9 + $0x50] sm:$0xff]  ;;  %s2493_s21 = scalar_lea.vmem %s3149_s12, 128  ;;  %p3261_p7 = scmp.ne.s32.totalorder %s3242_s22, 0 }
 0x156   : > { %1860 = vmatpush3.bf16.msra.mxu0 %v1859_v6  ;;  %v1871_v18 = vpack.c.bf16 %v575_v17, %v574_v16  ;;  %v577_v20 = vld [vmem:[#allocation9 + $0x58] sm:$0xff]  ;;  %v578_v22 = vld [vmem:[#allocation9 + $0x60] sm:$0xff]  ;;  %v579_v23 = vld [vmem:[#allocation9 + $0x68] sm:$0xff]  ;;  %p2494_p0 = scmp.ne.s32.totalorder %s3149_s12, %s2493_s21  ;;  %s2619_s4 = smov [#allocation21]  }
 0x157   : > { %1861 = vmatprep.subr.bf16.mxu0 %v2615_v0  ;;  %v1874_v21 = vpack.c.bf16 %v577_v20, %v576_v19  ;;  %v1877_v25 = vpack.c.bf16 %v579_v23, %v578_v22  ;;  %v580_v26 = vld [vmem:[#allocation9 + $0x70] sm:$0xff]  ;;  %v581_v27 = vld [vmem:[#allocation9 + $0x78] sm:$0xff]  ;;  %v706_v35 = vld [vmem:[#allocation10] sm:$0xff]  ;;  %s2497_s20 = sshll.u32 %s2619_s4, 4  ;;  %s2498_s20 = int_to_ptr.vmem [resolvable:$false] %s2497_s20 }
 0x158   : > { %v1880_v28 = vpack.c.bf16 %v581_v27, %v580_v26  ;;  %v707_v36 = vld [vmem:[#allocation10 + $0x8] sm:$0xff]  ;;  %v1574_v40 = vld [vmem:[#allocation18] ss:$0 sm:$0xff]  ;;  %v708_v50 = vld [vmem:[#allocation10 + $0x10] sm:$0xff]  ;;  %s1595_s24 = sshll.u32 %s3259_s19, 7  ;;  %p2495_p11 = pnand %p2494_p0, %p3261_p7 }
 0x159   : > { %v558_v29 = vld [vmem:[#allocation3] sm:$0xff]  ;;  %v1883_v37 = vpack.c.bf16 %v707_v36, %v706_v35  ;;  %v710_v53 = vld [vmem:[#allocation10 + $0x20] sm:$0xff]  ;;  %v711_v54 = vld [vmem:[#allocation10 + $0x28] sm:$0xff]  ;;  %s3147_s25 = scalar_lea.hbm %s3260_s3, %s1595_s24  ;;  %s2499_s11 = scalar_lea.vmem %s2498_s20, 256 }
 0x15a   : > { %1863 = vmatpush3.bf16.msra.mxu0 %v1862_v9  ;;  %v709_v51 = vld [vmem:[#allocation10 + $0x18] sm:$0xff]  ;;  %v1889_v55 = vpack.c.bf16 %v711_v54, %v710_v53  ;;  %v712_v56 = vld [vmem:[#allocation10 + $0x30] sm:$0xff]  ;;  %v714_v59 = vld [vmem:[#allocation10 + $0x40] sm:$0xff]  ;;  %p2496_p2 = pneg %p2495_p11  ;;  %p2500_p10 = scmp.lt.s32.totalorder %s3149_s12, %s2498_s20 }
 0x15b   : > { %1864 = vmatprep.subr.bf16.mxu0 %v2615_v0  ;;  %1884 = vmatpush3.bf16.msra.mxu1 %v1883_v37  ;;  %v1886_v52 = vpack.c.bf16 %v709_v51, %v708_v50  ;;  %v713_v57 = vld [vmem:[#allocation10 + $0x38] sm:$0xff]  ;;  %v715_v60 = vld [vmem:[#allocation10 + $0x48] sm:$0xff]  ;;  %v716_v62 = vld [vmem:[#allocation10 + $0x50] sm:$0xff]  ;;  %p2501_p1 = scmp.lt.s32.totalorder %s2499_s11, %s2493_s21 }
 0x15c   : > { %1885 = vmatprep.subr.bf16.mxu1 %v2615_v0  ;;  %v1892_v58 = vpack.c.bf16 %v713_v57, %v712_v56  ;;  %v1895_v61 = vpack.c.bf16 %v715_v60, %v714_v59  ;;  %v717_v63 = vld [vmem:[#allocation10 + $0x58] sm:$0xff]  ;;  %v718_v3 = vld [vmem:[#allocation10 + $0x60] sm:$0xff]  ;;  %v719_v4 = vld [vmem:[#allocation10 + $0x68] sm:$0xff] }
 0x15d   : > { %v1901_v5 = vpack.c.bf16 %v719_v4, %v718_v3  ;;  %v720_v6 = vld [vmem:[#allocation10 + $0x70] sm:$0xff]  ;;  %v721_v7 = vld [vmem:[#allocation10 + $0x78] sm:$0xff]  ;;  %v1577_v20 = vld [vmem:[#allocation18 + $0xa] ss:$0 sm:$0xff]  ;;  %p2502_p5 = por %p2501_p1, %p2500_p10 }
 0x15e   : > { %1866 = vmatpush3.bf16.msra.mxu0 %v1865_v12  ;;  %v1904_v8 = vpack.c.bf16 %v721_v7, %v720_v6  ;;  %v831_v23 = vld [vmem:[#allocation12] sm:$0xff]  ;;  %v832_v24 = vld [vmem:[#allocation12 + $0x8] sm:$0xff]  ;;  %v833_v37 = vld [vmem:[#allocation12 + $0x10] sm:$0xff] }
 0x15f   : > { %1867 = vmatprep.subr.bf16.mxu0 %v2615_v0  ;;  %1887 = vmatpush3.bf16.msra.mxu1 %v1886_v52  ;;  %v1578_v26 = vld [vmem:[#allocation18 + $0x1] ss:$0 sm:$0xff]  ;;  %v842_v50 = vld [vmem:[#allocation12 + $0x58] sm:$0xff]  ;;  %v844_v53 = vld [vmem:[#allocation12 + $0x68] sm:$0xff]  ;;  %p2503_p8 = pnand %p2502_p5, %p2496_p2 }
 0x160   : > { %1888 = vmatprep.subr.bf16.mxu1 %v2615_v0  ;;  %v843_v52 = vld [vmem:[#allocation12 + $0x60] sm:$0xff]  ;;  %v846_v56 = vld [vmem:[#allocation12 + $0x78] sm:$0xff]  ;;  %v1581_v7 = vld [vmem:[#allocation18 + $0xb] ss:$0 sm:$0xff] }
 0x161   : > { %v1925_v54 = vpack.c.bf16 %v844_v53, %v843_v52 }
 0x162   : > { %1869 = vmatpush3.bf16.msra.mxu0 %v1868_v15 }
 0x163   : > { %1870 = vmatprep.subr.bf16.mxu0 %v2615_v0  ;;  %1890 = vmatpush3.bf16.msra.mxu1 %v1889_v55  ;;  %v845_v55 = vld [vmem:[#allocation12 + $0x70] sm:$0xff] }
 0x164   : > { %1891 = vmatprep.subr.bf16.mxu1 %v2615_v0  ;;  %v1928_v57 = vpack.c.bf16 %v846_v56, %v845_v55  ;;  %v1584_v55 = vld [vmem:[#allocation18 + $0x7] ss:$0 sm:$0xff] }
 0x166   : > { %1872 = vmatpush3.bf16.msra.mxu0 %v1871_v18  ;;  %v1576_v18 = vld [vmem:[#allocation18 + $0x5] ss:$0 sm:$0xff] }
 0x167   : > { %1873 = vmatprep.subr.bf16.mxu0 %v2615_v0  ;;  %1893 = vmatpush3.bf16.msra.mxu1 %v1892_v58 }
 0x168   : > { %1894 = vmatprep.subr.bf16.mxu1 %v2615_v0 }
 0x16a   : > { %1875 = vmatpush3.bf16.msra.mxu0 %v1874_v21 }
 0x16b   : > { %1876 = vmatprep.subr.bf16.mxu0 %v2615_v0  ;;  %1896 = vmatpush3.bf16.msra.mxu1 %v1895_v61 }
 0x16c   : > { %1897 = vmatprep.subr.bf16.mxu1 %v2615_v0 }
 0x16e   : > { %1878 = vmatpush3.bf16.msra.mxu0 %v1877_v25  ;;  %v1907_v25 = vpack.c.bf16 %v832_v24, %v831_v23 }
 0x16f   : > { %1879 = vmatprep.subr.bf16.mxu0 %v2615_v0 }
 0x172   : > { %1881 = vmatpush3.bf16.msra.mxu0 %v1880_v28 }
 0x173   : > { %1906 = vmatprep.subr.bf16.mxu0 %v2615_v0 }
 0x175   : > { %1716 = vmatmul.mubr.f32.vlgmr.msra.gmra.mrb[0].mxu0 %v557_v2  ;;  %v1898_v2 = vpack.c.bf16 %v717_v63, %v716_v62 }
 0x176   : > { %1785 = vmatprep.mubr.msk.f32.mxu0 %vm2616_vm1, %v2617_v1  ;;  %1908 = vmatpush3.bf16.msra.mxu0 %v1907_v25 }
 0x177   : > { %1899 = vmatpush3.bf16.msra.mxu1 %v1898_v2  ;;  %1909 = vmatprep.subr.bf16.mxu0 %v2615_v0 }
 0x178   : > { %1900 = vmatprep.subr.bf16.mxu1 %v2615_v0 }
 0x17b   : > { %1902 = vmatpush3.bf16.msra.mxu1 %v1901_v5  ;;  %v1580_v5 = vld [vmem:[#allocation18 + $0x6] ss:$0 sm:$0xff] }
 0x17c   : > { %1903 = vmatprep.subr.bf16.mxu1 %v2615_v0 }
 0x17f   : > { %1905 = vmatpush3.bf16.msra.mxu1 %v1904_v8 }
 0x180   : > { %1930 = vmatprep.subr.bf16.mxu1 %v2615_v0 }
 0x1e2   : > { %v561_v30 = vpop.xlane.xlu0 %560 }
 0x1e3   : > { %v562_v31 = vadd.f32 %v561_v30, %v558_v29 }
 0x1e5   : > { %564 = vst.msk [vmem:[#allocation3] sm:$0xff] %vm555_vm0, %v562_v31 }
 0x1ec   : > { %v657_v32 = vld [vmem:[#allocation3] sm:$0xff] }
 0x1ed   : > { %v658_v33 = vmax.f32 %v657_v32, 1e-12 }
 0x1ef   : > { %2167 = vrsqrt.f32 %v658_v33 }
 0x1f9   : > { %v2168_v34 = vpop.eup %2167 }
 0x1fa   : > { %663 = vperm.xlu0 %2166, %v2168_v34  }
 0x248   : > { %v648_v38 = vpop.f32.mrb[0].mxu0 }
 0x249   : > { %v1717_v39 = vpop.f32.mrb[1].mxu0 }
 0x279   : > { %v664_v41 = vpop.permute.xlu0 %663 }
 0x27a   : > { %v666_v42 = vmul.f32 %v664_v41, %v648_v38  ;;  %v834_v38 = vld [vmem:[#allocation12 + $0x18] sm:$0xff]  ;;  %v836_v41 = vld [vmem:[#allocation12 + $0x28] sm:$0xff] }
 0x27b   : > { %v1910_v39 = vpack.c.bf16 %v834_v38, %v833_v37  ;;  %v966_v37 = vld [vmem:[#allocation13 + $0x50] sm:$0xff]  ;;  %v967_v38 = vld [vmem:[#allocation13 + $0x58] sm:$0xff] }
 0x27c   : > { %v672_v43 = vadd.f32 %v1574_v40, %v666_v42  ;;  %v835_v40 = vld [vmem:[#allocation12 + $0x20] sm:$0xff] }
 0x27d   : > { %1911 = vmatpush3.bf16.msra.mxu0 %v1910_v39  ;;  %v1913_v42 = vpack.c.bf16 %v836_v41, %v835_v40  ;;  %v1946_v39 = vpack.c.bf16 %v967_v38, %v966_v37  ;;  %v968_v40 = vld [vmem:[#allocation13 + $0x60] sm:$0xff]  ;;  %v969_v41 = vld [vmem:[#allocation13 + $0x68] sm:$0xff] }
 0x27e   : > { %v1575_v44 = vmul.f32 -1.442695, %v672_v43  ;;  %1912 = vmatprep.subr.bf16.mxu0 %v2615_v0 }
 0x280   : > { %2169 = vpow2.f32 %v1575_v44  ;;  %v838_v44 = vld [vmem:[#allocation12 + $0x38] sm:$0xff] }
 0x281   : > { %1914 = vmatpush3.bf16.msra.mxu0 %v1913_v42  ;;  %v1949_v42 = vpack.c.bf16 %v969_v41, %v968_v40 }
 0x282   : > { %1915 = vmatprep.subr.bf16.mxu0 %v2615_v0 }
 0x28a   : > { %v2170_v45 = vpop.eup %2169 }
 0x28b   : > { %v676_v46 = vadd.f32 1.0, %v2170_v45 }
 0x28d   : > { %2171 = vrcp.f32 %v676_v46  ;;  %v839_v46 = vld [vmem:[#allocation12 + $0x40] sm:$0xff] }
 0x297   : > { %v2172_v47 = vpop.eup %2171 }
 0x298   : > { %v679_v48 = vmul.f32 %v2172_v47, %v672_v43  ;;  %v837_v43 = vld [vmem:[#allocation12 + $0x30] sm:$0xff]  ;;  %v840_v47 = vld [vmem:[#allocation12 + $0x48] sm:$0xff] }
 0x299   : > { %v1916_v45 = vpack.c.bf16 %v838_v44, %v837_v43  ;;  %v970_v43 = vld [vmem:[#allocation13 + $0x70] sm:$0xff]  ;;  %v971_v44 = vld [vmem:[#allocation13 + $0x78] sm:$0xff] }
 0x29a   : > { %682 = vadd.xlane.f32.xlu1 %v679_v48  ;;  %v685_v49 = vmul.f32 %v679_v48, %v679_v48 }
 0x29b   : > { %1917 = vmatpush3.bf16.msra.mxu0 %v1916_v45  ;;  %v1952_v45 = vpack.c.bf16 %v971_v44, %v970_v43  ;;  %v1589_v44 = vld [vmem:[#allocation18 + $0xd] ss:$0 sm:$0xff] }
 0x29c   : > { %1918 = vmatprep.subr.bf16.mxu0 %v2615_v0 }
 0x29e   : > { %686 = vadd.xlane.f32.xlu1 %v685_v49  ;;  %v841_v49 = vld [vmem:[#allocation12 + $0x50] sm:$0xff] }
 0x29f   : > { %v1922_v51 = vpack.c.bf16 %v842_v50, %v841_v49 }
 0x327   : > { %v683_v9 = vpop.xlane.xlu1 %682 }
 0x328   : > { %v684_v10 = vmul.f32 0.03125, %v683_v9 }
 0x32a   : > { %v689_v12 = vmul.f32 %v684_v10, %v684_v10  ;;  %v691_v16 = vsub.f32 %v679_v48, %v684_v10  ;;  %v1919_v48 = vpack.c.bf16 %v840_v47, %v839_v46  ;;  %v956_v10 = vld [vmem:[#allocation13] sm:$0xff] }
 0x32b   : > { %v687_v11 = vpop.xlane.xlu1 %686 }
 0x32c   : > { %v688_v13 = vmul.f32 0.03125, %v687_v11  ;;  %1920 = vmatpush3.bf16.msra.mxu0 %v1919_v48  ;;  %v957_v11 = vld [vmem:[#allocation13 + $0x8] sm:$0xff] }
 0x32d   : > { %1921 = vmatprep.subr.bf16.mxu0 %v2615_v0 }
 0x32e   : > { %v690_v14 = vsub.f32 %v688_v13, %v689_v12  ;;  %v1931_v12 = vpack.c.bf16 %v957_v11, %v956_v10  ;;  %v1582_v13 = vld [vmem:[#allocation18 + $0x2] ss:$0 sm:$0xff] }
 0x330   : > { %v692_v15 = vadd.f32 0.1, %v690_v14  ;;  %1923 = vmatpush3.bf16.msra.mxu0 %v1922_v51 }
 0x331   : > { %1924 = vmatprep.subr.bf16.mxu0 %v2615_v0 }
 0x332   : > { %2173 = vrsqrt.f32 %v692_v15 }
 0x334   : > { %1926 = vmatpush3.bf16.msra.mxu0 %v1925_v54 }
 0x335   : > { %1927 = vmatprep.subr.bf16.mxu0 %v2615_v0 }
 0x338   : > { %1929 = vmatpush3.bf16.msra.mxu0 %v1928_v57  ;;  %v1585_v57 = vld [vmem:[#allocation18 + $0xc] ss:$0 sm:$0xff] }
 0x339   : > { %1954 = vmatprep.subr.bf16.mxu0 %v2615_v0 }
 0x33c   : > { %v2174_v17 = vpop.eup %2173 }
 0x33d   : > { %v694_v19 = vmul.f32 %v2174_v17, %v691_v16 }
 0x33f   : > { %v699_v21 = vmul.f32 %v1576_v18, %v694_v19 }
 0x341   : > { %v3094_v22 = vadd.f32 %v1577_v20, %v699_v21 }
 0x343   : > { %1751 = vmatmul.mubr.f32.vlgmr.msra.gmra.mrb[0].mxu1 %v3094_v22 }
 0x344   : > { %1820 = vmatprep.mubr.msk.f32.mxu1 %vm2616_vm1, %v2617_v1  ;;  %1932 = vmatpush3.bf16.msra.mxu1 %v1931_v12  ;;  %v1083_v12 = vld [vmem:[#allocation15 + $0x10] sm:$0xff] }
 0x345   : > { %1933 = vmatprep.subr.bf16.mxu1 %v2615_v0 }
 0x416   : > { %v792_v27 = vpop.f32.mrb[0].mxu1 }
 0x417   : > { %v793_v28 = vadd.f32 %v1578_v26, %v792_v27  ;;  %v1752_v29 = vpop.f32.mrb[1].mxu1  ;;  %v958_v26 = vld [vmem:[#allocation13 + $0x10] sm:$0xff]  ;;  %v959_v27 = vld [vmem:[#allocation13 + $0x18] sm:$0xff] }
 0x418   : > { %v961_v29 = vld [vmem:[#allocation13 + $0x28] sm:$0xff] }
 0x419   : > { %v796_v30 = vadd.f32 %v793_v28, %v3094_v22  ;;  %v1934_v28 = vpack.c.bf16 %v959_v27, %v958_v26  ;;  %v1092_v26 = vld [vmem:[#allocation15 + $0x58] sm:$0xff] }
 0x41b   : > { %v1579_v31 = vmul.f32 -1.442695, %v796_v30  ;;  %1935 = vmatpush3.bf16.msra.mxu1 %v1934_v28  ;;  %v1093_v28 = vld [vmem:[#allocation15 + $0x60] sm:$0xff] }
 0x41c   : > { %1936 = vmatprep.subr.bf16.mxu1 %v2615_v0 }
 0x41d   : > { %2175 = vpow2.f32 %v1579_v31  ;;  %v962_v31 = vld [vmem:[#allocation13 + $0x30] sm:$0xff] }
 0x427   : > { %v2176_v32 = vpop.eup %2175 }
 0x428   : > { %v800_v33 = vadd.f32 1.0, %v2176_v32  ;;  %v963_v32 = vld [vmem:[#allocation13 + $0x38] sm:$0xff] }
 0x42a   : > { %2177 = vrcp.f32 %v800_v33  ;;  %v1940_v33 = vpack.c.bf16 %v963_v32, %v962_v31  ;;  %v1096_v31 = vld [vmem:[#allocation15 + $0x78] sm:$0xff] }
 0x434   : > { %v2178_v34 = vpop.eup %2177 }
 0x435   : > { %v803_v35 = vmul.f32 %v2178_v34, %v796_v30  ;;  %v964_v34 = vld [vmem:[#allocation13 + $0x40] sm:$0xff] }
 0x437   : > { %806 = vadd.xlane.f32.xlu1 %v803_v35  ;;  %v809_v36 = vmul.f32 %v803_v35, %v803_v35 }
 0x43b   : > { %810 = vadd.xlane.f32.xlu1 %v809_v36 }
 0x4c4   : > { %v807_v58 = vpop.xlane.xlu1 %806 }
 0x4c5   : > { %v808_v59 = vmul.f32 0.03125, %v807_v58 }
 0x4c7   : > { %v813_v61 = vmul.f32 %v808_v59, %v808_v59  ;;  %v815_v3 = vsub.f32 %v803_v35, %v808_v59  ;;  %v965_v35 = vld [vmem:[#allocation13 + $0x48] sm:$0xff] }
 0x4c8   : > { %v811_v60 = vpop.xlane.xlu1 %810  ;;  %v1943_v36 = vpack.c.bf16 %v965_v35, %v964_v34 }
 0x4c9   : > { %v812_v62 = vmul.f32 0.03125, %v811_v60  ;;  %v1081_v60 = vld [vmem:[#allocation15] sm:$0xff] }
 0x4cb   : > { %v814_v63 = vsub.f32 %v812_v62, %v813_v61  ;;  %v1082_v61 = vld [vmem:[#allocation15 + $0x8] sm:$0xff] }
 0x4cc   : > { %v1955_v62 = vpack.c.bf16 %v1082_v61, %v1081_v60 }
 0x4cd   : > { %v816_v2 = vadd.f32 0.1, %v814_v63  ;;  %v1586_v63 = vld [vmem:[#allocation18 + $0x3] ss:$0 sm:$0xff] }
 0x4cf   : > { %2179 = vrsqrt.f32 %v816_v2 }
 0x4d9   : > { %v2180_v4 = vpop.eup %2179 }
 0x4da   : > { %v818_v6 = vmul.f32 %v2180_v4, %v815_v3 }
 0x4dc   : > { %v823_v8 = vmul.f32 %v1580_v5, %v818_v6 }
 0x4de   : > { %v828_v9 = vadd.f32 %v1581_v7, %v823_v8 }
 0x4e0   : > { %1786 = vmatmul.mubr.f32.vlgmr.msra.gmra.mrb[2].mxu0 %v828_v9  ;;  %v3112_v15 = vadd.f32 %v828_v9, %v3094_v22  ;;  %v960_v22 = vld [vmem:[#allocation13 + $0x20] sm:$0xff] }
 0x4e1   : > { %1855 = vmatprep.mubr.msk.f32.mxu0 %vm2616_vm1, %v2617_v1  ;;  %v1937_v30 = vpack.c.bf16 %v961_v29, %v960_v22  ;;  %1956 = vmatpush3.bf16.msra.mxu0 %v1955_v62  ;;  %v1094_v22 = vld [vmem:[#allocation15 + $0x68] sm:$0xff] }
 0x4e2   : > { %1957 = vmatprep.subr.bf16.mxu0 %v2615_v0  ;;  %v1973_v29 = vpack.c.bf16 %v1094_v22, %v1093_v28  ;;  %v1225_v28 = vld [vmem:[#allocation16 + $0xa0] sm:$0xff] }
 0x4e3   : > { %1938 = vmatpush3.bf16.msra.mxu1 %v1937_v30  ;;  %v1095_v30 = vld [vmem:[#allocation15 + $0x70] sm:$0xff] }
 0x4e4   : > { %1939 = vmatprep.subr.bf16.mxu1 %v2615_v0  ;;  %v1976_v32 = vpack.c.bf16 %v1096_v31, %v1095_v30  ;;  %v1230_v30 = vld [vmem:[#allocation16 + $0xc8] sm:$0xff]  ;;  %v1232_v31 = vld [vmem:[#allocation16 + $0xd8] sm:$0xff] }
 0x4e7   : > { %1941 = vmatpush3.bf16.msra.mxu1 %v1940_v33 }
 0x4e8   : > { %1942 = vmatprep.subr.bf16.mxu1 %v2615_v0 }
 0x4eb   : > { %1944 = vmatpush3.bf16.msra.mxu1 %v1943_v36 }
 0x4ec   : > { %1945 = vmatprep.subr.bf16.mxu1 %v2615_v0 }
 0x4ef   : > { %1947 = vmatpush3.bf16.msra.mxu1 %v1946_v39 }
 0x4f0   : > { %1948 = vmatprep.subr.bf16.mxu1 %v2615_v0 }
 0x4f3   : > { %1950 = vmatpush3.bf16.msra.mxu1 %v1949_v42  ;;  %v1588_v42 = vld [vmem:[#allocation18 + $0x8] ss:$0 sm:$0xff] }
 0x4f4   : > { %1951 = vmatprep.subr.bf16.mxu1 %v2615_v0 }
 0x4f7   : > { %1953 = vmatpush3.bf16.msra.mxu1 %v1952_v45 }
 0x5b3   : > { %v917_v14 = vpop.f32.mrb[2].mxu0 }
 0x5b4   : > { %v918_v16 = vadd.f32 %v1582_v13, %v917_v14  ;;  %v1787_v17 = vpop.f32.mrb[3].mxu0  ;;  %v1084_v13 = vld [vmem:[#allocation15 + $0x18] sm:$0xff] }
 0x5b5   : > { %v1958_v14 = vpack.c.bf16 %v1084_v13, %v1083_v12  ;;  %v1218_v13 = vld [vmem:[#allocation16 + $0x68] sm:$0xff] }
 0x5b6   : > { %v921_v18 = vadd.f32 %v918_v16, %v3112_v15  ;;  %v1086_v16 = vld [vmem:[#allocation15 + $0x28] sm:$0xff] }
 0x5b7   : > { %1959 = vmatpush3.bf16.msra.mxu0 %v1958_v14  ;;  %v1220_v14 = vld [vmem:[#allocation16 + $0x78] sm:$0xff] }
 0x5b8   : > { %v1583_v19 = vmul.f32 -1.442695, %v921_v18  ;;  %1960 = vmatprep.subr.bf16.mxu0 %v2615_v0 }
 0x5ba   : > { %2181 = vpow2.f32 %v1583_v19  ;;  %v1088_v19 = vld [vmem:[#allocation15 + $0x38] sm:$0xff] }
 0x5c4   : > { %v2182_v20 = vpop.eup %2181 }
 0x5c5   : > { %v925_v21 = vadd.f32 1.0, %v2182_v20 }
 0x5c7   : > { %2183 = vrcp.f32 %v925_v21  ;;  %v1089_v21 = vld [vmem:[#allocation15 + $0x40] sm:$0xff] }
 0x5d1   : > { %v2184_v23 = vpop.eup %2183 }
 0x5d2   : > { %v928_v24 = vmul.f32 %v2184_v23, %v921_v18  ;;  %v1087_v18 = vld [vmem:[#allocation15 + $0x30] sm:$0xff]  ;;  %v1090_v23 = vld [vmem:[#allocation15 + $0x48] sm:$0xff] }
 0x5d3   : > { %v1964_v20 = vpack.c.bf16 %v1088_v19, %v1087_v18  ;;  %v1222_v19 = vld [vmem:[#allocation16 + $0x88] sm:$0xff] }
 0x5d4   : > { %931 = vadd.xlane.f32.xlu1 %v928_v24  ;;  %v934_v25 = vmul.f32 %v928_v24, %v928_v24 }
 0x5d8   : > { %935 = vadd.xlane.f32.xlu1 %v934_v25  ;;  %v1091_v25 = vld [vmem:[#allocation15 + $0x50] sm:$0xff] }
 0x5d9   : > { %v1970_v27 = vpack.c.bf16 %v1092_v26, %v1091_v25  ;;  %v1226_v26 = vld [vmem:[#allocation16 + $0xa8] sm:$0xff] }
 0x661   : > { %v932_v46 = vpop.xlane.xlu1 %931 }
 0x662   : > { %v933_v47 = vmul.f32 0.03125, %v932_v46 }
 0x664   : > { %v938_v49 = vmul.f32 %v933_v47, %v933_v47  ;;  %v940_v53 = vsub.f32 %v928_v24, %v933_v47  ;;  %v1967_v24 = vpack.c.bf16 %v1090_v23, %v1089_v21  ;;  %v1206_v47 = vld [vmem:[#allocation16 + $0x8] sm:$0xff]  ;;  %v1221_v23 = vld [vmem:[#allocation16 + $0x80] sm:$0xff] }
 0x665   : > { %v936_v48 = vpop.xlane.xlu1 %935 }
 0x666   : > { %v937_v50 = vmul.f32 0.03125, %v936_v48  ;;  %v1208_v48 = vld [vmem:[#allocation16 + $0x18] sm:$0xff] }
 0x668   : > { %v939_v51 = vsub.f32 %v937_v50, %v938_v49  ;;  %v1978_v49 = vpack.c.bf16 %v1208_v48, %v1206_v47  ;;  %v1207_v50 = vld [vmem:[#allocation16 + $0x10] sm:$0xff] }
 0x66a   : > { %v941_v52 = vadd.f32 0.1, %v939_v51  ;;  %v1210_v51 = vld [vmem:[#allocation16 + $0x28] sm:$0xff]  ;;  %1979 = vmatprep.subr.bf16.mxu1 %v1978_v49 }
 0x66c   : > { %2185 = vrsqrt.f32 %v941_v52  ;;  %v1212_v52 = vld [vmem:[#allocation16 + $0x38] sm:$0xff] }
 0x676   : > { %v2186_v54 = vpop.eup %2185 }
 0x677   : > { %v943_v56 = vmul.f32 %v2186_v54, %v940_v53  ;;  %v1982_v54 = vpack.c.bf16 %v1212_v52, %v1210_v51  ;;  %v1592_v51 = vld [vmem:[#allocation18 + $0x9] ss:$0 sm:$0xff] }
 0x679   : > { %v948_v58 = vmul.f32 %v1584_v55, %v943_v56  ;;  %v1590_v55 = vld [vmem:[#allocation18 + $0x4] ss:$0 sm:$0xff] }
 0x67b   : > { %v953_v59 = vadd.f32 %v1585_v57, %v948_v58 }
 0x67d   : > { %1821 = vmatmul.mubr.f32.vlgmr.msra.gmra.mrb[2].mxu1 %v953_v59  ;;  %v3124_v3 = vadd.f32 %v953_v59, %v3112_v15  ;;  %v1085_v15 = vld [vmem:[#allocation15 + $0x20] sm:$0xff] }
 0x67e   : > { %1312 = vmatprep.mubr.f32.mxu1 %v2617_v1  ;;  %v1961_v17 = vpack.c.bf16 %v1086_v16, %v1085_v15  ;;  %v1990_v15 = vpack.c.bf16 %v1220_v14, %v1218_v13  ;;  %v1217_v16 = vld [vmem:[#allocation16 + $0x60] sm:$0xff] }
 0x680   : > { %1962 = vmatpush3.bf16.msra.mxu0 %v1961_v17  ;;  %v1219_v17 = vld [vmem:[#allocation16 + $0x70] sm:$0xff] }
 0x681   : > { %1963 = vmatprep.subr.bf16.mxu0 %v2615_v0  ;;  %v1992_v18 = vpack.c.bf16 %v1219_v17, %v1217_v16 }
 0x684   : > { %1965 = vmatpush3.bf16.msra.mxu0 %v1964_v20  ;;  %v1224_v20 = vld [vmem:[#allocation16 + $0x98] sm:$0xff] }
 0x685   : > { %1966 = vmatprep.subr.bf16.mxu0 %v2615_v0  ;;  %v1994_v21 = vpack.c.bf16 %v1224_v20, %v1222_v19 }
 0x688   : > { %1968 = vmatpush3.bf16.msra.mxu0 %v1967_v24  ;;  %v1223_v24 = vld [vmem:[#allocation16 + $0x90] sm:$0xff] }
 0x689   : > { %1969 = vmatprep.subr.bf16.mxu0 %v2615_v0  ;;  %v1996_v25 = vpack.c.bf16 %v1223_v24, %v1221_v23 }
 0x68c   : > { %1971 = vmatpush3.bf16.msra.mxu0 %v1970_v27  ;;  %v1228_v27 = vld [vmem:[#allocation16 + $0xb8] sm:$0xff] }
 0x68d   : > { %1972 = vmatprep.subr.bf16.mxu0 %v2615_v0  ;;  %v1998_v22 = vpack.c.bf16 %v1228_v27, %v1226_v26 }
 0x690   : > { %1974 = vmatpush3.bf16.msra.mxu0 %v1973_v29  ;;  %v1227_v29 = vld [vmem:[#allocation16 + $0xb0] sm:$0xff] }
 0x691   : > { %1975 = vmatprep.subr.bf16.mxu0 %v2615_v0  ;;  %v1205_v0 = vld [vmem:[#allocation16] sm:$0xff] }
 0x692   : > { %v1980_v53 = vpack.c.bf16 %v1207_v50, %v1205_v0 }
 0x694   : > { %1977 = vmatpush3.bf16.msra.mxu0 %v1976_v32  ;;  %1981 = vmatpush1.bf16.msra.mxu1 %v1980_v53  ;;  %v2000_v32 = vpack.c.bf16 %v1227_v29, %v1225_v28  ;;  %v1593_v53 = vld [vmem:[#allocation18 + $0xe] ss:$0 sm:$0xff] }
 0x695   : > { %1983 = vmatprep.subr.bf16.mxu1 %v1982_v54 }
 0x750   : > { %v1042_v2 = vpop.f32.mrb[2].mxu1 }
 0x751   : > { %v1043_v4 = vadd.f32 %v1586_v63, %v1042_v2  ;;  %v1822_v5 = vpop.f32.mrb[3].mxu1 }
 0x753   : > { %v1046_v6 = vadd.f32 %v1043_v4, %v3124_v3 }
 0x755   : > { %v1587_v7 = vmul.f32 -1.442695, %v1046_v6 }
 0x757   : > { %2187 = vpow2.f32 %v1587_v7  ;;  %v1211_v7 = vld [vmem:[#allocation16 + $0x30] sm:$0xff] }
 0x761   : > { %v2188_v8 = vpop.eup %2187 }
 0x762   : > { %v1050_v9 = vadd.f32 1.0, %v2188_v8  ;;  %v1214_v8 = vld [vmem:[#allocation16 + $0x48] sm:$0xff] }
 0x764   : > { %2189 = vrcp.f32 %v1050_v9  ;;  %v1216_v9 = vld [vmem:[#allocation16 + $0x58] sm:$0xff] }
 0x76e   : > { %v2190_v1 = vpop.eup %2189 }
 0x76f   : > { %v1053_v10 = vmul.f32 %v2190_v1, %v1046_v6  ;;  %v1209_v6 = vld [vmem:[#allocation16 + $0x20] sm:$0xff]  ;;  %v1986_v1 = vpack.c.bf16 %v1216_v9, %v1214_v8 }
 0x771   : > { %1056 = vadd.xlane.f32.xlu1 %v1053_v10  ;;  %v1059_v11 = vmul.f32 %v1053_v10, %v1053_v10 }
 0x775   : > { %1060 = vadd.xlane.f32.xlu1 %v1059_v11  ;;  %v1215_v11 = vld [vmem:[#allocation16 + $0x50] sm:$0xff] }
 0x7fe   : > { %v1057_v33 = vpop.xlane.xlu1 %1056 }
 0x7ff   : > { %v1058_v34 = vmul.f32 0.03125, %v1057_v33  ;;  %v2002_v33 = vpack.c.bf16 %v1232_v31, %v1230_v30 }
 0x801   : > { %v1063_v36 = vmul.f32 %v1058_v34, %v1058_v34  ;;  %v1065_v40 = vsub.f32 %v1053_v10, %v1058_v34  ;;  %v1213_v10 = vld [vmem:[#allocation16 + $0x40] sm:$0xff] }
 0x802   : > { %v1061_v35 = vpop.xlane.xlu1 %1060  ;;  %v1988_v12 = vpack.c.bf16 %v1215_v11, %v1213_v10  ;;  %v1229_v34 = vld [vmem:[#allocation16 + $0xc0] sm:$0xff] }
 0x803   : > { %v1062_v37 = vmul.f32 0.03125, %v1061_v35  ;;  %v1231_v35 = vld [vmem:[#allocation16 + $0xd0] sm:$0xff] }
 0x805   : > { %v1064_v38 = vsub.f32 %v1062_v37, %v1063_v36  ;;  %v1234_v36 = vld [vmem:[#allocation16 + $0xe8] sm:$0xff]  ;;  %v1236_v37 = vld [vmem:[#allocation16 + $0xf8] sm:$0xff] }
 0x807   : > { %v1066_v39 = vadd.f32 0.1, %v1064_v38  ;;  %v2004_v38 = vpack.c.bf16 %v1231_v35, %v1229_v34 }
 0x809   : > { %2191 = vrsqrt.f32 %v1066_v39  ;;  %v2006_v39 = vpack.c.bf16 %v1236_v37, %v1234_v36 }
 0x813   : > { %v2192_v41 = vpop.eup %2191 }
 0x814   : > { %v1068_v43 = vmul.f32 %v2192_v41, %v1065_v40  ;;  %v1233_v40 = vld [vmem:[#allocation16 + $0xe0] sm:$0xff]  ;;  %v1235_v41 = vld [vmem:[#allocation16 + $0xf0] sm:$0xff] }
 0x816   : > { %v1073_v45 = vmul.f32 %v1588_v42, %v1068_v43  ;;  %v2008_v42 = vpack.c.bf16 %v1235_v41, %v1233_v40 }
 0x818   : > { %v1078_v46 = vadd.f32 %v1589_v44, %v1073_v45 }
 0x81a   : > { %1856 = vmatmul.mubr.f32.vlgmr.msra.gmra.mrb[4].mxu0 %v1078_v46  ;;  %v1079_v57 = vadd.f32 %v1078_v46, %v3124_v3  ;;  %v1984_v3 = vpack.c.bf16 %v1211_v7, %v1209_v6 }
 0x81c   : > { %1985 = vmatpush1.bf16.msra.mxu1 %v1984_v3  ;;  %v1319_v3 = vld [vmem:[%s475_s7] sm:$0xff] }
 0x81d   : > { %1987 = vmatprep.subr.bf16.mxu1 %v1986_v1  ;;  %v1320_v9 = vmul.f32 %v1319_v3, %v1319_v3 }
 0x81f   : > { %v1321_v11 = vmul.f32 0.5, %v1320_v9  ;;  %v1333_v14 = vmul.f32 2.2699965e-05, %v1320_v9 }
 0x820   : > { %1989 = vmatpush1.bf16.msra.mxu1 %v1988_v12 }
 0x821   : > { %1991 = vmatprep.subr.bf16.mxu1 %v1990_v15  ;;  %v1322_v16 = vsub.f32 -2.8160586, %v1321_v11 }
 0x824   : > { %1993 = vmatpush1.bf16.msra.mxu1 %v1992_v18  ;;  %v1334_v18 = vsub.f32 -8.221523, %v1333_v14 }
 0x825   : > { %1995 = vmatprep.subr.bf16.mxu1 %v1994_v21 }
 0x828   : > { %1997 = vmatpush1.bf16.msra.mxu1 %v1996_v25 }
 0x829   : > { %1999 = vmatprep.subr.bf16.mxu1 %v1998_v22 }
 0x82c   : > { %2001 = vmatpush1.bf16.msra.mxu1 %v2000_v32 }
 0x82d   : > { %2003 = vmatprep.subr.bf16.mxu1 %v2002_v33 }
 0x830   : > { %2005 = vmatpush1.bf16.msra.mxu1 %v2004_v38 }
 0x831   : > { %2007 = vmatprep.subr.bf16.mxu1 %v2006_v39 }
 0x834   : > { %2009 = vmatpush1.bf16.msra.mxu1 %v2008_v42 }
 0x8ed   : > { %v1167_v56 = vpop.f32.mrb[4].mxu0 }
 0x8ee   : > { %v1168_v58 = vadd.f32 %v1590_v55, %v1167_v56  ;;  %v1857_v59 = vpop.f32.mrb[5].mxu0  ;;  %v1238_v56 = vlaneseq }
 0x8ef   : > { %v1204_v59 = vld [vmem:[#allocation19] sm:$0x3] }
 0x8f0   : > { %v1171_v60 = vadd.f32 %v1168_v58, %v1079_v57  ;;  %v1239_v57 = vshrl.u32 %v1238_v56, 7 }
 0x8f2   : > { %v1591_v61 = vmul.f32 -1.442695, %v1171_v60  ;;  %v1244_v58 = vsub.s32 1, %v1239_v57 }
 0x8f4   : > { %2193 = vpow2.f32 %v1591_v61 }
 0x8fe   : > { %v2194_v62 = vpop.eup %2193 }
 0x8ff   : > { %v1175_v63 = vadd.f32 1.0, %v2194_v62  ;;  %v1240_v62 = vsub.s32 0, %v1239_v57 }
 0x901   : > { %2195 = vrcp.f32 %v1175_v63  ;;  %v1241_v6 = vrot.slane %v1204_v59, %v1240_v62 }
 0x90b   : > { %v2196_v2 = vpop.eup %2195 }
 0x90c   : > { %v3134_v4 = vmul.f32 %v2196_v2, %v1171_v60  ;;  %v1245_v60 = vrot.slane %v1204_v59, %v1244_v58 }
 0x90e   : > { %1181 = vadd.xlane.f32.xlu1 %v3134_v4  ;;  %v1184_v5 = vmul.f32 %v3134_v4, %v3134_v4 }
 0x912   : > { %1185 = vadd.xlane.f32.xlu1 %v1184_v5 }
 0x99b   : > { %v1182_v43 = vpop.xlane.xlu1 %1181 }
 0x99c   : > { %v1183_v44 = vmul.f32 0.03125, %v1182_v43 }
 0x99e   : > { %v1188_v46 = vmul.f32 %v1183_v44, %v1183_v44  ;;  %v1190_v49 = vsub.f32 %v3134_v4, %v1183_v44 }
 0x99f   : > { %v1186_v45 = vpop.xlane.xlu1 %1185 }
 0x9a0   : > { %v1187_v47 = vmul.f32 0.03125, %v1186_v45 }
 0x9a2   : > { %v1189_v48 = vsub.f32 %v1187_v47, %v1188_v46 }
 0x9a4   : > { %v1191_v0 = vadd.f32 0.1, %v1189_v48 }
 0x9a6   : > { %2197 = vrsqrt.f32 %v1191_v0 }
 0x9b0   : > { %v2198_v50 = vpop.eup %2197 }
 0x9b1   : > { %v1193_v52 = vmul.f32 %v2198_v50, %v1190_v49 }
 0x9b3   : > { %v1198_v54 = vmul.f32 %v1592_v51, %v1193_v52 }
 0x9b5   : > { %v1203_v55 = vadd.f32 %v1593_v53, %v1198_v54 }
 0x9b7   : > { %1313 = vmatmul.mubr.f32.vlgmr.msra.gmra.mrb[4].mxu1 %v1203_v55 }
 0xa8a   : > { %v1314_v61 = vpop.f32.mrb[4].mxu1 }
 0xa8b   : > { %v1316_v63 = vpop.f32.mrb[5].mxu1  ;;  %v1315_v7 = vadd.f32 %v1314_v61, %v1241_v6 }
 0xa8c   : > { %v1317_v2 = vadd.f32 %v1316_v63, %v1245_v60 }
 0xa8d   : > { %v1323_v8 = vsub.f32 %v1319_v3, %v1315_v7 }
 0xa8e   : > { %v1326_v5 = vsub.f32 0.0, %v1317_v2  ;;  %v1324_v12 = vadd.f32 1.837877, %v1317_v2 }
 0xa8f   : > { %v1325_v1 = vmul.f32 %v1323_v8, %v1323_v8 }
 0xa90   : > { %v1327_v4 = vmul.f32 1.442695, %v1326_v5 }
 0xa92   : > { %2199 = vpow2.f32 %v1327_v4 }
 0xa9c   : > { %v2200_v10 = vpop.eup %2199 }
 0xa9d   : > { %v1329_v13 = vmul.f32 %v2200_v10, %v1325_v1 }
 0xa9f   : > { %v1330_v15 = vadd.f32 %v1329_v13, %v1324_v12 }
 0xaa1   : > { %v1331_v17 = vmul.f32 -0.5, %v1330_v15 }
 0xaa3   : > { %v1332_v19 = vadd.f32 -0.2876821, %v1331_v17 }
 0xaa5   : > { %v1335_v20 = vmax.f32 %v1322_v16, %v1332_v19 }
 0xaa7   : > { %v1336_v21 = vmax.f32 %v1335_v20, %v1334_v18 }
 0xaa9   : > { %v1337_v23 = vsub.f32 %v1322_v16, %v1336_v21  ;;  %v1340_v24 = vsub.f32 %v1332_v19, %v1336_v21  ;;  %v1344_v25 = vsub.f32 %v1334_v18, %v1336_v21 }
 0xaab   : > { %v1338_v26 = vmul.f32 1.442695, %v1337_v23  ;;  %v1341_v27 = vmul.f32 1.442695, %v1340_v24  ;;  %v1345_v28 = vmul.f32 1.442695, %v1344_v25 }
 0xaad   : > { %2201 = vpow2.f32 %v1338_v26 }
 0xaae   : > { %2203 = vpow2.f32 %v1341_v27 }
 0xaaf   : > { %2205 = vpow2.f32 %v1345_v28 }
 0xab7   : > { %v2202_v22 = vpop.eup %2201 }
 0xab8   : > { %v2204_v29 = vpop.eup %2203 }
 0xab9   : > { %v1343_v30 = vadd.f32 %v2204_v29, %v2202_v22  ;;  %v2206_v31 = vpop.eup %2205 }
 0xabb   : > { %v1347_v32 = vadd.f32 %v2206_v31, %v1343_v30 }
 0xabd   : > { %2207 = vlog2.f32 %v1347_v32 }
 0xac7   : > { %v2208_v33 = vpop.eup %2207 }
 0xac8   : > { %v1349_v34 = vmul.f32 0.6931472, %v2208_v33 }
 0xaca   : > { %v1350_v35 = vadd.f32 %v1349_v34, %v1336_v21 }
 0xacc   : > { %1351 = vst [vmem:[%s548_s26] sm:$0xff] %v1350_v35 }
 0xacd   : > { %2506 = shalt.err (!%p2503_p8)
}
 0xace   : > { %s2507_s5 = scalar_lea.hbm %s3147_s25, 128  ;;  %s2511_s23 = scalar_lea.hbm %s3260_s3, 256 }
 0xacf   : > { %p2508_p3 = scmp.ne.s32.totalorder %s3147_s25, %s2507_s5  ;;  %p2512_p13 = scmp.lt.u32.totalorder %s3147_s25, %s3260_s3 }
 0xad0   : > { %p2513_p4 = scmp.lt.u32.totalorder %s2511_s23, %s2507_s5  ;;  %p2515_p0 = scmp.lt.u32.totalorder %s2507_s5, %s3147_s25 }
 0xad1   : > { %p2509_p12 = pnand %p2508_p3, %p3261_p7 }
 0xad2   : > { %p2514_p9 = por %p2513_p4, %p2512_p13 }
 0xad3   : > { %p2510_p6 = pneg %p2509_p12 }
 0xad4   : > { %p2516_p11 = por %p2515_p0, %p2514_p9 }
 0xad6   : > { %p2517_p2 = pnand %p2516_p11, %p2510_p6 }
 0xad8   : > { %2520 = shalt.err (!%p2517_p2)
}
 0xad9   : > { %2046 = dma.vmem_to_hbm [thread:$0]  (%p3261_p7), %s3149_s12, 128, %s3147_s25, %s1353_s30  }
 0xada PF: > { %s1378_s24 = sand.u32 1, %s2579_s13   ;;  %p3262_p10 = scmp.ne.s32.totalorder %s3243_s10, 0 }
 0xadb   : > { %p3263_p1 = scmp.ge.s32.totalorder %s2599_s18, 2  ;;  %s1379_s26 = scalar_lea.sflag [#allocation6], %s1378_s24 }
 0xadd   : > { %p2081_p5 = pnand %p3263_p1, %p3262_p10 }
 0xadf   : > { %2574 = dma.done.wait (!%p2081_p5), %s1379_s26, 128  }
 0xae0   : > { %2576 = vsyncadd (!%p2081_p5), %s1379_s26, 4294967168  ;;  %s33_s18 = sadd.s32 1, %s2599_s18   ;;  %s3264_s13 = smov %s2583_s14 }
 0xae1   : > { %p30_p8 = scmp.ge.s32.totalorder %s33_s18, 4   ;;  %s3265_s14 = smov %s2587_s15 }
 0xae2   : > { %s3266_s15 = smov %s2951_s27  ;;  %s3267_s16 = smov %s2595_s17 }
 0xae3   : > { %s3268_s17 = smov %s3270_s1  ;;  %32 = sbr.rel (!%p30_p8) target bundleno = 21 (0x15), region = 159 }
 0xaea   :  { %1384 = vsyncpa [#allocation5], 1 }
 0xaeb   :  { %1386 = vsyncpa [#allocation5 + $0x1], 1 }
 0xaec   :  { %1387 = vsyncpa [#allocation8], 1 }
 0xaed   :  { %1389 = vsyncpa [#allocation8 + $0x1], 1 }
 0xaee   :  { %1390 = vsyncpa [#allocation11], 1 }
 0xaef   :  { %1391 = vsyncpa [#allocation14], 1 }
 0xaf0   :  { %1392 = vsyncpa [#allocation17], 1 }
 0xaf1   :  { %1393 = vsyncpa [#allocation20], 1 }
 0xaf2   :  { %1394 = vsyncpa [#allocation6], 1 }
 0xaf3   :  { %1396 = vsyncpa [#allocation6 + $0x1], 1 }

// kernel: tpu_custom_call.1
= control target key start
LH: loop header
LB: loop body
LE: loop exit
PB: predicated region body
PF: predicated region fallthrough
CT: control target
= control target key end

     0   :  { %s3196_s0 = inlined_call_operand.hbm [shape: f32[16,128], index: 0, kind: input, shape index: {}]   ;;  %s3197_s1 = inlined_call_operand.hbm [shape: f32[16,128], index: 1, kind: input, shape index: {}]   ;;  %s3198_s2 = inlined_call_operand.hbm [shape: f32[128,128], index: 2, kind: input, shape index: {}]   ;;  %s3199_s3 = inlined_call_operand.hbm [shape: f32[128,128], index: 3, kind: input, shape index: {}]   ;;  %s3200_s4 = inlined_call_operand.hbm [shape: f32[128,128], index: 4, kind: input, shape index: {}]   ;;  %s3201_s5 = inlined_call_operand.hbm [shape: f32[128,128], index: 5, kind: input, shape index: {}]   ;;  %s3202_s6 = inlined_call_operand.hbm [shape: f32[128,128], index: 6, kind: input, shape index: {}]   ;;  %s3203_s7 = inlined_call_operand.hbm [shape: f32[128,256], index: 7, kind: input, shape index: {}]   ;;  %s3204_s8 = inlined_call_operand.hbm [shape: f32[16,128], index: 8, kind: input, shape index: {}]   ;;  %s3205_s9 = inlined_call_operand.hbm [shape: f32[1,256], index: 9, kind: input, shape index: {}]   ;;  %s3206_s10 = inlined_call_operand.hbm [shape: f32[16,128], index: 10, kind: output, shape index: {}]  }
   0x1   :  { %3218 = sst [smem:[#allocation32_spill]] %s3197_s1 }
   0x2   :  { %3219 = sst [smem:[#allocation33_spill]] %s3198_s2 }
   0x3   :  { %3220 = sst [smem:[#allocation34_spill]] %s3199_s3 }
   0x4   :  { %3221 = sst [smem:[#allocation35_spill]] %s3200_s4 }
   0x5   :  { %3222 = sst [smem:[#allocation36_spill]] %s3201_s5 }
   0x6   :  { %3223 = sst [smem:[#allocation37_spill]] %s3202_s6 }
   0x7   :  { %3224 = sst [smem:[#allocation38_spill]] %s3203_s7 }
   0x8   :  { %3225 = sst [smem:[#allocation39_spill]] %s3206_s10 }
   0x9   :  { %15 = vsyncpa [#allocation5], 0 }
   0xa   :  { %17 = vsyncpa [#allocation5 + $0x1], 0 }
   0xb   :  { %18 = vsyncpa [#allocation8], 0 }
   0xc   :  { %20 = vsyncpa [#allocation8 + $0x1], 0 }
   0xd   :  { %21 = vsyncpa [#allocation11], 0 }
   0xe   :  { %22 = vsyncpa [#allocation14], 0 }
   0xf   :  { %23 = vsyncpa [#allocation17], 0 }
  0x10   :  { %24 = vsyncpa [#allocation20], 0 }
  0x11   :  { %25 = vsyncpa [#allocation6], 0 }
  0x12   :  { %27 = vsyncpa [#allocation6 + $0x1], 0  ;;  %s2675_s13 = smov 0   ;;  %s2677_s14 = smov 0  }
  0x13   :  { %s2679_s15 = smov 0   ;;  %s2681_s16 = smov 0  }
  0x14   :  { %s2683_s17 = smov 0   ;;  %s2685_s18 = smov 0  }
  0x15 LB: > { %3226 = sst [smem:[#allocation30_spill]] %s2591_s16  ;;  %s2706_s19 = sadd.s32 4294967295, %s2599_s18   ;;  %s2599_s18 = sphi %s2685_s18, %s33_s18   ;;  %s2595_s17 = sphi %s2683_s17, %s3268_s17   ;;  %s2591_s16 = sphi %s2681_s16, %s3267_s16   ;;  %s2587_s15 = sphi %s2679_s15, %s3266_s15   ;;  %s2583_s14 = sphi %s2677_s14, %s3265_s14   ;;  %s2579_s13 = sphi %s2675_s13, %s3264_s13  }
  0x16   : > { %p1548_p0 = scmp.ge.s32.totalorder %s2599_s18, 1  ;;  %p3210_p1 = scmp.eq.s32.totalorder %s2706_s19, 0 }
  0x17   : > { %p303_p2 = scmp.lt.s32.totalorder %s2599_s18, 3  ;;  %s2601_s21 = smov [#allocation9]  }
  0x18   : > { %s318_s22 = sshll.u32 %s2601_s21, 4  ;;  %s2602_s24 = smov [#allocation10]   ;;  %s2715_s22 = int_to_ptr.vmem [resolvable:$true] %s318_s22 }
  0x19   : > { %p2711_p3 = pnand %p1548_p0, %p303_p2  ;;  %s331_s25 = sshll.u32 %s2602_s24, 4  ;;  %s2726_s25 = int_to_ptr.vmem [resolvable:$true] %s331_s25 }
  0x1a   : > { %s2603_s26 = smov [#allocation13]   ;;  %s3230_s2 = sld [smem:[#allocation33_spill]] }
  0x1b   : > { %s3227_s20 = scalar_select %p2711_p3, 1, 0 }
  0x1c   : > { %p2048_p4 = pneg %p2711_p3  ;;  %s2728_s27 = sshll.u32 %s2603_s26, 4  ;;  %s358_s27 = int_to_ptr.vmem [resolvable:$true] %s2728_s27 }
  0x1d   : > { %3228 = sst [smem:[#allocation31_spill]] %s3227_s20 }
  0x1e   : > { %p2722_p6 = pnand %p2048_p4, %p3210_p1 }
  0x20   : > { %s2209_s30 = scalar_lea.hbm %s3230_s2, 2048  ;;  %p2738_p8 = pneg %p2722_p6 }
  0x21   : > { %p2210_p7 = scmp.ne.s32.totalorder %s3230_s2, %s2209_s30  ;;  %p2216_p11 = scmp.lt.u32.totalorder %s2209_s30, %s3230_s2 }
  0x23   : > { %p2212_p9 = pnand %p2738_p8, %p2210_p7 }
  0x25   : > { %p2213_p10 = pneg %p2212_p9 }
  0x27   : > { %p2218_p12 = pnand %p2216_p11, %p2213_p10 }
  0x29   : > { %2221 = shalt.err (!%p2218_p12)
}
  0x2a   : > { %s2222_s28 = scalar_lea.vmem %s2715_s22, 2048  ;;  %p2230_p4 = scmp.lt.s32.totalorder %s2715_s22, %s2715_s22 }
  0x2b   : > { %p2223_p13 = scmp.ne.s32.totalorder %s2715_s22, %s2222_s28  ;;  %p2231_p5 = scmp.lt.s32.totalorder %s2222_s28, %s2222_s28 }
  0x2d   : > { %p2225_p0 = pnand %p2223_p13, %p2738_p8  ;;  %p2232_p7 = por %p2231_p5, %p2230_p4 }
  0x2f   : > { %p2226_p2 = pneg %p2225_p0 }
  0x31   : > { %p2233_p9 = pnand %p2232_p7, %p2226_p2 }
  0x33   : > { %2236 = shalt.err (!%p2233_p9)
}
  0x34   : > { %s3212_s29 = smov 128   ;;  %s3214_s30 = smov 8  }
  0x35   : > { %2051 = dma.hbm_to_vmem [thread:$0]  (!%p2722_p6), %s3230_s2, 2048, %s2715_s22, [#allocation8], %s3212_s29, %s3212_s29, %s3214_s30  }
  0x36   : > { %s3232_s3 = sld [smem:[#allocation34_spill]] }
  0x3c   : > { %s2237_s28 = scalar_lea.hbm %s3232_s3, 2048 }
  0x3d   : > { %p2238_p5 = scmp.ne.s32.totalorder %s3232_s3, %s2237_s28  ;;  %p2244_p12 = scmp.lt.u32.totalorder %s2237_s28, %s3232_s3 }
  0x3f   : > { %p2240_p10 = pnand %p2238_p5, %p2738_p8 }
  0x41   : > { %p2241_p11 = pneg %p2240_p10 }
  0x43   : > { %p2246_p13 = pnand %p2244_p12, %p2241_p11 }
  0x45   : > { %2249 = shalt.err (!%p2246_p13)
}
  0x46   : > { %s2250_s22 = scalar_lea.vmem %s2726_s25, 2048  ;;  %p2258_p7 = scmp.lt.s32.totalorder %s2726_s25, %s2726_s25 }
  0x47   : > { %p2251_p0 = scmp.ne.s32.totalorder %s2726_s25, %s2250_s22  ;;  %p2259_p9 = scmp.lt.s32.totalorder %s2250_s22, %s2250_s22 }
  0x49   : > { %p2253_p2 = pnand %p2251_p0, %p2738_p8  ;;  %p2260_p5 = por %p2259_p9, %p2258_p7 }
  0x4b   : > { %p2254_p4 = pneg %p2253_p2 }
  0x4d   : > { %p2261_p10 = pnand %p2260_p5, %p2254_p4 }
  0x4f   : > { %2264 = shalt.err (!%p2261_p10)
}
  0x50   : > { %2054 = dma.hbm_to_vmem [thread:$0]  (!%p2722_p6), %s3232_s3, 2048, %s2726_s25, [#allocation11], %s3212_s29, %s3212_s29, %s3214_s30  }
  0x51   : > { %s3233_s5 = sld [smem:[#allocation36_spill]] }
  0x57   : > { %s2265_s11 = scalar_lea.hbm %s3233_s5, 2048 }
  0x58   : > { %p2266_p11 = scmp.ne.s32.totalorder %s3233_s5, %s2265_s11  ;;  %p2272_p0 = scmp.lt.u32.totalorder %s2265_s11, %s3233_s5 }
  0x5a   : > { %p2268_p12 = pnand %p2266_p11, %p2738_p8 }
  0x5c   : > { %p2269_p13 = pneg %p2268_p12 }
  0x5e   : > { %p2274_p2 = pnand %p2272_p0, %p2269_p13 }
  0x60   : > { %2277 = shalt.err (!%p2274_p2)
}
  0x61   : > { %s2278_s22 = scalar_lea.vmem %s358_s27, 2048  ;;  %p2286_p5 = scmp.lt.s32.totalorder %s358_s27, %s358_s27 }
  0x62   : > { %p2279_p4 = scmp.ne.s32.totalorder %s358_s27, %s2278_s22  ;;  %p2287_p10 = scmp.lt.s32.totalorder %s2278_s22, %s2278_s22 }
  0x64   : > { %p2281_p7 = pnand %p2279_p4, %p2738_p8  ;;  %p2288_p1 = por %p2287_p10, %p2286_p5 }
  0x66   : > { %p2282_p9 = pneg %p2281_p7 }
  0x68   : > { %p2289_p3 = pnand %p2288_p1, %p2282_p9 }
  0x6a   : > { %2292 = shalt.err (!%p2289_p3)
}
  0x6b   : > { %2060 = dma.hbm_to_vmem [thread:$0]  (!%p2722_p6), %s3233_s5, 2048, %s358_s27, [#allocation14], %s3212_s29, %s3212_s29, %s3214_s30  }
  0x6c   : > { %s2606_s10 = smov [#allocation16]   ;;  %s3234_s7 = sld [smem:[#allocation38_spill]] }
  0x6d   : > { %s383_s16 = sshll.u32 %s2606_s10, 4  ;;  %s384_s16 = int_to_ptr.vmem [resolvable:$true] %s383_s16 }
  0x72   : > { %s2293_s12 = scalar_lea.hbm %s3234_s7, 4096 }
  0x73   : > { %p2294_p1 = scmp.ne.s32.totalorder %s3234_s7, %s2293_s12  ;;  %p2300_p12 = scmp.lt.u32.totalorder %s2293_s12, %s3234_s7 }
  0x75   : > { %p2296_p3 = pnand %p2294_p1, %p2738_p8 }
  0x77   : > { %p2297_p11 = pneg %p2296_p3 }
  0x79   : > { %p2302_p13 = pnand %p2300_p12, %p2297_p11 }
  0x7b   : > { %2305 = shalt.err (!%p2302_p13)
}
  0x7c   : > { %s2306_s27 = scalar_lea.vmem %s384_s16, 4096  ;;  %p2314_p7 = scmp.lt.s32.totalorder %s384_s16, %s384_s16 }
  0x7d   : > { %p2307_p0 = scmp.ne.s32.totalorder %s384_s16, %s2306_s27  ;;  %p2315_p9 = scmp.lt.s32.totalorder %s2306_s27, %s2306_s27 }
  0x7f   : > { %p2309_p2 = pnand %p2307_p0, %p2738_p8  ;;  %p2316_p5 = por %p2315_p9, %p2314_p7 }
  0x81   : > { %p2310_p4 = pneg %p2309_p2 }
  0x83   : > { %p2317_p10 = pnand %p2316_p5, %p2310_p4 }
  0x85   : > { %2320 = shalt.err (!%p2317_p10)
}
  0x86   : > { %s2607_s25 = smov 256   ;;  %s2608_s1 = smov 16  }
  0x87   : > { %2066 = dma.hbm_to_vmem [thread:$0]  (!%p2722_p6), %s3234_s7, 4096, %s384_s16, [#allocation17], %s2607_s25, %s2607_s25, %s2608_s1  }
  0x88   : > { %s2609_s11 = smov [#allocation12]   ;;  %s2610_s24 = smov [#allocation15]  }
  0x89   : > { %s344_s12 = sshll.u32 %s2609_s11, 4  ;;  %s370_s26 = sshll.u32 %s2610_s24, 4  ;;  %s345_s12 = int_to_ptr.vmem [resolvable:$true] %s344_s12  ;;  %s2828_s26 = int_to_ptr.vmem [resolvable:$true] %s370_s26 }
  0x8a   : > { %s3235_s4 = sld [smem:[#allocation35_spill]] }
  0x90   : > { %s2321_s27 = scalar_lea.hbm %s3235_s4, 2048 }
  0x91   : > { %p2322_p1 = scmp.ne.s32.totalorder %s3235_s4, %s2321_s27  ;;  %p2328_p12 = scmp.lt.u32.totalorder %s2321_s27, %s3235_s4 }
  0x93   : > { %p2324_p3 = pnand %p2322_p1, %p2738_p8 }
  0x95   : > { %p2325_p11 = pneg %p2324_p3 }
  0x97   : > { %p2330_p13 = pnand %p2328_p12, %p2325_p11 }
  0x99   : > { %2333 = shalt.err (!%p2330_p13)
}
  0x9a   : > { %s2334_s25 = scalar_lea.vmem %s345_s12, 2048  ;;  %p2342_p7 = scmp.lt.s32.totalorder %s345_s12, %s345_s12 }
  0x9b   : > { %p2335_p0 = scmp.ne.s32.totalorder %s345_s12, %s2334_s25  ;;  %p2343_p9 = scmp.lt.s32.totalorder %s2334_s25, %s2334_s25 }
  0x9d   : > { %p2337_p2 = pnand %p2335_p0, %p2738_p8  ;;  %p2344_p5 = por %p2343_p9, %p2342_p7 }
  0x9f   : > { %p2338_p4 = pneg %p2337_p2 }
  0xa1   : > { %p2345_p10 = pnand %p2344_p5, %p2338_p4 }
  0xa3   : > { %2348 = shalt.err (!%p2345_p10)
}
  0xa4   : > { %s3236_s29 = smov 8   ;;  %s3237_s30 = smov 128  }
  0xa5   : > { %2057 = dma.hbm_to_vmem [thread:$0]  (!%p2722_p6), %s3235_s4, 2048, %s345_s12, [#allocation11], %s3237_s30, %s3237_s30, %s3236_s29  }
  0xa6   : > { %s3238_s6 = sld [smem:[#allocation37_spill]] }
  0xac   : > { %s2349_s28 = scalar_lea.hbm %s3238_s6, 2048 }
  0xad   : > { %p2350_p1 = scmp.ne.s32.totalorder %s3238_s6, %s2349_s28  ;;  %p2356_p12 = scmp.lt.u32.totalorder %s2349_s28, %s3238_s6 }
  0xaf   : > { %p2352_p3 = pnand %p2350_p1, %p2738_p8 }
  0xb1   : > { %p2353_p11 = pneg %p2352_p3 }
  0xb3   : > { %p2358_p13 = pnand %p2356_p12, %p2353_p11 }
  0xb5   : > { %2361 = shalt.err (!%p2358_p13)
}
  0xb6   : > { %s2362_s12 = scalar_lea.vmem %s2828_s26, 2048  ;;  %p2370_p7 = scmp.lt.s32.totalorder %s2828_s26, %s2828_s26 }
  0xb7   : > { %p2363_p0 = scmp.ne.s32.totalorder %s2828_s26, %s2362_s12  ;;  %p2371_p9 = scmp.lt.s32.totalorder %s2362_s12, %s2362_s12 }
  0xb9   : > { %p2365_p2 = pnand %p2363_p0, %p2738_p8  ;;  %p2372_p5 = por %p2371_p9, %p2370_p7 }
  0xbb   : > { %p2366_p4 = pneg %p2365_p2 }
  0xbd   : > { %p2373_p10 = pnand %p2372_p5, %p2366_p4 }
  0xbf   : > { %2376 = shalt.err (!%p2373_p10)
}
  0xc0   : > { %2063 = dma.hbm_to_vmem [thread:$0]  (!%p2722_p6), %s3238_s6, 2048, %s2828_s26, [#allocation14], %s3237_s30, %s3237_s30, %s3236_s29  }
  0xc1   : > { %s2611_s20 = smov [#allocation18]   ;;  %s2612_s24 = smov [#allocation19]  }
  0xc2   : > { %s396_s11 = sshll.u32 %s2611_s20, 4  ;;  %s410_s28 = sshll.u32 %s2612_s24, 4  ;;  %s397_s11 = int_to_ptr.vmem [resolvable:$true] %s396_s11  ;;  %s2877_s28 = int_to_ptr.vmem [resolvable:$true] %s410_s28 }
  0xc3   : > { %s2377_s10 = scalar_lea.hbm %s3204_s8, 256 }
  0xc4   : > { %p2378_p1 = scmp.ne.s32.totalorder %s3204_s8, %s2377_s10  ;;  %p2384_p12 = scmp.lt.u32.totalorder %s2377_s10, %s3204_s8 }
  0xc6   : > { %p2380_p3 = pnand %p2378_p1, %p2738_p8 }
  0xc8   : > { %p2381_p11 = pneg %p2380_p3 }
  0xca   : > { %p2386_p13 = pnand %p2384_p12, %p2381_p11 }
  0xcc   : > { %2389 = shalt.err (!%p2386_p13)
}
  0xcd   : > { %s2390_s1 = scalar_lea.vmem %s397_s11, 256  ;;  %p2398_p7 = scmp.lt.s32.totalorder %s397_s11, %s397_s11 }
  0xce   : > { %p2391_p0 = scmp.ne.s32.totalorder %s397_s11, %s2390_s1  ;;  %p2399_p9 = scmp.lt.s32.totalorder %s2390_s1, %s2390_s1 }
  0xd0   : > { %p2393_p2 = pnand %p2391_p0, %p2738_p8  ;;  %p2400_p5 = por %p2399_p9, %p2398_p7 }
  0xd2   : > { %p2394_p4 = pneg %p2393_p2 }
  0xd4   : > { %p2401_p10 = pnand %p2400_p5, %p2394_p4 }
  0xd6   : > { %2404 = shalt.err (!%p2401_p10)
}
  0xd7   : > { %2069 = dma.hbm_to_vmem [thread:$0]  (!%p2722_p6), %s3204_s8, 256, %s397_s11, [#allocation17], %s3237_s30, %s3237_s30, %s3236_s29  }
  0xd8   : > { %s2405_s10 = scalar_lea.hbm %s3205_s9, 32 }
  0xd9   : > { %p2406_p1 = scmp.ne.s32.totalorder %s3205_s9, %s2405_s10  ;;  %p2412_p12 = scmp.lt.u32.totalorder %s2405_s10, %s3205_s9 }
  0xdb   : > { %p2408_p3 = pnand %p2406_p1, %p2738_p8 }
  0xdd   : > { %p2409_p11 = pneg %p2408_p3 }
  0xdf   : > { %p2414_p13 = pnand %p2412_p12, %p2409_p11 }
  0xe1   : > { %2417 = shalt.err (!%p2414_p13)
}
  0xe2   : > { %s2418_s29 = scalar_lea.vmem %s2877_s28, 32  ;;  %p2426_p7 = scmp.lt.s32.totalorder %s2877_s28, %s2877_s28 }
  0xe3   : > { %p2419_p0 = scmp.ne.s32.totalorder %s2877_s28, %s2418_s29  ;;  %p2427_p9 = scmp.lt.s32.totalorder %s2418_s29, %s2418_s29 }
  0xe5   : > { %p2421_p2 = pnand %p2419_p0, %p2738_p8  ;;  %p2428_p5 = por %p2427_p9, %p2426_p7 }
  0xe7   : > { %p2422_p4 = pneg %p2421_p2 }
  0xe9   : > { %p2429_p10 = pnand %p2428_p5, %p2422_p4 }
  0xeb   : > { %2432 = shalt.err (!%p2429_p10)
}
  0xec   : > { %2072 = dma.hbm_to_vmem [thread:$0]  (!%p2722_p6), %s3205_s9, 32, %s2877_s28, [#allocation20]  }
  0xed   : > { %s1547_s21 = sadd.s32 4294967294, %s2599_s18   ;;  %s45_s1 = sadd.s32 1, %s2595_s17 }
  0xee   : > { %p47_p8 = scmp.ge.s32.totalorder %s45_s1, 2  ;;  %s54_s23 = sadd.s32 1, %s2587_s15 }
  0xef   : > { %p61_p1 = scmp.ne.s32.totalorder %s2587_s15, %s2583_s14  ;;  %p62_p3 = scmp.eq.s32.totalorder %s2599_s18, 0 }
  0xf0   : > { %s3270_s1 = smov (%p47_p8, %s45_s1), 0  ;;  %p67_p12 = scmp.ne.s32.totalorder %s2583_s14, %s2579_s13 }
  0xf1   : > { %p2931_p11 = por %p62_p3, %p61_p1  ;;  %s49_s28 = ssub.s32 %s2595_s17, %s3270_s1 }
  0xf2   : > { %p290_p6 = scmp.eq.s32.totalorder %s2706_s19, 1  ;;  %p52_p13 = scmp.eq.s32.totalorder %s49_s28, 0 }
  0xf3   : > { %p3240_p0 = scmp.eq.s32.totalorder %s2706_s19, 0  ;;  %p296_p7 = scmp.eq.s32.totalorder %s1547_s21, 1 }
  0xf4   : > { %p2946_p4 = por %p290_p6, %p61_p1  ;;  %p2092_p5 = scmp.lt.s32.totalorder %s2599_s18, 2 }
  0xf5   : > { %p2942_p2 = por %p3240_p0, %p67_p12  ;;  %p2953_p9 = por %p296_p7, %p67_p12 }
  0xf6   : > { %s3242_s22 = scalar_select %p2946_p4, 1, 0 }
  0xf7   : > { %s3241_s24 = scalar_select %p2942_p2, 1, 0 }
  0xf8   : > { %s2951_s27 = scalar_select %p52_p13, %s2587_s15, %s54_s23  }
  0xf9   : > { %s3243_s10 = scalar_select %p2953_p9, 1, 0 }
  0xfa   : > { %s421_s16 = sand.u32 1, %s2587_s15   ;;  %s1559_s12 = sshll.u32 %s2595_s17, 7 }
  0xfb   : > { %s2960_s25 = sshll.u32 %s421_s16, 3  ;;  %s2965_s30 = scalar_lea.hbm %s3196_s0, %s1559_s12 }
  0xfc   : > { %s425_s11 = scalar_lea.vmem [#allocation4], %s2960_s25  ;;  %p2970_p10 = pnand %p2092_p5, %p2931_p11 }
  0xfd   : > { %s433_s21 = sshll.u32 %s425_s11, 4  ;;  %s3245_s29 = sld [smem:[#allocation32_spill]]  ;;  %s2974_s21 = int_to_ptr.vmem [resolvable:$true] %s433_s21 }
  0xfe   : > { %s422_s3 = scalar_lea.sflag [#allocation5], %s421_s16  ;;  %s2433_s4 = scalar_lea.hbm %s2965_s30, 128 }
  0xff   : > { %p2434_p8 = scmp.ne.s32.totalorder %s2965_s30, %s2433_s4  ;;  %p2435_p1 = pneg %p2970_p10 }
 0x100   : > { %s2438_s5 = scalar_lea.hbm %s3196_s0, 256  ;;  %p2439_p12 = scmp.lt.u32.totalorder %s2965_s30, %s3196_s0 }
 0x101   : > { %p2436_p3 = pnand %p2435_p1, %p2434_p8  ;;  %p2440_p6 = scmp.lt.u32.totalorder %s2438_s5, %s2433_s4 }
 0x102   : > { %p2442_p0 = scmp.lt.u32.totalorder %s2433_s4, %s2965_s30 }
 0x103   : > { %s2979_s2 = scalar_lea.hbm %s3245_s29, %s1559_s12  ;;  %p2437_p11 = pneg %p2436_p3 }
 0x104   : > { %p2441_p13 = por %p2440_p6, %p2439_p12 }
 0x106   : > { %p2443_p7 = por %p2442_p0, %p2441_p13 }
 0x108   : > { %p2444_p5 = pnand %p2443_p7, %p2437_p11 }
 0x10a   : > { %2447 = shalt.err (!%p2444_p5)
}
 0x10b   : > { %s2448_s16 = scalar_lea.vmem %s2974_s21, 128  ;;  %s2613_s12 = smov [#allocation4]  }
 0x10c   : > { %p2449_p8 = scmp.ne.s32.totalorder %s2974_s21, %s2448_s16  ;;  %s2453_s28 = sshll.u32 %s2613_s12, 4  ;;  %s2454_s28 = int_to_ptr.vmem [resolvable:$false] %s2453_s28 }
 0x10d   : > { %s2455_s6 = scalar_lea.vmem %s2454_s28, 256  ;;  %p2456_p4 = scmp.lt.s32.totalorder %s2974_s21, %s2454_s28 }
 0x10e   : > { %p2451_p3 = pnand %p2449_p8, %p2435_p1  ;;  %p2457_p12 = scmp.lt.s32.totalorder %s2455_s6, %s2448_s16 }
 0x110   : > { %p2452_p9 = pneg %p2451_p3  ;;  %p2458_p6 = por %p2457_p12, %p2456_p4 }
 0x112   : > { %p2459_p13 = pnand %p2458_p6, %p2452_p9 }
 0x114   : > { %2462 = shalt.err (!%p2459_p13)
}
 0x115   : > { %2076 = dma.hbm_to_vmem [thread:$0]  (!%p2970_p10), %s2965_s30, 128, %s2974_s21, %s422_s3  }
 0x116   : > { %s440_s4 = sand.u32 1, %s2599_s18   ;;  %s444_s5 = scalar_lea.vmem [#allocation7], %s2960_s25 }
 0x117   : > { %s451_s7 = sshll.u32 %s444_s5, 4  ;;  %s441_s26 = scalar_lea.sflag [#allocation8], %s440_s4  ;;  %s452_s7 = int_to_ptr.vmem [resolvable:$true] %s451_s7 }
 0x118   : > { %s2463_s20 = scalar_lea.hbm %s2979_s2, 128  ;;  %s2468_s12 = scalar_lea.hbm %s3245_s29, 256 }
 0x119   : > { %p2464_p4 = scmp.ne.s32.totalorder %s2979_s2, %s2463_s20  ;;  %p2469_p0 = scmp.lt.u32.totalorder %s2979_s2, %s3245_s29 }
 0x11a   : > { %p2470_p7 = scmp.lt.u32.totalorder %s2468_s12, %s2463_s20  ;;  %p2472_p8 = scmp.lt.u32.totalorder %s2463_s20, %s2979_s2 }
 0x11b   : > { %p2466_p9 = pnand %p2464_p4, %p2435_p1 }
 0x11c   : > { %p2471_p5 = por %p2470_p7, %p2469_p0 }
 0x11d   : > { %p2467_p11 = pneg %p2466_p9 }
 0x11e   : > { %p2473_p3 = por %p2472_p8, %p2471_p5 }
 0x120   : > { %p2474_p12 = pnand %p2473_p3, %p2467_p11 }
 0x122   : > { %2477 = shalt.err (!%p2474_p12)
}
 0x123   : > { %s2478_s3 = scalar_lea.vmem %s452_s7, 128  ;;  %s2614_s25 = smov [#allocation7]  }
 0x124   : > { %p2479_p6 = scmp.ne.s32.totalorder %s452_s7, %s2478_s3  ;;  %s2483_s30 = sshll.u32 %s2614_s25, 4  ;;  %s2484_s30 = int_to_ptr.vmem [resolvable:$false] %s2483_s30 }
 0x125   : > { %s2485_s21 = scalar_lea.vmem %s2484_s30, 256  ;;  %p2486_p9 = scmp.lt.s32.totalorder %s452_s7, %s2484_s30 }
 0x126   : > { %p2481_p13 = pnand %p2479_p6, %p2435_p1  ;;  %p2487_p2 = scmp.lt.s32.totalorder %s2485_s21, %s2478_s3 }
 0x128   : > { %p2482_p4 = pneg %p2481_p13  ;;  %p2488_p0 = por %p2487_p2, %p2486_p9 }
 0x12a   : > { %p2489_p7 = pnand %p2488_p0, %p2482_p4 }
 0x12c   : > { %2492 = shalt.err (!%p2489_p7)
}
 0x12d   : > { %2079 = dma.hbm_to_vmem [thread:$0]  (!%p2970_p10), %s2979_s2, 128, %s452_s7, %s441_s26  }
 0x12e   : > { %s3246_s4 = sld [smem:[#allocation31_spill]] }
 0x134   : > { %p3247_p11 = scmp.ne.s32.totalorder %s3246_s4, 0 }
 0x135   : > { %s3030_s5 = sand.u32 (!%p3247_p11), 1, %s2583_s14   ;;  %p3248_p2 = scmp.ne.s32.totalorder (!%p3247_p11), %s3241_s24, 0 }
 0x136   : > { %460 = sbr.rel (%p3247_p11) target bundleno = 2778 (0xada), region = 60  ;;  %s3033_s20 = sshll.u32 (!%p3247_p11), %s3030_s5, 3 }
 0x137   : > { %s463_s11 = scalar_lea.sflag (!%p3247_p11), [#allocation5], %s3030_s5  ;;  %s466_s16 = scalar_lea.vmem (!%p3247_p11), [#allocation4], %s3033_s20 }
 0x13d   : > { %2546 = dma.done.wait (%p3248_p2), %s463_s11, 128  }
 0x13e   : > { %2548 = vsyncadd (%p3248_p2), %s463_s11, 4294967168  ;;  %s471_s2 = sand.u32 1, %s2706_s19   ;;  %s475_s7 = scalar_lea.vmem [#allocation7], %s3033_s20 }
 0x13f   : > { %s472_s23 = scalar_lea.sflag [#allocation8], %s471_s2 }
 0x140   : > { %2550 = dma.done.wait (%p3248_p2), %s472_s23, 128  }
 0x141   : > { %2552 = vsyncadd (%p3248_p2), %s472_s23, 4294967168  ;;  %p3249_p10 = scmp.eq.s32.totalorder %s2706_s19, 0 }
 0x143   : > { %2554 = dma.done.wait (%p3249_p10), [#allocation8], 2048   ;;  %p3250_p1 = pmov %p3249_p10 }
 0x145   : > { %2556 = vsyncadd (%p3250_p1), [#allocation8], 4294965248  ;;  %p3251_p5 = pmov %p3250_p1 }
 0x146   : > { %p3252_p8 = pmov %p3250_p1 }
 0x147   : > { %2558 = dma.done.wait (%p3251_p5), [#allocation11], 4096  }
 0x148   : > { %2560 = vsyncadd (%p3252_p8), [#allocation11], 4294963200  ;;  %p3253_p3 = pmov %p3250_p1 }
 0x149   : > { %p3254_p12 = pmov %p3250_p1 }
 0x14a   : > { %2562 = dma.done.wait (%p3253_p3), [#allocation14], 4096  }
 0x14b   : > { %2564 = vsyncadd (%p3254_p12), [#allocation14], 4294963200  ;;  %p3255_p6 = pmov %p3250_p1 }
 0x14c   : > { %p3256_p13 = pmov %p3250_p1 }
 0x14d   : > { %2566 = dma.done.wait (%p3255_p6), [#allocation17], 4352  }
 0x14e   : > { %2568 = vsyncadd (%p3256_p13), [#allocation17], 4294962944  ;;  %p3257_p4 = pmov %p3250_p1 }
 0x14f   : > { %p3258_p9 = pmov %p3250_p1 }
 0x150   : > { %2570 = dma.done.wait (%p3257_p4), [#allocation20], 32  }
 0x151   : > { %2572 = vsyncadd (%p3258_p9), [#allocation20], 4294967264  ;;  %vm555_vm0 = vcmask 7168   ;;  %v2615_v0 = vmov 0.0|0.0   ;;  %vm2616_vm1 = vmmov 0   ;;  %v2617_v1 = vmov 0.0  }
 0x152   : > { %1858 = vmatprep.subr.bf16.mxu0 %v2615_v0  ;;  %1715 = vmatprep.mubr.msk.f32.mxu0 %vm2616_vm1, %v2617_v1  ;;  %556 = vst.msk [vmem:[#allocation3] sm:$0xff] %vm555_vm0, %v2617_v1  ;;  %v557_v2 = vld [vmem:[%s466_s16] sm:$0xff]  ;;  %v568_v7 = vld [vmem:[#allocation9 + $0x10] sm:$0xff]  ;;  %v569_v8 = vld [vmem:[#allocation9 + $0x18] sm:$0xff]  ;;  %v2618_v24 = vmov 0   ;;  %s3259_s19 = sld [smem:[#allocation30_spill]] }
 0x153   : > { %1882 = vmatprep.subr.bf16.mxu1 %v2615_v0  ;;  %1750 = vmatprep.mubr.msk.f32.mxu1 %vm2616_vm1, %v2617_v1  ;;  %v566_v3 = vld [vmem:[#allocation9] sm:$0xff]  ;;  %v567_v4 = vld [vmem:[#allocation9 + $0x8] sm:$0xff]  ;;  %v559_v5 = vmul.f32 %v557_v2, %v557_v2  ;;  %v1862_v9 = vpack.c.bf16 %v569_v8, %v568_v7  ;;  %v572_v13 = vld [vmem:[#allocation9 + $0x30] sm:$0xff]  ;;  %s548_s26 = scalar_lea.vmem [#allocation21], %s3033_s20  ;;  %s3260_s3 = sld [smem:[#allocation39_spill]] }
 0x154   : > { %v1859_v6 = vpack.c.bf16 %v567_v4, %v566_v3  ;;  %v570_v10 = vld [vmem:[#allocation9 + $0x20] sm:$0xff]  ;;  %v571_v11 = vld [vmem:[#allocation9 + $0x28] sm:$0xff]  ;;  %v573_v14 = vld [vmem:[#allocation9 + $0x38] sm:$0xff]  ;;  %2166 = vset.pattern.permute.xlu0 %v2618_v24  ;;  %s1366_s12 = sshll.u32 %s548_s26, 4  ;;  %s1353_s30 = scalar_lea.sflag [#allocation6], %s3030_s5  ;;  %s3149_s12 = int_to_ptr.vmem [resolvable:$true] %s1366_s12 }
 0x155   : > { %560 = vadd.xlane.f32.xlu0 %v559_v5  ;;  %v1865_v12 = vpack.c.bf16 %v571_v11, %v570_v10  ;;  %v1868_v15 = vpack.c.bf16 %v573_v14, %v572_v13  ;;  %v574_v16 = vld [vmem:[#allocation9 + $0x40] sm:$0xff]  ;;  %v575_v17 = vld [vmem:[#allocation9 + $0x48] sm:$0xff]  ;;  %v576_v19 = vld [vmem:[#allocation9 + $0x50] sm:$0xff]  ;;  %s2493_s21 = scalar_lea.vmem %s3149_s12, 128  ;;  %p3261_p7 = scmp.ne.s32.totalorder %s3242_s22, 0 }
 0x156   : > { %1860 = vmatpush3.bf16.msra.mxu0 %v1859_v6  ;;  %v1871_v18 = vpack.c.bf16 %v575_v17, %v574_v16  ;;  %v577_v20 = vld [vmem:[#allocation9 + $0x58] sm:$0xff]  ;;  %v578_v22 = vld [vmem:[#allocation9 + $0x60] sm:$0xff]  ;;  %v579_v23 = vld [vmem:[#allocation9 + $0x68] sm:$0xff]  ;;  %p2494_p0 = scmp.ne.s32.totalorder %s3149_s12, %s2493_s21  ;;  %s2619_s4 = smov [#allocation21]  }
 0x157   : > { %1861 = vmatprep.subr.bf16.mxu0 %v2615_v0  ;;  %v1874_v21 = vpack.c.bf16 %v577_v20, %v576_v19  ;;  %v1877_v25 = vpack.c.bf16 %v579_v23, %v578_v22  ;;  %v580_v26 = vld [vmem:[#allocation9 + $0x70] sm:$0xff]  ;;  %v581_v27 = vld [vmem:[#allocation9 + $0x78] sm:$0xff]  ;;  %v706_v35 = vld [vmem:[#allocation10] sm:$0xff]  ;;  %s2497_s20 = sshll.u32 %s2619_s4, 4  ;;  %s2498_s20 = int_to_ptr.vmem [resolvable:$false] %s2497_s20 }
 0x158   : > { %v1880_v28 = vpack.c.bf16 %v581_v27, %v580_v26  ;;  %v707_v36 = vld [vmem:[#allocation10 + $0x8] sm:$0xff]  ;;  %v1574_v40 = vld [vmem:[#allocation18] ss:$0 sm:$0xff]  ;;  %v708_v50 = vld [vmem:[#allocation10 + $0x10] sm:$0xff]  ;;  %s1595_s24 = sshll.u32 %s3259_s19, 7  ;;  %p2495_p11 = pnand %p2494_p0, %p3261_p7 }
 0x159   : > { %v558_v29 = vld [vmem:[#allocation3] sm:$0xff]  ;;  %v1883_v37 = vpack.c.bf16 %v707_v36, %v706_v35  ;;  %v710_v53 = vld [vmem:[#allocation10 + $0x20] sm:$0xff]  ;;  %v711_v54 = vld [vmem:[#allocation10 + $0x28] sm:$0xff]  ;;  %s3147_s25 = scalar_lea.hbm %s3260_s3, %s1595_s24  ;;  %s2499_s11 = scalar_lea.vmem %s2498_s20, 256 }
 0x15a   : > { %1863 = vmatpush3.bf16.msra.mxu0 %v1862_v9  ;;  %v709_v51 = vld [vmem:[#allocation10 + $0x18] sm:$0xff]  ;;  %v1889_v55 = vpack.c.bf16 %v711_v54, %v710_v53  ;;  %v712_v56 = vld [vmem:[#allocation10 + $0x30] sm:$0xff]  ;;  %v714_v59 = vld [vmem:[#allocation10 + $0x40] sm:$0xff]  ;;  %p2496_p2 = pneg %p2495_p11  ;;  %p2500_p10 = scmp.lt.s32.totalorder %s3149_s12, %s2498_s20 }
 0x15b   : > { %1864 = vmatprep.subr.bf16.mxu0 %v2615_v0  ;;  %1884 = vmatpush3.bf16.msra.mxu1 %v1883_v37  ;;  %v1886_v52 = vpack.c.bf16 %v709_v51, %v708_v50  ;;  %v713_v57 = vld [vmem:[#allocation10 + $0x38] sm:$0xff]  ;;  %v715_v60 = vld [vmem:[#allocation10 + $0x48] sm:$0xff]  ;;  %v716_v62 = vld [vmem:[#allocation10 + $0x50] sm:$0xff]  ;;  %p2501_p1 = scmp.lt.s32.totalorder %s2499_s11, %s2493_s21 }
 0x15c   : > { %1885 = vmatprep.subr.bf16.mxu1 %v2615_v0  ;;  %v1892_v58 = vpack.c.bf16 %v713_v57, %v712_v56  ;;  %v1895_v61 = vpack.c.bf16 %v715_v60, %v714_v59  ;;  %v717_v63 = vld [vmem:[#allocation10 + $0x58] sm:$0xff]  ;;  %v718_v3 = vld [vmem:[#allocation10 + $0x60] sm:$0xff]  ;;  %v719_v4 = vld [vmem:[#allocation10 + $0x68] sm:$0xff] }
 0x15d   : > { %v1901_v5 = vpack.c.bf16 %v719_v4, %v718_v3  ;;  %v720_v6 = vld [vmem:[#allocation10 + $0x70] sm:$0xff]  ;;  %v721_v7 = vld [vmem:[#allocation10 + $0x78] sm:$0xff]  ;;  %v1577_v20 = vld [vmem:[#allocation18 + $0xa] ss:$0 sm:$0xff]  ;;  %p2502_p5 = por %p2501_p1, %p2500_p10 }
 0x15e   : > { %1866 = vmatpush3.bf16.msra.mxu0 %v1865_v12  ;;  %v1904_v8 = vpack.c.bf16 %v721_v7, %v720_v6  ;;  %v831_v23 = vld [vmem:[#allocation12] sm:$0xff]  ;;  %v832_v24 = vld [vmem:[#allocation12 + $0x8] sm:$0xff]  ;;  %v833_v37 = vld [vmem:[#allocation12 + $0x10] sm:$0xff] }
 0x15f   : > { %1867 = vmatprep.subr.bf16.mxu0 %v2615_v0  ;;  %1887 = vmatpush3.bf16.msra.mxu1 %v1886_v52  ;;  %v1578_v26 = vld [vmem:[#allocation18 + $0x1] ss:$0 sm:$0xff]  ;;  %v842_v50 = vld [vmem:[#allocation12 + $0x58] sm:$0xff]  ;;  %v844_v53 = vld [vmem:[#allocation12 + $0x68] sm:$0xff]  ;;  %p2503_p8 = pnand %p2502_p5, %p2496_p2 }
 0x160   : > { %1888 = vmatprep.subr.bf16.mxu1 %v2615_v0  ;;  %v843_v52 = vld [vmem:[#allocation12 + $0x60] sm:$0xff]  ;;  %v846_v56 = vld [vmem:[#allocation12 + $0x78] sm:$0xff]  ;;  %v1581_v7 = vld [vmem:[#allocation18 + $0xb] ss:$0 sm:$0xff] }
 0x161   : > { %v1925_v54 = vpack.c.bf16 %v844_v53, %v843_v52 }
 0x162   : > { %1869 = vmatpush3.bf16.msra.mxu0 %v1868_v15 }
 0x163   : > { %1870 = vmatprep.subr.bf16.mxu0 %v2615_v0  ;;  %1890 = vmatpush3.bf16.msra.mxu1 %v1889_v55  ;;  %v845_v55 = vld [vmem:[#allocation12 + $0x70] sm:$0xff] }
 0x164   : > { %1891 = vmatprep.subr.bf16.mxu1 %v2615_v0  ;;  %v1928_v57 = vpack.c.bf16 %v846_v56, %v845_v55  ;;  %v1584_v55 = vld [vmem:[#allocation18 + $0x7] ss:$0 sm:$0xff] }
 0x166   : > { %1872 = vmatpush3.bf16.msra.mxu0 %v1871_v18  ;;  %v1576_v18 = vld [vmem:[#allocation18 + $0x5] ss:$0 sm:$0xff] }
 0x167   : > { %1873 = vmatprep.subr.bf16.mxu0 %v2615_v0  ;;  %1893 = vmatpush3.bf16.msra.mxu1 %v1892_v58 }
 0x168   : > { %1894 = vmatprep.subr.bf16.mxu1 %v2615_v0 }
 0x16a   : > { %1875 = vmatpush3.bf16.msra.mxu0 %v1874_v21 }
 0x16b   : > { %1876 = vmatprep.subr.bf16.mxu0 %v2615_v0  ;;  %1896 = vmatpush3.bf16.msra.mxu1 %v1895_v61 }
 0x16c   : > { %1897 = vmatprep.subr.bf16.mxu1 %v2615_v0 }
 0x16e   : > { %1878 = vmatpush3.bf16.msra.mxu0 %v1877_v25  ;;  %v1907_v25 = vpack.c.bf16 %v832_v24, %v831_v23 }
 0x16f   : > { %1879 = vmatprep.subr.bf16.mxu0 %v2615_v0 }
 0x172   : > { %1881 = vmatpush3.bf16.msra.mxu0 %v1880_v28 }
 0x173   : > { %1906 = vmatprep.subr.bf16.mxu0 %v2615_v0 }
 0x175   : > { %1716 = vmatmul.mubr.f32.vlgmr.msra.gmra.mrb[0].mxu0 %v557_v2  ;;  %v1898_v2 = vpack.c.bf16 %v717_v63, %v716_v62 }
 0x176   : > { %1785 = vmatprep.mubr.msk.f32.mxu0 %vm2616_vm1, %v2617_v1  ;;  %1908 = vmatpush3.bf16.msra.mxu0 %v1907_v25 }
 0x177   : > { %1899 = vmatpush3.bf16.msra.mxu1 %v1898_v2  ;;  %1909 = vmatprep.subr.bf16.mxu0 %v2615_v0 }
 0x178   : > { %1900 = vmatprep.subr.bf16.mxu1 %v2615_v0 }
 0x17b   : > { %1902 = vmatpush3.bf16.msra.mxu1 %v1901_v5  ;;  %v1580_v5 = vld [vmem:[#allocation18 + $0x6] ss:$0 sm:$0xff] }
 0x17c   : > { %1903 = vmatprep.subr.bf16.mxu1 %v2615_v0 }
 0x17f   : > { %1905 = vmatpush3.bf16.msra.mxu1 %v1904_v8 }
 0x180   : > { %1930 = vmatprep.subr.bf16.mxu1 %v2615_v0 }
 0x1e2   : > { %v561_v30 = vpop.xlane.xlu0 %560 }
 0x1e3   : > { %v562_v31 = vadd.f32 %v561_v30, %v558_v29 }
 0x1e5   : > { %564 = vst.msk [vmem:[#allocation3] sm:$0xff] %vm555_vm0, %v562_v31 }
 0x1ec   : > { %v657_v32 = vld [vmem:[#allocation3] sm:$0xff] }
 0x1ed   : > { %v658_v33 = vmax.f32 %v657_v32, 1e-12 }
 0x1ef   : > { %2167 = vrsqrt.f32 %v658_v33 }
 0x1f9   : > { %v2168_v34 = vpop.eup %2167 }
 0x1fa   : > { %663 = vperm.xlu0 %2166, %v2168_v34  }
 0x248   : > { %v648_v38 = vpop.f32.mrb[0].mxu0 }
 0x249   : > { %v1717_v39 = vpop.f32.mrb[1].mxu0 }
 0x279   : > { %v664_v41 = vpop.permute.xlu0 %663 }
 0x27a   : > { %v666_v42 = vmul.f32 %v664_v41, %v648_v38  ;;  %v834_v38 = vld [vmem:[#allocation12 + $0x18] sm:$0xff]  ;;  %v836_v41 = vld [vmem:[#allocation12 + $0x28] sm:$0xff] }
 0x27b   : > { %v1910_v39 = vpack.c.bf16 %v834_v38, %v833_v37  ;;  %v966_v37 = vld [vmem:[#allocation13 + $0x50] sm:$0xff]  ;;  %v967_v38 = vld [vmem:[#allocation13 + $0x58] sm:$0xff] }
 0x27c   : > { %v672_v43 = vadd.f32 %v1574_v40, %v666_v42  ;;  %v835_v40 = vld [vmem:[#allocation12 + $0x20] sm:$0xff] }
 0x27d   : > { %1911 = vmatpush3.bf16.msra.mxu0 %v1910_v39  ;;  %v1913_v42 = vpack.c.bf16 %v836_v41, %v835_v40  ;;  %v1946_v39 = vpack.c.bf16 %v967_v38, %v966_v37  ;;  %v968_v40 = vld [vmem:[#allocation13 + $0x60] sm:$0xff]  ;;  %v969_v41 = vld [vmem:[#allocation13 + $0x68] sm:$0xff] }
 0x27e   : > { %v1575_v44 = vmul.f32 -1.442695, %v672_v43  ;;  %1912 = vmatprep.subr.bf16.mxu0 %v2615_v0 }
 0x280   : > { %2169 = vpow2.f32 %v1575_v44  ;;  %v838_v44 = vld [vmem:[#allocation12 + $0x38] sm:$0xff] }
 0x281   : > { %1914 = vmatpush3.bf16.msra.mxu0 %v1913_v42  ;;  %v1949_v42 = vpack.c.bf16 %v969_v41, %v968_v40 }
 0x282   : > { %1915 = vmatprep.subr.bf16.mxu0 %v2615_v0 }
 0x28a   : > { %v2170_v45 = vpop.eup %2169 }
 0x28b   : > { %v676_v46 = vadd.f32 1.0, %v2170_v45 }
 0x28d   : > { %2171 = vrcp.f32 %v676_v46  ;;  %v839_v46 = vld [vmem:[#allocation12 + $0x40] sm:$0xff] }
 0x297   : > { %v2172_v47 = vpop.eup %2171 }
 0x298   : > { %v679_v48 = vmul.f32 %v2172_v47, %v672_v43  ;;  %v837_v43 = vld [vmem:[#allocation12 + $0x30] sm:$0xff]  ;;  %v840_v47 = vld [vmem:[#allocation12 + $0x48] sm:$0xff] }
 0x299   : > { %v1916_v45 = vpack.c.bf16 %v838_v44, %v837_v43  ;;  %v970_v43 = vld [vmem:[#allocation13 + $0x70] sm:$0xff]  ;;  %v971_v44 = vld [vmem:[#allocation13 + $0x78] sm:$0xff] }
 0x29a   : > { %682 = vadd.xlane.f32.xlu1 %v679_v48  ;;  %v685_v49 = vmul.f32 %v679_v48, %v679_v48 }
 0x29b   : > { %1917 = vmatpush3.bf16.msra.mxu0 %v1916_v45  ;;  %v1952_v45 = vpack.c.bf16 %v971_v44, %v970_v43  ;;  %v1589_v44 = vld [vmem:[#allocation18 + $0xd] ss:$0 sm:$0xff] }
 0x29c   : > { %1918 = vmatprep.subr.bf16.mxu0 %v2615_v0 }
 0x29e   : > { %686 = vadd.xlane.f32.xlu1 %v685_v49  ;;  %v841_v49 = vld [vmem:[#allocation12 + $0x50] sm:$0xff] }
 0x29f   : > { %v1922_v51 = vpack.c.bf16 %v842_v50, %v841_v49 }
 0x327   : > { %v683_v9 = vpop.xlane.xlu1 %682 }
 0x328   : > { %v684_v10 = vmul.f32 0.03125, %v683_v9 }
 0x32a   : > { %v689_v12 = vmul.f32 %v684_v10, %v684_v10  ;;  %v691_v16 = vsub.f32 %v679_v48, %v684_v10  ;;  %v1919_v48 = vpack.c.bf16 %v840_v47, %v839_v46  ;;  %v956_v10 = vld [vmem:[#allocation13] sm:$0xff] }
 0x32b   : > { %v687_v11 = vpop.xlane.xlu1 %686 }
 0x32c   : > { %v688_v13 = vmul.f32 0.03125, %v687_v11  ;;  %1920 = vmatpush3.bf16.msra.mxu0 %v1919_v48  ;;  %v957_v11 = vld [vmem:[#allocation13 + $0x8] sm:$0xff] }
 0x32d   : > { %1921 = vmatprep.subr.bf16.mxu0 %v2615_v0 }
 0x32e   : > { %v690_v14 = vsub.f32 %v688_v13, %v689_v12  ;;  %v1931_v12 = vpack.c.bf16 %v957_v11, %v956_v10  ;;  %v1582_v13 = vld [vmem:[#allocation18 + $0x2] ss:$0 sm:$0xff] }
 0x330   : > { %v692_v15 = vadd.f32 0.1, %v690_v14  ;;  %1923 = vmatpush3.bf16.msra.mxu0 %v1922_v51 }
 0x331   : > { %1924 = vmatprep.subr.bf16.mxu0 %v2615_v0 }
 0x332   : > { %2173 = vrsqrt.f32 %v692_v15 }
 0x334   : > { %1926 = vmatpush3.bf16.msra.mxu0 %v1925_v54 }
 0x335   : > { %1927 = vmatprep.subr.bf16.mxu0 %v2615_v0 }
 0x338   : > { %1929 = vmatpush3.bf16.msra.mxu0 %v1928_v57  ;;  %v1585_v57 = vld [vmem:[#allocation18 + $0xc] ss:$0 sm:$0xff] }
 0x339   : > { %1954 = vmatprep.subr.bf16.mxu0 %v2615_v0 }
 0x33c   : > { %v2174_v17 = vpop.eup %2173 }
 0x33d   : > { %v694_v19 = vmul.f32 %v2174_v17, %v691_v16 }
 0x33f   : > { %v699_v21 = vmul.f32 %v1576_v18, %v694_v19 }
 0x341   : > { %v3094_v22 = vadd.f32 %v1577_v20, %v699_v21 }
 0x343   : > { %1751 = vmatmul.mubr.f32.vlgmr.msra.gmra.mrb[0].mxu1 %v3094_v22 }
 0x344   : > { %1820 = vmatprep.mubr.msk.f32.mxu1 %vm2616_vm1, %v2617_v1  ;;  %1932 = vmatpush3.bf16.msra.mxu1 %v1931_v12  ;;  %v1083_v12 = vld [vmem:[#allocation15 + $0x10] sm:$0xff] }
 0x345   : > { %1933 = vmatprep.subr.bf16.mxu1 %v2615_v0 }
 0x416   : > { %v792_v27 = vpop.f32.mrb[0].mxu1 }
 0x417   : > { %v793_v28 = vadd.f32 %v1578_v26, %v792_v27  ;;  %v1752_v29 = vpop.f32.mrb[1].mxu1  ;;  %v958_v26 = vld [vmem:[#allocation13 + $0x10] sm:$0xff]  ;;  %v959_v27 = vld [vmem:[#allocation13 + $0x18] sm:$0xff] }
 0x418   : > { %v961_v29 = vld [vmem:[#allocation13 + $0x28] sm:$0xff] }
 0x419   : > { %v796_v30 = vadd.f32 %v793_v28, %v3094_v22  ;;  %v1934_v28 = vpack.c.bf16 %v959_v27, %v958_v26  ;;  %v1092_v26 = vld [vmem:[#allocation15 + $0x58] sm:$0xff] }
 0x41b   : > { %v1579_v31 = vmul.f32 -1.442695, %v796_v30  ;;  %1935 = vmatpush3.bf16.msra.mxu1 %v1934_v28  ;;  %v1093_v28 = vld [vmem:[#allocation15 + $0x60] sm:$0xff] }
 0x41c   : > { %1936 = vmatprep.subr.bf16.mxu1 %v2615_v0 }
 0x41d   : > { %2175 = vpow2.f32 %v1579_v31  ;;  %v962_v31 = vld [vmem:[#allocation13 + $0x30] sm:$0xff] }
 0x427   : > { %v2176_v32 = vpop.eup %2175 }
 0x428   : > { %v800_v33 = vadd.f32 1.0, %v2176_v32  ;;  %v963_v32 = vld [vmem:[#allocation13 + $0x38] sm:$0xff] }
 0x42a   : > { %2177 = vrcp.f32 %v800_v33  ;;  %v1940_v33 = vpack.c.bf16 %v963_v32, %v962_v31  ;;  %v1096_v31 = vld [vmem:[#allocation15 + $0x78] sm:$0xff] }
 0x434   : > { %v2178_v34 = vpop.eup %2177 }
 0x435   : > { %v803_v35 = vmul.f32 %v2178_v34, %v796_v30  ;;  %v964_v34 = vld [vmem:[#allocation13 + $0x40] sm:$0xff] }
 0x437   : > { %806 = vadd.xlane.f32.xlu1 %v803_v35  ;;  %v809_v36 = vmul.f32 %v803_v35, %v803_v35 }
 0x43b   : > { %810 = vadd.xlane.f32.xlu1 %v809_v36 }
 0x4c4   : > { %v807_v58 = vpop.xlane.xlu1 %806 }
 0x4c5   : > { %v808_v59 = vmul.f32 0.03125, %v807_v58 }
 0x4c7   : > { %v813_v61 = vmul.f32 %v808_v59, %v808_v59  ;;  %v815_v3 = vsub.f32 %v803_v35, %v808_v59  ;;  %v965_v35 = vld [vmem:[#allocation13 + $0x48] sm:$0xff] }
 0x4c8   : > { %v811_v60 = vpop.xlane.xlu1 %810  ;;  %v1943_v36 = vpack.c.bf16 %v965_v35, %v964_v34 }
 0x4c9   : > { %v812_v62 = vmul.f32 0.03125, %v811_v60  ;;  %v1081_v60 = vld [vmem:[#allocation15] sm:$0xff] }
 0x4cb   : > { %v814_v63 = vsub.f32 %v812_v62, %v813_v61  ;;  %v1082_v61 = vld [vmem:[#allocation15 + $0x8] sm:$0xff] }
 0x4cc   : > { %v1955_v62 = vpack.c.bf16 %v1082_v61, %v1081_v60 }
 0x4cd   : > { %v816_v2 = vadd.f32 0.1, %v814_v63  ;;  %v1586_v63 = vld [vmem:[#allocation18 + $0x3] ss:$0 sm:$0xff] }
 0x4cf   : > { %2179 = vrsqrt.f32 %v816_v2 }
 0x4d9   : > { %v2180_v4 = vpop.eup %2179 }
 0x4da   : > { %v818_v6 = vmul.f32 %v2180_v4, %v815_v3 }
 0x4dc   : > { %v823_v8 = vmul.f32 %v1580_v5, %v818_v6 }
 0x4de   : > { %v828_v9 = vadd.f32 %v1581_v7, %v823_v8 }
 0x4e0   : > { %1786 = vmatmul.mubr.f32.vlgmr.msra.gmra.mrb[2].mxu0 %v828_v9  ;;  %v3112_v15 = vadd.f32 %v828_v9, %v3094_v22  ;;  %v960_v22 = vld [vmem:[#allocation13 + $0x20] sm:$0xff] }
 0x4e1   : > { %1855 = vmatprep.mubr.msk.f32.mxu0 %vm2616_vm1, %v2617_v1  ;;  %v1937_v30 = vpack.c.bf16 %v961_v29, %v960_v22  ;;  %1956 = vmatpush3.bf16.msra.mxu0 %v1955_v62  ;;  %v1094_v22 = vld [vmem:[#allocation15 + $0x68] sm:$0xff] }
 0x4e2   : > { %1957 = vmatprep.subr.bf16.mxu0 %v2615_v0  ;;  %v1973_v29 = vpack.c.bf16 %v1094_v22, %v1093_v28  ;;  %v1225_v28 = vld [vmem:[#allocation16 + $0xa0] sm:$0xff] }
 0x4e3   : > { %1938 = vmatpush3.bf16.msra.mxu1 %v1937_v30  ;;  %v1095_v30 = vld [vmem:[#allocation15 + $0x70] sm:$0xff] }
 0x4e4   : > { %1939 = vmatprep.subr.bf16.mxu1 %v2615_v0  ;;  %v1976_v32 = vpack.c.bf16 %v1096_v31, %v1095_v30  ;;  %v1230_v30 = vld [vmem:[#allocation16 + $0xc8] sm:$0xff]  ;;  %v1232_v31 = vld [vmem:[#allocation16 + $0xd8] sm:$0xff] }
 0x4e7   : > { %1941 = vmatpush3.bf16.msra.mxu1 %v1940_v33 }
 0x4e8   : > { %1942 = vmatprep.subr.bf16.mxu1 %v2615_v0 }
 0x4eb   : > { %1944 = vmatpush3.bf16.msra.mxu1 %v1943_v36 }
 0x4ec   : > { %1945 = vmatprep.subr.bf16.mxu1 %v2615_v0 }
 0x4ef   : > { %1947 = vmatpush3.bf16.msra.mxu1 %v1946_v39 }
 0x4f0   : > { %1948 = vmatprep.subr.bf16.mxu1 %v2615_v0 }
 0x4f3   : > { %1950 = vmatpush3.bf16.msra.mxu1 %v1949_v42  ;;  %v1588_v42 = vld [vmem:[#allocation18 + $0x8] ss:$0 sm:$0xff] }
 0x4f4   : > { %1951 = vmatprep.subr.bf16.mxu1 %v2615_v0 }
 0x4f7   : > { %1953 = vmatpush3.bf16.msra.mxu1 %v1952_v45 }
 0x5b3   : > { %v917_v14 = vpop.f32.mrb[2].mxu0 }
 0x5b4   : > { %v918_v16 = vadd.f32 %v1582_v13, %v917_v14  ;;  %v1787_v17 = vpop.f32.mrb[3].mxu0  ;;  %v1084_v13 = vld [vmem:[#allocation15 + $0x18] sm:$0xff] }
 0x5b5   : > { %v1958_v14 = vpack.c.bf16 %v1084_v13, %v1083_v12  ;;  %v1218_v13 = vld [vmem:[#allocation16 + $0x68] sm:$0xff] }
 0x5b6   : > { %v921_v18 = vadd.f32 %v918_v16, %v3112_v15  ;;  %v1086_v16 = vld [vmem:[#allocation15 + $0x28] sm:$0xff] }
 0x5b7   : > { %1959 = vmatpush3.bf16.msra.mxu0 %v1958_v14  ;;  %v1220_v14 = vld [vmem:[#allocation16 + $0x78] sm:$0xff] }
 0x5b8   : > { %v1583_v19 = vmul.f32 -1.442695, %v921_v18  ;;  %1960 = vmatprep.subr.bf16.mxu0 %v2615_v0 }
 0x5ba   : > { %2181 = vpow2.f32 %v1583_v19  ;;  %v1088_v19 = vld [vmem:[#allocation15 + $0x38] sm:$0xff] }
 0x5c4   : > { %v2182_v20 = vpop.eup %2181 }
 0x5c5   : > { %v925_v21 = vadd.f32 1.0, %v2182_v20 }
 0x5c7   : > { %2183 = vrcp.f32 %v925_v21  ;;  %v1089_v21 = vld [vmem:[#allocation15 + $0x40] sm:$0xff] }
 0x5d1   : > { %v2184_v23 = vpop.eup %2183 }
 0x5d2   : > { %v928_v24 = vmul.f32 %v2184_v23, %v921_v18  ;;  %v1087_v18 = vld [vmem:[#allocation15 + $0x30] sm:$0xff]  ;;  %v1090_v23 = vld [vmem:[#allocation15 + $0x48] sm:$0xff] }
 0x5d3   : > { %v1964_v20 = vpack.c.bf16 %v1088_v19, %v1087_v18  ;;  %v1222_v19 = vld [vmem:[#allocation16 + $0x88] sm:$0xff] }
 0x5d4   : > { %931 = vadd.xlane.f32.xlu1 %v928_v24  ;;  %v934_v25 = vmul.f32 %v928_v24, %v928_v24 }
 0x5d8   : > { %935 = vadd.xlane.f32.xlu1 %v934_v25  ;;  %v1091_v25 = vld [vmem:[#allocation15 + $0x50] sm:$0xff] }
 0x5d9   : > { %v1970_v27 = vpack.c.bf16 %v1092_v26, %v1091_v25  ;;  %v1226_v26 = vld [vmem:[#allocation16 + $0xa8] sm:$0xff] }
 0x661   : > { %v932_v46 = vpop.xlane.xlu1 %931 }
 0x662   : > { %v933_v47 = vmul.f32 0.03125, %v932_v46 }
 0x664   : > { %v938_v49 = vmul.f32 %v933_v47, %v933_v47  ;;  %v940_v53 = vsub.f32 %v928_v24, %v933_v47  ;;  %v1967_v24 = vpack.c.bf16 %v1090_v23, %v1089_v21  ;;  %v1206_v47 = vld [vmem:[#allocation16 + $0x8] sm:$0xff]  ;;  %v1221_v23 = vld [vmem:[#allocation16 + $0x80] sm:$0xff] }
 0x665   : > { %v936_v48 = vpop.xlane.xlu1 %935 }
 0x666   : > { %v937_v50 = vmul.f32 0.03125, %v936_v48  ;;  %v1208_v48 = vld [vmem:[#allocation16 + $0x18] sm:$0xff] }
 0x668   : > { %v939_v51 = vsub.f32 %v937_v50, %v938_v49  ;;  %v1978_v49 = vpack.c.bf16 %v1208_v48, %v1206_v47  ;;  %v1207_v50 = vld [vmem:[#allocation16 + $0x10] sm:$0xff] }
 0x66a   : > { %v941_v52 = vadd.f32 0.1, %v939_v51  ;;  %v1210_v51 = vld [vmem:[#allocation16 + $0x28] sm:$0xff]  ;;  %1979 = vmatprep.subr.bf16.mxu1 %v1978_v49 }
 0x66c   : > { %2185 = vrsqrt.f32 %v941_v52  ;;  %v1212_v52 = vld [vmem:[#allocation16 + $0x38] sm:$0xff] }
 0x676   : > { %v2186_v54 = vpop.eup %2185 }
 0x677   : > { %v943_v56 = vmul.f32 %v2186_v54, %v940_v53  ;;  %v1982_v54 = vpack.c.bf16 %v1212_v52, %v1210_v51  ;;  %v1592_v51 = vld [vmem:[#allocation18 + $0x9] ss:$0 sm:$0xff] }
 0x679   : > { %v948_v58 = vmul.f32 %v1584_v55, %v943_v56  ;;  %v1590_v55 = vld [vmem:[#allocation18 + $0x4] ss:$0 sm:$0xff] }
 0x67b   : > { %v953_v59 = vadd.f32 %v1585_v57, %v948_v58 }
 0x67d   : > { %1821 = vmatmul.mubr.f32.vlgmr.msra.gmra.mrb[2].mxu1 %v953_v59  ;;  %v3124_v3 = vadd.f32 %v953_v59, %v3112_v15  ;;  %v1085_v15 = vld [vmem:[#allocation15 + $0x20] sm:$0xff] }
 0x67e   : > { %1312 = vmatprep.mubr.f32.mxu1 %v2617_v1  ;;  %v1961_v17 = vpack.c.bf16 %v1086_v16, %v1085_v15  ;;  %v1990_v15 = vpack.c.bf16 %v1220_v14, %v1218_v13  ;;  %v1217_v16 = vld [vmem:[#allocation16 + $0x60] sm:$0xff] }
 0x680   : > { %1962 = vmatpush3.bf16.msra.mxu0 %v1961_v17  ;;  %v1219_v17 = vld [vmem:[#allocation16 + $0x70] sm:$0xff] }
 0x681   : > { %1963 = vmatprep.subr.bf16.mxu0 %v2615_v0  ;;  %v1992_v18 = vpack.c.bf16 %v1219_v17, %v1217_v16 }
 0x684   : > { %1965 = vmatpush3.bf16.msra.mxu0 %v1964_v20  ;;  %v1224_v20 = vld [vmem:[#allocation16 + $0x98] sm:$0xff] }
 0x685   : > { %1966 = vmatprep.subr.bf16.mxu0 %v2615_v0  ;;  %v1994_v21 = vpack.c.bf16 %v1224_v20, %v1222_v19 }
 0x688   : > { %1968 = vmatpush3.bf16.msra.mxu0 %v1967_v24  ;;  %v1223_v24 = vld [vmem:[#allocation16 + $0x90] sm:$0xff] }
 0x689   : > { %1969 = vmatprep.subr.bf16.mxu0 %v2615_v0  ;;  %v1996_v25 = vpack.c.bf16 %v1223_v24, %v1221_v23 }
 0x68c   : > { %1971 = vmatpush3.bf16.msra.mxu0 %v1970_v27  ;;  %v1228_v27 = vld [vmem:[#allocation16 + $0xb8] sm:$0xff] }
 0x68d   : > { %1972 = vmatprep.subr.bf16.mxu0 %v2615_v0  ;;  %v1998_v22 = vpack.c.bf16 %v1228_v27, %v1226_v26 }
 0x690   : > { %1974 = vmatpush3.bf16.msra.mxu0 %v1973_v29  ;;  %v1227_v29 = vld [vmem:[#allocation16 + $0xb0] sm:$0xff] }
 0x691   : > { %1975 = vmatprep.subr.bf16.mxu0 %v2615_v0  ;;  %v1205_v0 = vld [vmem:[#allocation16] sm:$0xff] }
 0x692   : > { %v1980_v53 = vpack.c.bf16 %v1207_v50, %v1205_v0 }
 0x694   : > { %1977 = vmatpush3.bf16.msra.mxu0 %v1976_v32  ;;  %1981 = vmatpush1.bf16.msra.mxu1 %v1980_v53  ;;  %v2000_v32 = vpack.c.bf16 %v1227_v29, %v1225_v28  ;;  %v1593_v53 = vld [vmem:[#allocation18 + $0xe] ss:$0 sm:$0xff] }
 0x695   : > { %1983 = vmatprep.subr.bf16.mxu1 %v1982_v54 }
 0x750   : > { %v1042_v2 = vpop.f32.mrb[2].mxu1 }
 0x751   : > { %v1043_v4 = vadd.f32 %v1586_v63, %v1042_v2  ;;  %v1822_v5 = vpop.f32.mrb[3].mxu1 }
 0x753   : > { %v1046_v6 = vadd.f32 %v1043_v4, %v3124_v3 }
 0x755   : > { %v1587_v7 = vmul.f32 -1.442695, %v1046_v6 }
 0x757   : > { %2187 = vpow2.f32 %v1587_v7  ;;  %v1211_v7 = vld [vmem:[#allocation16 + $0x30] sm:$0xff] }
 0x761   : > { %v2188_v8 = vpop.eup %2187 }
 0x762   : > { %v1050_v9 = vadd.f32 1.0, %v2188_v8  ;;  %v1214_v8 = vld [vmem:[#allocation16 + $0x48] sm:$0xff] }
 0x764   : > { %2189 = vrcp.f32 %v1050_v9  ;;  %v1216_v9 = vld [vmem:[#allocation16 + $0x58] sm:$0xff] }
 0x76e   : > { %v2190_v1 = vpop.eup %2189 }
 0x76f   : > { %v1053_v10 = vmul.f32 %v2190_v1, %v1046_v6  ;;  %v1209_v6 = vld [vmem:[#allocation16 + $0x20] sm:$0xff]  ;;  %v1986_v1 = vpack.c.bf16 %v1216_v9, %v1214_v8 }
 0x771   : > { %1056 = vadd.xlane.f32.xlu1 %v1053_v10  ;;  %v1059_v11 = vmul.f32 %v1053_v10, %v1053_v10 }
 0x775   : > { %1060 = vadd.xlane.f32.xlu1 %v1059_v11  ;;  %v1215_v11 = vld [vmem:[#allocation16 + $0x50] sm:$0xff] }
 0x7fe   : > { %v1057_v33 = vpop.xlane.xlu1 %1056 }
 0x7ff   : > { %v1058_v34 = vmul.f32 0.03125, %v1057_v33  ;;  %v2002_v33 = vpack.c.bf16 %v1232_v31, %v1230_v30 }
 0x801   : > { %v1063_v36 = vmul.f32 %v1058_v34, %v1058_v34  ;;  %v1065_v40 = vsub.f32 %v1053_v10, %v1058_v34  ;;  %v1213_v10 = vld [vmem:[#allocation16 + $0x40] sm:$0xff] }
 0x802   : > { %v1061_v35 = vpop.xlane.xlu1 %1060  ;;  %v1988_v12 = vpack.c.bf16 %v1215_v11, %v1213_v10  ;;  %v1229_v34 = vld [vmem:[#allocation16 + $0xc0] sm:$0xff] }
 0x803   : > { %v1062_v37 = vmul.f32 0.03125, %v1061_v35  ;;  %v1231_v35 = vld [vmem:[#allocation16 + $0xd0] sm:$0xff] }
 0x805   : > { %v1064_v38 = vsub.f32 %v1062_v37, %v1063_v36  ;;  %v1234_v36 = vld [vmem:[#allocation16 + $0xe8] sm:$0xff]  ;;  %v1236_v37 = vld [vmem:[#allocation16 + $0xf8] sm:$0xff] }
 0x807   : > { %v1066_v39 = vadd.f32 0.1, %v1064_v38  ;;  %v2004_v38 = vpack.c.bf16 %v1231_v35, %v1229_v34 }
 0x809   : > { %2191 = vrsqrt.f32 %v1066_v39  ;;  %v2006_v39 = vpack.c.bf16 %v1236_v37, %v1234_v36 }
 0x813   : > { %v2192_v41 = vpop.eup %2191 }
 0x814   : > { %v1068_v43 = vmul.f32 %v2192_v41, %v1065_v40  ;;  %v1233_v40 = vld [vmem:[#allocation16 + $0xe0] sm:$0xff]  ;;  %v1235_v41 = vld [vmem:[#allocation16 + $0xf0] sm:$0xff] }
 0x816   : > { %v1073_v45 = vmul.f32 %v1588_v42, %v1068_v43  ;;  %v2008_v42 = vpack.c.bf16 %v1235_v41, %v1233_v40 }
 0x818   : > { %v1078_v46 = vadd.f32 %v1589_v44, %v1073_v45 }
 0x81a   : > { %1856 = vmatmul.mubr.f32.vlgmr.msra.gmra.mrb[4].mxu0 %v1078_v46  ;;  %v1079_v57 = vadd.f32 %v1078_v46, %v3124_v3  ;;  %v1984_v3 = vpack.c.bf16 %v1211_v7, %v1209_v6 }
 0x81c   : > { %1985 = vmatpush1.bf16.msra.mxu1 %v1984_v3  ;;  %v1319_v3 = vld [vmem:[%s475_s7] sm:$0xff] }
 0x81d   : > { %1987 = vmatprep.subr.bf16.mxu1 %v1986_v1  ;;  %v1320_v9 = vmul.f32 %v1319_v3, %v1319_v3 }
 0x81f   : > { %v1321_v11 = vmul.f32 0.5, %v1320_v9  ;;  %v1333_v14 = vmul.f32 2.2699965e-05, %v1320_v9 }
 0x820   : > { %1989 = vmatpush1.bf16.msra.mxu1 %v1988_v12 }
 0x821   : > { %1991 = vmatprep.subr.bf16.mxu1 %v1990_v15  ;;  %v1322_v16 = vsub.f32 -2.8160586, %v1321_v11 }
 0x824   : > { %1993 = vmatpush1.bf16.msra.mxu1 %v1992_v18  ;;  %v1334_v18 = vsub.f32 -8.221523, %v1333_v14 }
 0x825   : > { %1995 = vmatprep.subr.bf16.mxu1 %v1994_v21 }
 0x828   : > { %1997 = vmatpush1.bf16.msra.mxu1 %v1996_v25 }
 0x829   : > { %1999 = vmatprep.subr.bf16.mxu1 %v1998_v22 }
 0x82c   : > { %2001 = vmatpush1.bf16.msra.mxu1 %v2000_v32 }
 0x82d   : > { %2003 = vmatprep.subr.bf16.mxu1 %v2002_v33 }
 0x830   : > { %2005 = vmatpush1.bf16.msra.mxu1 %v2004_v38 }
 0x831   : > { %2007 = vmatprep.subr.bf16.mxu1 %v2006_v39 }
 0x834   : > { %2009 = vmatpush1.bf16.msra.mxu1 %v2008_v42 }
 0x8ed   : > { %v1167_v56 = vpop.f32.mrb[4].mxu0 }
 0x8ee   : > { %v1168_v58 = vadd.f32 %v1590_v55, %v1167_v56  ;;  %v1857_v59 = vpop.f32.mrb[5].mxu0  ;;  %v1238_v56 = vlaneseq }
 0x8ef   : > { %v1204_v59 = vld [vmem:[#allocation19] sm:$0x3] }
 0x8f0   : > { %v1171_v60 = vadd.f32 %v1168_v58, %v1079_v57  ;;  %v1239_v57 = vshrl.u32 %v1238_v56, 7 }
 0x8f2   : > { %v1591_v61 = vmul.f32 -1.442695, %v1171_v60  ;;  %v1244_v58 = vsub.s32 1, %v1239_v57 }
 0x8f4   : > { %2193 = vpow2.f32 %v1591_v61 }
 0x8fe   : > { %v2194_v62 = vpop.eup %2193 }
 0x8ff   : > { %v1175_v63 = vadd.f32 1.0, %v2194_v62  ;;  %v1240_v62 = vsub.s32 0, %v1239_v57 }
 0x901   : > { %2195 = vrcp.f32 %v1175_v63  ;;  %v1241_v6 = vrot.slane %v1204_v59, %v1240_v62 }
 0x90b   : > { %v2196_v2 = vpop.eup %2195 }
 0x90c   : > { %v3134_v4 = vmul.f32 %v2196_v2, %v1171_v60  ;;  %v1245_v60 = vrot.slane %v1204_v59, %v1244_v58 }
 0x90e   : > { %1181 = vadd.xlane.f32.xlu1 %v3134_v4  ;;  %v1184_v5 = vmul.f32 %v3134_v4, %v3134_v4 }
 0x912   : > { %1185 = vadd.xlane.f32.xlu1 %v1184_v5 }
 0x99b   : > { %v1182_v43 = vpop.xlane.xlu1 %1181 }
 0x99c   : > { %v1183_v44 = vmul.f32 0.03125, %v1182_v43 }
 0x99e   : > { %v1188_v46 = vmul.f32 %v1183_v44, %v1183_v44  ;;  %v1190_v49 = vsub.f32 %v3134_v4, %v1183_v44 }
 0x99f   : > { %v1186_v45 = vpop.xlane.xlu1 %1185 }
 0x9a0   : > { %v1187_v47 = vmul.f32 0.03125, %v1186_v45 }
 0x9a2   : > { %v1189_v48 = vsub.f32 %v1187_v47, %v1188_v46 }
 0x9a4   : > { %v1191_v0 = vadd.f32 0.1, %v1189_v48 }
 0x9a6   : > { %2197 = vrsqrt.f32 %v1191_v0 }
 0x9b0   : > { %v2198_v50 = vpop.eup %2197 }
 0x9b1   : > { %v1193_v52 = vmul.f32 %v2198_v50, %v1190_v49 }
 0x9b3   : > { %v1198_v54 = vmul.f32 %v1592_v51, %v1193_v52 }
 0x9b5   : > { %v1203_v55 = vadd.f32 %v1593_v53, %v1198_v54 }
 0x9b7   : > { %1313 = vmatmul.mubr.f32.vlgmr.msra.gmra.mrb[4].mxu1 %v1203_v55 }
 0xa8a   : > { %v1314_v61 = vpop.f32.mrb[4].mxu1 }
 0xa8b   : > { %v1316_v63 = vpop.f32.mrb[5].mxu1  ;;  %v1315_v7 = vadd.f32 %v1314_v61, %v1241_v6 }
 0xa8c   : > { %v1317_v2 = vadd.f32 %v1316_v63, %v1245_v60 }
 0xa8d   : > { %v1323_v8 = vsub.f32 %v1319_v3, %v1315_v7 }
 0xa8e   : > { %v1326_v5 = vsub.f32 0.0, %v1317_v2  ;;  %v1324_v12 = vadd.f32 1.837877, %v1317_v2 }
 0xa8f   : > { %v1325_v1 = vmul.f32 %v1323_v8, %v1323_v8 }
 0xa90   : > { %v1327_v4 = vmul.f32 1.442695, %v1326_v5 }
 0xa92   : > { %2199 = vpow2.f32 %v1327_v4 }
 0xa9c   : > { %v2200_v10 = vpop.eup %2199 }
 0xa9d   : > { %v1329_v13 = vmul.f32 %v2200_v10, %v1325_v1 }
 0xa9f   : > { %v1330_v15 = vadd.f32 %v1329_v13, %v1324_v12 }
 0xaa1   : > { %v1331_v17 = vmul.f32 -0.5, %v1330_v15 }
 0xaa3   : > { %v1332_v19 = vadd.f32 -0.2876821, %v1331_v17 }
 0xaa5   : > { %v1335_v20 = vmax.f32 %v1322_v16, %v1332_v19 }
 0xaa7   : > { %v1336_v21 = vmax.f32 %v1335_v20, %v1334_v18 }
 0xaa9   : > { %v1337_v23 = vsub.f32 %v1322_v16, %v1336_v21  ;;  %v1340_v24 = vsub.f32 %v1332_v19, %v1336_v21  ;;  %v1344_v25 = vsub.f32 %v1334_v18, %v1336_v21 }
 0xaab   : > { %v1338_v26 = vmul.f32 1.442695, %v1337_v23  ;;  %v1341_v27 = vmul.f32 1.442695, %v1340_v24  ;;  %v1345_v28 = vmul.f32 1.442695, %v1344_v25 }
 0xaad   : > { %2201 = vpow2.f32 %v1338_v26 }
 0xaae   : > { %2203 = vpow2.f32 %v1341_v27 }
 0xaaf   : > { %2205 = vpow2.f32 %v1345_v28 }
 0xab7   : > { %v2202_v22 = vpop.eup %2201 }
 0xab8   : > { %v2204_v29 = vpop.eup %2203 }
 0xab9   : > { %v1343_v30 = vadd.f32 %v2204_v29, %v2202_v22  ;;  %v2206_v31 = vpop.eup %2205 }
 0xabb   : > { %v1347_v32 = vadd.f32 %v2206_v31, %v1343_v30 }
 0xabd   : > { %2207 = vlog2.f32 %v1347_v32 }
 0xac7   : > { %v2208_v33 = vpop.eup %2207 }
 0xac8   : > { %v1349_v34 = vmul.f32 0.6931472, %v2208_v33 }
 0xaca   : > { %v1350_v35 = vadd.f32 %v1349_v34, %v1336_v21 }
 0xacc   : > { %1351 = vst [vmem:[%s548_s26] sm:$0xff] %v1350_v35 }
 0xacd   : > { %2506 = shalt.err (!%p2503_p8)
}
 0xace   : > { %s2507_s5 = scalar_lea.hbm %s3147_s25, 128  ;;  %s2511_s23 = scalar_lea.hbm %s3260_s3, 256 }
 0xacf   : > { %p2508_p3 = scmp.ne.s32.totalorder %s3147_s25, %s2507_s5  ;;  %p2512_p13 = scmp.lt.u32.totalorder %s3147_s25, %s3260_s3 }
 0xad0   : > { %p2513_p4 = scmp.lt.u32.totalorder %s2511_s23, %s2507_s5  ;;  %p2515_p0 = scmp.lt.u32.totalorder %s2507_s5, %s3147_s25 }
 0xad1   : > { %p2509_p12 = pnand %p2508_p3, %p3261_p7 }
 0xad2   : > { %p2514_p9 = por %p2513_p4, %p2512_p13 }
 0xad3   : > { %p2510_p6 = pneg %p2509_p12 }
 0xad4   : > { %p2516_p11 = por %p2515_p0, %p2514_p9 }
 0xad6   : > { %p2517_p2 = pnand %p2516_p11, %p2510_p6 }
 0xad8   : > { %2520 = shalt.err (!%p2517_p2)
}
 0xad9   : > { %2046 = dma.vmem_to_hbm [thread:$0]  (%p3261_p7), %s3149_s12, 128, %s3147_s25, %s1353_s30  }
 0xada PF: > { %s1378_s24 = sand.u32 1, %s2579_s13   ;;  %p3262_p10 = scmp.ne.s32.totalorder %s3243_s10, 0 }
 0xadb   : > { %p3263_p1 = scmp.ge.s32.totalorder %s2599_s18, 2  ;;  %s1379_s26 = scalar_lea.sflag [#allocation6], %s1378_s24 }
 0xadd   : > { %p2081_p5 = pnand %p3263_p1, %p3262_p10 }
 0xadf   : > { %2574 = dma.done.wait (!%p2081_p5), %s1379_s26, 128  }
 0xae0   : > { %2576 = vsyncadd (!%p2081_p5), %s1379_s26, 4294967168  ;;  %s33_s18 = sadd.s32 1, %s2599_s18   ;;  %s3264_s13 = smov %s2583_s14 }
 0xae1   : > { %p30_p8 = scmp.ge.s32.totalorder %s33_s18, 4   ;;  %s3265_s14 = smov %s2587_s15 }
 0xae2   : > { %s3266_s15 = smov %s2951_s27  ;;  %s3267_s16 = smov %s2595_s17 }
 0xae3   : > { %s3268_s17 = smov %s3270_s1  ;;  %32 = sbr.rel (!%p30_p8) target bundleno = 21 (0x15), region = 159 }
 0xaea   :  { %1384 = vsyncpa [#allocation5], 1 }
 0xaeb   :  { %1386 = vsyncpa [#allocation5 + $0x1], 1 }
 0xaec   :  { %1387 = vsyncpa [#allocation8], 1 }
 0xaed   :  { %1389 = vsyncpa [#allocation8 + $0x1], 1 }
 0xaee   :  { %1390 = vsyncpa [#allocation11], 1 }
 0xaef   :  { %1391 = vsyncpa [#allocation14], 1 }
 0xaf0   :  { %1392 = vsyncpa [#allocation17], 1 }
 0xaf1   :  { %1393 = vsyncpa [#allocation20], 1 }
 0xaf2   :  { %1394 = vsyncpa [#allocation6], 1 }
 0xaf3   :  { %1396 = vsyncpa [#allocation6 + $0x1], 1 }

</bundles_post_ra>
